<compile_context>
chip_gen: v6e
topology: v6e:2x2x1
jax: 0.10.0
libtpu: 0.0.40
codegen_flags: <defaults>
</compile_context>

<pallas_src>
import numpy as np
import jax
import jax.numpy as jnp
from jax import lax
from jax.experimental import pallas as pl
from jax.experimental.pallas import tpu as pltpu

SOS_token = 1

H = 32            # hidden size
V = 32            # vocab size (== H so the output projection packs into w_post)
T = 8             # input sequence length
N_LAYERS = 1      # decoder.n_layers
MAX_LENGTH = 5

GATE = 128        # lane stride per GRU gate block (>= 2*H, multiple of 128 so
GW = 3 * GATE     # every per-gate slice in-kernel starts on a vreg boundary)

VMEM_SPEC = pl.BlockSpec(memory_space=pltpu.MemorySpace.VMEM)


# ----------------------------------------------------------------------------
# Fused Pallas kernel: bidirectional GRU encoder + greedy attention decoder
# ----------------------------------------------------------------------------
def _greedy_decode_kernel(tok_in_ref, emb_ref, wg_ref, wp_ref, b_ref,
                          tok_ref, score_ref):
    f32, bf16 = jnp.float32, jnp.bfloat16
    seq_len = tok_in_ref.shape[0]
    vocab, hidden = emb_ref.shape
    max_len = tok_ref.shape[1]
    two_h = 2 * hidden

    def mm(a, b):
        return jnp.dot(a, b, preferred_element_type=f32)

    emb_tab = emb_ref[...]                                           # (V, H) bf16

    # ---- encoder input embedding: in-kernel one-hot gather -------------------
    vpos = lax.broadcasted_iota(jnp.int32, (seq_len, vocab), 1)
    onehot_in = (vpos == tok_in_ref[...]).astype(f32).astype(bf16)   # (T, V)
    emb_seq = mm(onehot_in, emb_tab).astype(bf16)                    # (T, H)

    # ---- encoder: hoist x@Wih (+bih) out of the recurrence --------------------
    wih_f = wg_ref[0][:hidden, :]        # (H, GW) bf16  fwd lanes of each block
    wih_b = wg_ref[1][:hidden, :]        # (H, GW) bf16  bwd lanes of each block
    whh_fb = wg_ref[2]                   # (2H, GW) bf16 block-diagonal fwd|bwd
    gi_f = mm(emb_seq, wih_f) + b_ref[0]                             # (T, GW)
    gi_b = mm(emb_seq, wih_b)                                        # (T, GW)
    bhh_enc = b_ref[1]                                               # (1, GW)

    # fused bidirectional recurrence: h_cat = [h_fwd | h_bwd], ONE MXU dot/step
    h_cat = jnp.zeros((1, two_h), f32)
    h_steps = []
    for t in range(seq_len):
        tb = seq_len - 1 - t
        gi = gi_f[t:t + 1, :] + gi_b[tb:tb + 1, :]       # precomputed, off-chain
        gh = mm(h_cat.astype(bf16), whh_fb) + bhh_enc    # fused-gate, both dirs
        r = jax.nn.sigmoid(gi[:, 0:two_h] + gh[:, 0:two_h])
        z = jax.nn.sigmoid(gi[:, GATE:GATE + two_h] + gh[:, GATE:GATE + two_h])
        n = jnp.tanh(gi[:, 2 * GATE:2 * GATE + two_h]
                     + r * gh[:, 2 * GATE:2 * GATE + two_h])
        h_cat = (1.0 - z) * n + z * h_cat
        h_steps.append(h_cat)

    # ---- assemble encoder outputs AFTER the recurrence (not loop-carried) -----
    rows = lax.broadcasted_iota(jnp.int32, (seq_len, two_h), 0)
    hs = jnp.zeros((seq_len, two_h), f32)
    for t in range(seq_len):
        hs = hs + jnp.where(rows == t, h_steps[t], 0.0)              # (T, 2H)

    # enc_out[t] = h_fwd(step t) + h_bwd(step T-1-t); bwd half is picked and
    # row-reversed with tiny 0/1 matmuls (keeps lane movement off the VPU/XLU
    # critical path and avoids unaligned lane slicing).
    r64 = lax.broadcasted_iota(jnp.int32, (two_h, hidden), 0)
    c64 = lax.broadcasted_iota(jnp.int32, (two_h, hidden), 1)
    sel_b = (r64 == c64 + hidden).astype(f32)                        # (2H, H)
    rT = lax.broadcasted_iota(jnp.int32, (seq_len, seq_len), 0)
    cT = lax.broadcasted_iota(jnp.int32, (seq_len, seq_len), 1)
    rev = (cT == seq_len - 1 - rT).astype(f32)                       # (T, T)
    enc_out = hs[:, :hidden] + mm(rev, mm(hs, sel_b))                # (T, H) f32

    # ---- decoder-loop invariants (hoisted) ------------------------------------
    eye_h = (lax.broadcasted_iota(jnp.int32, (hidden, hidden), 0)
             == lax.broadcasted_iota(jnp.int32, (hidden, hidden), 1)).astype(f32)
    enc_out_t = lax.dot_general(eye_h, enc_out, (((1,), (1,)), ((), ())),
                                preferred_element_type=f32).astype(bf16)  # (H,T)
    wc1 = wp_ref[0]                                                  # (H, H) bf16
    wc2 = wp_ref[1]                                                  # (H, H) bf16
    wo = wp_ref[2]                                                   # (H, V) bf16
    # (attn @ enc_out) @ wc2  ==  attn @ (enc_out @ wc2): fold into one dot/step
    enc_wc2 = mm(enc_out.astype(bf16), wc2).astype(bf16)             # (T, H)
    bc = b_ref[4][:, :hidden]                                        # (1, H)
    bo = b_ref[5][:, :vocab]                                         # (1, V)

    # decoder GRU: fold embedding + input projection + bias into one table so
    # gi = onehot @ e_gi is a single dot (onehot has exactly one 1 => bias ok)
    wih_d = wg_ref[3][:hidden, :]                                    # (H, GW)
    whh_d = wg_ref[3][hidden:, :]                                    # (H, GW)
    e_gi = (mm(emb_tab, wih_d) + b_ref[2]).astype(bf16)              # (V, GW)
    bhh_d = b_ref[3]                                                 # (1, GW)

    # ---- greedy attention decoder (n_layers = 1) ------------------------------
    h_d = h_cat[:, :hidden]                      # encoder fwd final hidden (f32)
    vocab_ids = lax.broadcasted_iota(jnp.int32, (1, vocab), 1)
    pos_ids = lax.broadcasted_iota(jnp.int32, (1, max_len), 1)
    toks = jnp.zeros((1, max_len), jnp.int32)
    scores = jnp.zeros((1, max_len), f32)
    tok = jnp.full((1, 1), SOS_token, jnp.int32)

    for i in range(max_len):
        onehot = (vocab_ids == tok).astype(f32).astype(bf16)         # (1, V)
        gi = mm(onehot, e_gi)                                        # (1, GW)
        gh = mm(h_d.astype(bf16), whh_d) + bhh_d                     # (1, GW)
        r = jax.nn.sigmoid(gi[:, 0:hidden] + gh[:, 0:hidden])
        z = jax.nn.sigmoid(gi[:, GATE:GATE + hidden] + gh[:, GATE:GATE + hidden])
        n = jnp.tanh(gi[:, 2 * GATE:2 * GATE + hidden]
                     + r * gh[:, 2 * GATE:2 * GATE + hidden])
        h_d = (1.0 - z) * n + z * h_d                                # (1, H) f32
        h_bf = h_d.astype(bf16)

        # Luong "dot" attention, RHS pre-transposed outside the loop
        e = mm(h_bf, enc_out_t)                                      # (1, T)
        e = e - jnp.max(e, axis=1, keepdims=True)
        ew = jnp.exp(e)
        attn = ew * pl.reciprocal(jnp.sum(ew, axis=1, keepdims=True), approx=True)
        ctx_wc2 = mm(attn.astype(bf16), enc_wc2)                     # context @ Wc2
        co = jnp.tanh(mm(h_bf, wc1) + ctx_wc2 + bc)                  # (1, H)
        logits = mm(co.astype(bf16), wo) + bo                        # (1, V)

        # greedy max over softmax(logits) without materializing it:
        #   score = 1 / sum(exp(logits - max(logits)))   (exact)
        m = jnp.max(logits, axis=1, keepdims=True)
        denom = jnp.sum(jnp.exp(logits - m), axis=1, keepdims=True)
        score = pl.reciprocal(denom)                                 # exact recip
        tok = jnp.min(jnp.where(logits == m, vocab_ids, vocab),
                      axis=1, keepdims=True)                         # first argmax

        toks = jnp.where(pos_ids == i, tok, toks)
        scores = jnp.where(pos_ids == i, score, scores)

    # single lane-contiguous store of all tokens / scores at the end
    tok_ref[...] = toks
    score_ref[...] = scores


# ----------------------------------------------------------------------------
# Wrapper (single pallas_call; everything incl. the embedding gather is fused)
# ----------------------------------------------------------------------------
def greedy_search_decode(params, input_seq, input_length, max_length):
    # TODO(synk): input_length / pack_padded_sequence masking has no clean Pallas
    # equivalent here; the full fixed-length sequence is encoded and attended over.
    del input_length
    tokens_in = input_seq.astype(jnp.int32)                          # (T, 1)

    tokens, scores = pl.pallas_call(
        _greedy_decode_kernel,
        out_shape=(jax.ShapeDtypeStruct((1, max_length), jnp.int32),
                   jax.ShapeDtypeStruct((1, max_length), jnp.float32)),
        in_specs=[VMEM_SPEC] * 5,
        out_specs=(VMEM_SPEC, VMEM_SPEC),
        compiler_params=pltpu.CompilerParams(vmem_limit_bytes=32 * 1024 * 1024),
    )(tokens_in, params["emb_tab"], params["w_gates"], params["w_post"],
      params["biases"])

    # PyTorch returns int64 "long" tokens; int32 here (fine for V=32).
    return tokens[0], scores[0]


# ----------------------------------------------------------------------------
# Deterministic parameter init + packing (shapes follow the PyTorch modules)
# ----------------------------------------------------------------------------
def init_params(key):
    ks = jax.random.split(key, 8)

    def w(k, shape):
        return np.asarray(0.1 * jax.random.normal(k, shape), np.float32)

    def gru_raw(k):
        k1, k2, k3, k4 = jax.random.split(k, 4)
        # PyTorch layout: weight_ih/hh (3H, H) gates stacked [r; z; n], bias (3H,)
        return (w(k1, (3 * H, H)), w(k2, (3 * H, H)),
                w(k3, (3 * H,)), w(k4, (3 * H,)))

    emb = w(ks[0], (V, H))
    enc_f = gru_raw(ks[1])
    enc_b = gru_raw(ks[2])
    dec = gru_raw(ks[3])
    wc = w(ks[4], (H, 2 * H))            # nn.Linear(2H, H).weight
    bc = w(ks[5], (H,))
    wo = w(ks[6], (V, H))                # nn.Linear(H, V).weight
    bo = w(ks[7], (V,))

    def gate_w(wmat, off):
        # torch (3H, H_in) -> (H_in, GW): gate g transposed into the 128-lane
        # block g at column offset `off` (fwd -> 0, bwd -> H)
        out = np.zeros((wmat.shape[1], GW), np.float32)
        for g in range(3):
            out[:, g * GATE + off:g * GATE + off + H] = wmat[g * H:(g + 1) * H, :].T
        return out

    def gate_b(bvec, off):
        out = np.zeros((1, GW), np.float32)
        for g in range(3):
            out[0, g * GATE + off:g * GATE + off + H] = bvec[g * H:(g + 1) * H]
        return out

    w_gates = np.zeros((4, 2 * H, GW), np.float32)
    w_gates[0, :H] = gate_w(enc_f[0], 0)          # enc Wih fwd
    w_gates[1, :H] = gate_w(enc_b[0], H)          # enc Wih bwd
    w_gates[2, :H] = gate_w(enc_f[1], 0)          # enc Whh block-diag: fwd rows
    w_gates[2, H:] = gate_w(enc_b[1], H)          #                     bwd rows
    w_gates[3, :H] = gate_w(dec[0], 0)            # dec Wih
    w_gates[3, H:] = gate_w(dec[1], 0)            # dec Whh

    biases = np.zeros((6, 1, GW), np.float32)
    biases[0] = gate_b(enc_f[2], 0) + gate_b(enc_b[2], H)    # enc bih (both dirs)
    biases[1] = gate_b(enc_f[3], 0) + gate_b(enc_b[3], H)    # enc bhh (both dirs)
    biases[2] = gate_b(dec[2], 0)                            # dec bih
    biases[3] = gate_b(dec[3], 0)                            # dec bhh
    biases[4, 0, :H] = bc
    biases[5, 0, :V] = bo

    # post-GRU projections: [wc1 (multiplies rnn_out), wc2 (multiplies context),
    # wo^T]; packing as (3, H, H) relies on V == H (true in this config).
    w_post = np.stack([wc[:, :H].T, wc[:, H:].T, wo.T], axis=0)

    return {
        "emb_tab": jnp.asarray(emb, jnp.bfloat16),
        "w_gates": jnp.asarray(w_gates, jnp.bfloat16),
        "w_post": jnp.asarray(w_post, jnp.bfloat16),
        "biases": jnp.asarray(biases, jnp.float32),
    }


if __name__ == "__main__":
    key = jax.random.PRNGKey(0)
    pkey, skey = jax.random.split(key)
    params = init_params(pkey)

    input_seq = jax.random.randint(skey, (T, 1), 2, V, dtype=jnp.int32)   # (seq_len, batch=1)
    input_length = jnp.array([T], dtype=jnp.int32)

    decode = jax.jit(greedy_search_decode, static_argnums=(3,))
    all_tokens, all_scores = decode(params, input_seq, input_length, MAX_LENGTH)
    (all_tokens, all_scores) = jax.block_until_ready((all_tokens, all_scores))

    assert all_tokens.shape == (MAX_LENGTH,) and all_tokens.dtype == jnp.int32
    assert all_scores.shape == (MAX_LENGTH,) and all_scores.dtype == jnp.float32
    assert bool(jnp.all(all_scores > 0.0)) and bool(jnp.all(all_scores <= 1.0))
    assert bool(jnp.all((all_tokens >= 0) & (all_tokens < V)))
    print("KERNEL_OK")
</pallas_src>

<mosaic_0001>
module attributes {stable_mosaic.version = 11 : i64} {
  func.func @_greedy_decode_kernel(%arg0: memref<8x1xi32, #tpu.memory_space<vmem>>, %arg1: memref<32x32xbf16, #tpu.memory_space<vmem>>, %arg2: memref<4x64x384xbf16, #tpu.memory_space<vmem>>, %arg3: memref<3x32x32xbf16, #tpu.memory_space<vmem>>, %arg4: memref<6x1x384xf32, #tpu.memory_space<vmem>>, %arg5: memref<1x5xi32, #tpu.memory_space<vmem>>, %arg6: memref<1x5xf32, #tpu.memory_space<vmem>>) attributes {dimension_semantics = [], scalar_prefetch = 0 : i64, scratch_operands = 0 : i64, tpu.core_type = #tpu.core_type<tc>} {
    %c0 = arith.constant 0 : index
    %c0_0 = arith.constant 0 : index
    %0 = vector.load %arg1[%c0, %c0_0] : memref<32x32xbf16, #tpu.memory_space<vmem>>, vector<32x32xbf16>
    %1 = tpu.iota {dimensions = array<i32: 1>} : vector<8x32xi32>
    %c0_1 = arith.constant 0 : index
    %c0_2 = arith.constant 0 : index
    %2 = vector.load %arg0[%c0_1, %c0_2] : memref<8x1xi32, #tpu.memory_space<vmem>>, vector<8x1xi32>
    %3 = vector.broadcast %2 : vector<8x1xi32> to vector<8x32xi32>
    %4 = arith.cmpi eq, %1, %3 : vector<8x32xi32>
    %5 = arith.extui %4 : vector<8x32xi1> to vector<8x32xi32>
    %6 = arith.sitofp %5 : vector<8x32xi32> to vector<8x32xf32>
    %7 = arith.truncf %6 : vector<8x32xf32> to vector<8x32xbf16>
    %cst = arith.constant dense<0.000000e+00> : vector<8x32xf32>
    %8 = tpu.matmul %7, %0, %cst {dimension_numbers = #tpu.dot_dimension_numbers<[1], [0], [0], [1], [0, 0, 1, 1], [], []>} : vector<8x32xbf16>, vector<32x32xbf16>, vector<8x32xf32> -> vector<8x32xf32>
    %9 = arith.truncf %8 : vector<8x32xf32> to vector<8x32xbf16>
    %c0_3 = arith.constant 0 : index
    %c0_4 = arith.constant 0 : index
    %c0_5 = arith.constant 0 : index
    %10 = vector.load %arg2[%c0_3, %c0_4, %c0_5] : memref<4x64x384xbf16, #tpu.memory_space<vmem>>, vector<1x64x384xbf16>
    %11 = vector.shape_cast %10 : vector<1x64x384xbf16> to vector<64x384xbf16>
    %12 = vector.extract_strided_slice %11 {offsets = [0, 0], sizes = [32, 384], strides = [1, 1]} : vector<64x384xbf16> to vector<32x384xbf16>
    %c1 = arith.constant 1 : index
    %c0_6 = arith.constant 0 : index
    %c0_7 = arith.constant 0 : index
    %13 = vector.load %arg2[%c1, %c0_6, %c0_7] : memref<4x64x384xbf16, #tpu.memory_space<vmem>>, vector<1x64x384xbf16>
    %14 = vector.shape_cast %13 : vector<1x64x384xbf16> to vector<64x384xbf16>
    %15 = vector.extract_strided_slice %14 {offsets = [0, 0], sizes = [32, 384], strides = [1, 1]} : vector<64x384xbf16> to vector<32x384xbf16>
    %c2 = arith.constant 2 : index
    %c0_8 = arith.constant 0 : index
    %c0_9 = arith.constant 0 : index
    %16 = vector.load %arg2[%c2, %c0_8, %c0_9] : memref<4x64x384xbf16, #tpu.memory_space<vmem>>, vector<1x64x384xbf16>
    %17 = vector.shape_cast %16 : vector<1x64x384xbf16> to vector<64x384xbf16>
    %cst_10 = arith.constant dense<0.000000e+00> : vector<8x384xf32>
    %18 = tpu.matmul %9, %12, %cst_10 {dimension_numbers = #tpu.dot_dimension_numbers<[1], [0], [0], [1], [0, 0, 1, 1], [], []>} : vector<8x32xbf16>, vector<32x384xbf16>, vector<8x384xf32> -> vector<8x384xf32>
    %c0_11 = arith.constant 0 : index
    %c0_12 = arith.constant 0 : index
    %c0_13 = arith.constant 0 : index
    %19 = vector.load %arg4[%c0_11, %c0_12, %c0_13] : memref<6x1x384xf32, #tpu.memory_space<vmem>>, vector<1x1x384xf32>
    %20 = vector.shape_cast %19 : vector<1x1x384xf32> to vector<1x384xf32>
    %21 = vector.broadcast %20 : vector<1x384xf32> to vector<8x384xf32>
    %22 = arith.addf %18, %21 : vector<8x384xf32>
    %cst_14 = arith.constant dense<0.000000e+00> : vector<8x384xf32>
    %23 = tpu.matmul %9, %15, %cst_14 {dimension_numbers = #tpu.dot_dimension_numbers<[1], [0], [0], [1], [0, 0, 1, 1], [], []>} : vector<8x32xbf16>, vector<32x384xbf16>, vector<8x384xf32> -> vector<8x384xf32>
    %c1_15 = arith.constant 1 : index
    %c0_16 = arith.constant 0 : index
    %c0_17 = arith.constant 0 : index
    %24 = vector.load %arg4[%c1_15, %c0_16, %c0_17] : memref<6x1x384xf32, #tpu.memory_space<vmem>>, vector<1x1x384xf32>
    %25 = vector.shape_cast %24 : vector<1x1x384xf32> to vector<1x384xf32>
    %cst_18 = arith.constant 0.000000e+00 : f32
    %26 = vector.broadcast %cst_18 : f32 to vector<1x64xf32>
    %27 = vector.extract_strided_slice %22 {offsets = [0, 0], sizes = [1, 384], strides = [1, 1]} : vector<8x384xf32> to vector<1x384xf32>
    %28 = vector.extract_strided_slice %23 {offsets = [7, 0], sizes = [1, 384], strides = [1, 1]} : vector<8x384xf32> to vector<1x384xf32>
    %29 = arith.addf %27, %28 : vector<1x384xf32>
    %30 = arith.truncf %26 : vector<1x64xf32> to vector<1x64xbf16>
    %cst_19 = arith.constant dense<0.000000e+00> : vector<1x384xf32>
    %31 = tpu.matmul %30, %17, %cst_19 {dimension_numbers = #tpu.dot_dimension_numbers<[1], [0], [0], [1], [0, 0, 1, 1], [], []>} : vector<1x64xbf16>, vector<64x384xbf16>, vector<1x384xf32> -> vector<1x384xf32>
    %32 = arith.addf %31, %25 : vector<1x384xf32>
    %33 = vector.extract_strided_slice %29 {offsets = [0, 0], sizes = [1, 64], strides = [1, 1]} : vector<1x384xf32> to vector<1x64xf32>
    %34 = vector.extract_strided_slice %32 {offsets = [0, 0], sizes = [1, 64], strides = [1, 1]} : vector<1x384xf32> to vector<1x64xf32>
    %35 = arith.addf %33, %34 : vector<1x64xf32>
    %36 = arith.negf %35 : vector<1x64xf32>
    %37 = math.exp %36 : vector<1x64xf32>
    %cst_20 = arith.constant 1.000000e+00 : f32
    %38 = vector.broadcast %cst_20 : f32 to vector<1x64xf32>
    %39 = arith.addf %38, %37 : vector<1x64xf32>
    %40 = arith.divf %38, %39 : vector<1x64xf32>
    %41 = vector.extract_strided_slice %29 {offsets = [0, 128], sizes = [1, 64], strides = [1, 1]} : vector<1x384xf32> to vector<1x64xf32>
    %42 = vector.extract_strided_slice %32 {offsets = [0, 128], sizes = [1, 64], strides = [1, 1]} : vector<1x384xf32> to vector<1x64xf32>
    %43 = arith.addf %41, %42 : vector<1x64xf32>
    %44 = arith.negf %43 : vector<1x64xf32>
    %45 = math.exp %44 : vector<1x64xf32>
    %cst_21 = arith.constant 1.000000e+00 : f32
    %46 = vector.broadcast %cst_21 : f32 to vector<1x64xf32>
    %47 = arith.addf %46, %45 : vector<1x64xf32>
    %48 = arith.divf %46, %47 : vector<1x64xf32>
    %49 = vector.extract_strided_slice %29 {offsets = [0, 256], sizes = [1, 64], strides = [1, 1]} : vector<1x384xf32> to vector<1x64xf32>
    %50 = vector.extract_strided_slice %32 {offsets = [0, 256], sizes = [1, 64], strides = [1, 1]} : vector<1x384xf32> to vector<1x64xf32>
    %51 = arith.mulf %40, %50 : vector<1x64xf32>
    %52 = arith.addf %49, %51 : vector<1x64xf32>
    %53 = math.tanh %52 : vector<1x64xf32>
    %cst_22 = arith.constant 1.000000e+00 : f32
    %54 = vector.broadcast %cst_22 : f32 to vector<1x64xf32>
    %55 = arith.subf %54, %48 : vector<1x64xf32>
    %56 = arith.mulf %55, %53 : vector<1x64xf32>
    %57 = arith.mulf %48, %26 : vector<1x64xf32>
    %58 = arith.addf %56, %57 : vector<1x64xf32>
    %59 = vector.extract_strided_slice %22 {offsets = [1, 0], sizes = [1, 384], strides = [1, 1]} : vector<8x384xf32> to vector<1x384xf32>
    %60 = vector.extract_strided_slice %23 {offsets = [6, 0], sizes = [1, 384], strides = [1, 1]} : vector<8x384xf32> to vector<1x384xf32>
    %61 = arith.addf %59, %60 : vector<1x384xf32>
    %62 = arith.truncf %58 : vector<1x64xf32> to vector<1x64xbf16>
    %cst_23 = arith.constant dense<0.000000e+00> : vector<1x384xf32>
    %63 = tpu.matmul %62, %17, %cst_23 {dimension_numbers = #tpu.dot_dimension_numbers<[1], [0], [0], [1], [0, 0, 1, 1], [], []>} : vector<1x64xbf16>, vector<64x384xbf16>, vector<1x384xf32> -> vector<1x384xf32>
    %64 = arith.addf %63, %25 : vector<1x384xf32>
    %65 = vector.extract_strided_slice %61 {offsets = [0, 0], sizes = [1, 64], strides = [1, 1]} : vector<1x384xf32> to vector<1x64xf32>
    %66 = vector.extract_strided_slice %64 {offsets = [0, 0], sizes = [1, 64], strides = [1, 1]} : vector<1x384xf32> to vector<1x64xf32>
    %67 = arith.addf %65, %66 : vector<1x64xf32>
    %68 = arith.negf %67 : vector<1x64xf32>
    %69 = math.exp %68 : vector<1x64xf32>
    %cst_24 = arith.constant 1.000000e+00 : f32
    %70 = vector.broadcast %cst_24 : f32 to vector<1x64xf32>
    %71 = arith.addf %70, %69 : vector<1x64xf32>
    %72 = arith.divf %70, %71 : vector<1x64xf32>
    %73 = vector.extract_strided_slice %61 {offsets = [0, 128], sizes = [1, 64], strides = [1, 1]} : vector<1x384xf32> to vector<1x64xf32>
    %74 = vector.extract_strided_slice %64 {offsets = [0, 128], sizes = [1, 64], strides = [1, 1]} : vector<1x384xf32> to vector<1x64xf32>
    %75 = arith.addf %73, %74 : vector<1x64xf32>
    %76 = arith.negf %75 : vector<1x64xf32>
    %77 = math.exp %76 : vector<1x64xf32>
    %cst_25 = arith.constant 1.000000e+00 : f32
    %78 = vector.broadcast %cst_25 : f32 to vector<1x64xf32>
    %79 = arith.addf %78, %77 : vector<1x64xf32>
    %80 = arith.divf %78, %79 : vector<1x64xf32>
    %81 = vector.extract_strided_slice %61 {offsets = [0, 256], sizes = [1, 64], strides = [1, 1]} : vector<1x384xf32> to vector<1x64xf32>
    %82 = vector.extract_strided_slice %64 {offsets = [0, 256], sizes = [1, 64], strides = [1, 1]} : vector<1x384xf32> to vector<1x64xf32>
    %83 = arith.mulf %72, %82 : vector<1x64xf32>
    %84 = arith.addf %81, %83 : vector<1x64xf32>
    %85 = math.tanh %84 : vector<1x64xf32>
    %cst_26 = arith.constant 1.000000e+00 : f32
    %86 = vector.broadcast %cst_26 : f32 to vector<1x64xf32>
    %87 = arith.subf %86, %80 : vector<1x64xf32>
    %88 = arith.mulf %87, %85 : vector<1x64xf32>
    %89 = arith.mulf %80, %58 : vector<1x64xf32>
    %90 = arith.addf %88, %89 : vector<1x64xf32>
    %91 = vector.extract_strided_slice %22 {offsets = [2, 0], sizes = [1, 384], strides = [1, 1]} : vector<8x384xf32> to vector<1x384xf32>
    %92 = vector.extract_strided_slice %23 {offsets = [5, 0], sizes = [1, 384], strides = [1, 1]} : vector<8x384xf32> to vector<1x384xf32>
    %93 = arith.addf %91, %92 : vector<1x384xf32>
    %94 = arith.truncf %90 : vector<1x64xf32> to vector<1x64xbf16>
    %cst_27 = arith.constant dense<0.000000e+00> : vector<1x384xf32>
    %95 = tpu.matmul %94, %17, %cst_27 {dimension_numbers = #tpu.dot_dimension_numbers<[1], [0], [0], [1], [0, 0, 1, 1], [], []>} : vector<1x64xbf16>, vector<64x384xbf16>, vector<1x384xf32> -> vector<1x384xf32>
    %96 = arith.addf %95, %25 : vector<1x384xf32>
    %97 = vector.extract_strided_slice %93 {offsets = [0, 0], sizes = [1, 64], strides = [1, 1]} : vector<1x384xf32> to vector<1x64xf32>
    %98 = vector.extract_strided_slice %96 {offsets = [0, 0], sizes = [1, 64], strides = [1, 1]} : vector<1x384xf32> to vector<1x64xf32>
    %99 = arith.addf %97, %98 : vector<1x64xf32>
    %100 = arith.negf %99 : vector<1x64xf32>
    %101 = math.exp %100 : vector<1x64xf32>
    %cst_28 = arith.constant 1.000000e+00 : f32
    %102 = vector.broadcast %cst_28 : f32 to vector<1x64xf32>
    %103 = arith.addf %102, %101 : vector<1x64xf32>
    %104 = arith.divf %102, %103 : vector<1x64xf32>
    %105 = vector.extract_strided_slice %93 {offsets = [0, 128], sizes = [1, 64], strides = [1, 1]} : vector<1x384xf32> to vector<1x64xf32>
    %106 = vector.extract_strided_slice %96 {offsets = [0, 128], sizes = [1, 64], strides = [1, 1]} : vector<1x384xf32> to vector<1x64xf32>
    %107 = arith.addf %105, %106 : vector<1x64xf32>
    %108 = arith.negf %107 : vector<1x64xf32>
    %109 = math.exp %108 : vector<1x64xf32>
    %cst_29 = arith.constant 1.000000e+00 : f32
    %110 = vector.broadcast %cst_29 : f32 to vector<1x64xf32>
    %111 = arith.addf %110, %109 : vector<1x64xf32>
    %112 = arith.divf %110, %111 : vector<1x64xf32>
    %113 = vector.extract_strided_slice %93 {offsets = [0, 256], sizes = [1, 64], strides = [1, 1]} : vector<1x384xf32> to vector<1x64xf32>
    %114 = vector.extract_strided_slice %96 {offsets = [0, 256], sizes = [1, 64], strides = [1, 1]} : vector<1x384xf32> to vector<1x64xf32>
    %115 = arith.mulf %104, %114 : vector<1x64xf32>
    %116 = arith.addf %113, %115 : vector<1x64xf32>
    %117 = math.tanh %116 : vector<1x64xf32>
    %cst_30 = arith.constant 1.000000e+00 : f32
    %118 = vector.broadcast %cst_30 : f32 to vector<1x64xf32>
    %119 = arith.subf %118, %112 : vector<1x64xf32>
    %120 = arith.mulf %119, %117 : vector<1x64xf32>
    %121 = arith.mulf %112, %90 : vector<1x64xf32>
    %122 = arith.addf %120, %121 : vector<1x64xf32>
    %123 = vector.extract_strided_slice %22 {offsets = [3, 0], sizes = [1, 384], strides = [1, 1]} : vector<8x384xf32> to vector<1x384xf32>
    %124 = vector.extract_strided_slice %23 {offsets = [4, 0], sizes = [1, 384], strides = [1, 1]} : vector<8x384xf32> to vector<1x384xf32>
    %125 = arith.addf %123, %124 : vector<1x384xf32>
    %126 = arith.truncf %122 : vector<1x64xf32> to vector<1x64xbf16>
    %cst_31 = arith.constant dense<0.000000e+00> : vector<1x384xf32>
    %127 = tpu.matmul %126, %17, %cst_31 {dimension_numbers = #tpu.dot_dimension_numbers<[1], [0], [0], [1], [0, 0, 1, 1], [], []>} : vector<1x64xbf16>, vector<64x384xbf16>, vector<1x384xf32> -> vector<1x384xf32>
    %128 = arith.addf %127, %25 : vector<1x384xf32>
    %129 = vector.extract_strided_slice %125 {offsets = [0, 0], sizes = [1, 64], strides = [1, 1]} : vector<1x384xf32> to vector<1x64xf32>
    %130 = vector.extract_strided_slice %128 {offsets = [0, 0], sizes = [1, 64], strides = [1, 1]} : vector<1x384xf32> to vector<1x64xf32>
    %131 = arith.addf %129, %130 : vector<1x64xf32>
    %132 = arith.negf %131 : vector<1x64xf32>
    %133 = math.exp %132 : vector<1x64xf32>
    %cst_32 = arith.constant 1.000000e+00 : f32
    %134 = vector.broadcast %cst_32 : f32 to vector<1x64xf32>
    %135 = arith.addf %134, %133 : vector<1x64xf32>
    %136 = arith.divf %134, %135 : vector<1x64xf32>
    %137 = vector.extract_strided_slice %125 {offsets = [0, 128], sizes = [1, 64], strides = [1, 1]} : vector<1x384xf32> to vector<1x64xf32>
    %138 = vector.extract_strided_slice %128 {offsets = [0, 128], sizes = [1, 64], strides = [1, 1]} : vector<1x384xf32> to vector<1x64xf32>
    %139 = arith.addf %137, %138 : vector<1x64xf32>
    %140 = arith.negf %139 : vector<1x64xf32>
    %141 = math.exp %140 : vector<1x64xf32>
    %cst_33 = arith.constant 1.000000e+00 : f32
    %142 = vector.broadcast %cst_33 : f32 to vector<1x64xf32>
    %143 = arith.addf %142, %141 : vector<1x64xf32>
    %144 = arith.divf %142, %143 : vector<1x64xf32>
    %145 = vector.extract_strided_slice %125 {offsets = [0, 256], sizes = [1, 64], strides = [1, 1]} : vector<1x384xf32> to vector<1x64xf32>
    %146 = vector.extract_strided_slice %128 {offsets = [0, 256], sizes = [1, 64], strides = [1, 1]} : vector<1x384xf32> to vector<1x64xf32>
    %147 = arith.mulf %136, %146 : vector<1x64xf32>
    %148 = arith.addf %145, %147 : vector<1x64xf32>
    %149 = math.tanh %148 : vector<1x64xf32>
    %cst_34 = arith.constant 1.000000e+00 : f32
    %150 = vector.broadcast %cst_34 : f32 to vector<1x64xf32>
    %151 = arith.subf %150, %144 : vector<1x64xf32>
    %152 = arith.mulf %151, %149 : vector<1x64xf32>
    %153 = arith.mulf %144, %122 : vector<1x64xf32>
    %154 = arith.addf %152, %153 : vector<1x64xf32>
    %155 = vector.extract_strided_slice %22 {offsets = [4, 0], sizes = [1, 384], strides = [1, 1]} : vector<8x384xf32> to vector<1x384xf32>
    %156 = vector.extract_strided_slice %23 {offsets = [3, 0], sizes = [1, 384], strides = [1, 1]} : vector<8x384xf32> to vector<1x384xf32>
    %157 = arith.addf %155, %156 : vector<1x384xf32>
    %158 = arith.truncf %154 : vector<1x64xf32> to vector<1x64xbf16>
    %cst_35 = arith.constant dense<0.000000e+00> : vector<1x384xf32>
    %159 = tpu.matmul %158, %17, %cst_35 {dimension_numbers = #tpu.dot_dimension_numbers<[1], [0], [0], [1], [0, 0, 1, 1], [], []>} : vector<1x64xbf16>, vector<64x384xbf16>, vector<1x384xf32> -> vector<1x384xf32>
    %160 = arith.addf %159, %25 : vector<1x384xf32>
    %161 = vector.extract_strided_slice %157 {offsets = [0, 0], sizes = [1, 64], strides = [1, 1]} : vector<1x384xf32> to vector<1x64xf32>
    %162 = vector.extract_strided_slice %160 {offsets = [0, 0], sizes = [1, 64], strides = [1, 1]} : vector<1x384xf32> to vector<1x64xf32>
    %163 = arith.addf %161, %162 : vector<1x64xf32>
    %164 = arith.negf %163 : vector<1x64xf32>
    %165 = math.exp %164 : vector<1x64xf32>
    %cst_36 = arith.constant 1.000000e+00 : f32
    %166 = vector.broadcast %cst_36 : f32 to vector<1x64xf32>
    %167 = arith.addf %166, %165 : vector<1x64xf32>
    %168 = arith.divf %166, %167 : vector<1x64xf32>
    %169 = vector.extract_strided_slice %157 {offsets = [0, 128], sizes = [1, 64], strides = [1, 1]} : vector<1x384xf32> to vector<1x64xf32>
    %170 = vector.extract_strided_slice %160 {offsets = [0, 128], sizes = [1, 64], strides = [1, 1]} : vector<1x384xf32> to vector<1x64xf32>
    %171 = arith.addf %169, %170 : vector<1x64xf32>
    %172 = arith.negf %171 : vector<1x64xf32>
    %173 = math.exp %172 : vector<1x64xf32>
    %cst_37 = arith.constant 1.000000e+00 : f32
    %174 = vector.broadcast %cst_37 : f32 to vector<1x64xf32>
    %175 = arith.addf %174, %173 : vector<1x64xf32>
    %176 = arith.divf %174, %175 : vector<1x64xf32>
    %177 = vector.extract_strided_slice %157 {offsets = [0, 256], sizes = [1, 64], strides = [1, 1]} : vector<1x384xf32> to vector<1x64xf32>
    %178 = vector.extract_strided_slice %160 {offsets = [0, 256], sizes = [1, 64], strides = [1, 1]} : vector<1x384xf32> to vector<1x64xf32>
    %179 = arith.mulf %168, %178 : vector<1x64xf32>
    %180 = arith.addf %177, %179 : vector<1x64xf32>
    %181 = math.tanh %180 : vector<1x64xf32>
    %cst_38 = arith.constant 1.000000e+00 : f32
    %182 = vector.broadcast %cst_38 : f32 to vector<1x64xf32>
    %183 = arith.subf %182, %176 : vector<1x64xf32>
    %184 = arith.mulf %183, %181 : vector<1x64xf32>
    %185 = arith.mulf %176, %154 : vector<1x64xf32>
    %186 = arith.addf %184, %185 : vector<1x64xf32>
    %187 = vector.extract_strided_slice %22 {offsets = [5, 0], sizes = [1, 384], strides = [1, 1]} : vector<8x384xf32> to vector<1x384xf32>
    %188 = vector.extract_strided_slice %23 {offsets = [2, 0], sizes = [1, 384], strides = [1, 1]} : vector<8x384xf32> to vector<1x384xf32>
    %189 = arith.addf %187, %188 : vector<1x384xf32>
    %190 = arith.truncf %186 : vector<1x64xf32> to vector<1x64xbf16>
    %cst_39 = arith.constant dense<0.000000e+00> : vector<1x384xf32>
    %191 = tpu.matmul %190, %17, %cst_39 {dimension_numbers = #tpu.dot_dimension_numbers<[1], [0], [0], [1], [0, 0, 1, 1], [], []>} : vector<1x64xbf16>, vector<64x384xbf16>, vector<1x384xf32> -> vector<1x384xf32>
    %192 = arith.addf %191, %25 : vector<1x384xf32>
    %193 = vector.extract_strided_slice %189 {offsets = [0, 0], sizes = [1, 64], strides = [1, 1]} : vector<1x384xf32> to vector<1x64xf32>
    %194 = vector.extract_strided_slice %192 {offsets = [0, 0], sizes = [1, 64], strides = [1, 1]} : vector<1x384xf32> to vector<1x64xf32>
    %195 = arith.addf %193, %194 : vector<1x64xf32>
    %196 = arith.negf %195 : vector<1x64xf32>
    %197 = math.exp %196 : vector<1x64xf32>
    %cst_40 = arith.constant 1.000000e+00 : f32
    %198 = vector.broadcast %cst_40 : f32 to vector<1x64xf32>
    %199 = arith.addf %198, %197 : vector<1x64xf32>
    %200 = arith.divf %198, %199 : vector<1x64xf32>
    %201 = vector.extract_strided_slice %189 {offsets = [0, 128], sizes = [1, 64], strides = [1, 1]} : vector<1x384xf32> to vector<1x64xf32>
    %202 = vector.extract_strided_slice %192 {offsets = [0, 128], sizes = [1, 64], strides = [1, 1]} : vector<1x384xf32> to vector<1x64xf32>
    %203 = arith.addf %201, %202 : vector<1x64xf32>
    %204 = arith.negf %203 : vector<1x64xf32>
    %205 = math.exp %204 : vector<1x64xf32>
    %cst_41 = arith.constant 1.000000e+00 : f32
    %206 = vector.broadcast %cst_41 : f32 to vector<1x64xf32>
    %207 = arith.addf %206, %205 : vector<1x64xf32>
    %208 = arith.divf %206, %207 : vector<1x64xf32>
    %209 = vector.extract_strided_slice %189 {offsets = [0, 256], sizes = [1, 64], strides = [1, 1]} : vector<1x384xf32> to vector<1x64xf32>
    %210 = vector.extract_strided_slice %192 {offsets = [0, 256], sizes = [1, 64], strides = [1, 1]} : vector<1x384xf32> to vector<1x64xf32>
    %211 = arith.mulf %200, %210 : vector<1x64xf32>
    %212 = arith.addf %209, %211 : vector<1x64xf32>
    %213 = math.tanh %212 : vector<1x64xf32>
    %cst_42 = arith.constant 1.000000e+00 : f32
    %214 = vector.broadcast %cst_42 : f32 to vector<1x64xf32>
    %215 = arith.subf %214, %208 : vector<1x64xf32>
    %216 = arith.mulf %215, %213 : vector<1x64xf32>
    %217 = arith.mulf %208, %186 : vector<1x64xf32>
    %218 = arith.addf %216, %217 : vector<1x64xf32>
    %219 = vector.extract_strided_slice %22 {offsets = [6, 0], sizes = [1, 384], strides = [1, 1]} : vector<8x384xf32> to vector<1x384xf32>
    %220 = vector.extract_strided_slice %23 {offsets = [1, 0], sizes = [1, 384], strides = [1, 1]} : vector<8x384xf32> to vector<1x384xf32>
    %221 = arith.addf %219, %220 : vector<1x384xf32>
    %222 = arith.truncf %218 : vector<1x64xf32> to vector<1x64xbf16>
    %cst_43 = arith.constant dense<0.000000e+00> : vector<1x384xf32>
    %223 = tpu.matmul %222, %17, %cst_43 {dimension_numbers = #tpu.dot_dimension_numbers<[1], [0], [0], [1], [0, 0, 1, 1], [], []>} : vector<1x64xbf16>, vector<64x384xbf16>, vector<1x384xf32> -> vector<1x384xf32>
    %224 = arith.addf %223, %25 : vector<1x384xf32>
    %225 = vector.extract_strided_slice %221 {offsets = [0, 0], sizes = [1, 64], strides = [1, 1]} : vector<1x384xf32> to vector<1x64xf32>
    %226 = vector.extract_strided_slice %224 {offsets = [0, 0], sizes = [1, 64], strides = [1, 1]} : vector<1x384xf32> to vector<1x64xf32>
    %227 = arith.addf %225, %226 : vector<1x64xf32>
    %228 = arith.negf %227 : vector<1x64xf32>
    %229 = math.exp %228 : vector<1x64xf32>
    %cst_44 = arith.constant 1.000000e+00 : f32
    %230 = vector.broadcast %cst_44 : f32 to vector<1x64xf32>
    %231 = arith.addf %230, %229 : vector<1x64xf32>
    %232 = arith.divf %230, %231 : vector<1x64xf32>
    %233 = vector.extract_strided_slice %221 {offsets = [0, 128], sizes = [1, 64], strides = [1, 1]} : vector<1x384xf32> to vector<1x64xf32>
    %234 = vector.extract_strided_slice %224 {offsets = [0, 128], sizes = [1, 64], strides = [1, 1]} : vector<1x384xf32> to vector<1x64xf32>
    %235 = arith.addf %233, %234 : vector<1x64xf32>
    %236 = arith.negf %235 : vector<1x64xf32>
    %237 = math.exp %236 : vector<1x64xf32>
    %cst_45 = arith.constant 1.000000e+00 : f32
    %238 = vector.broadcast %cst_45 : f32 to vector<1x64xf32>
    %239 = arith.addf %238, %237 : vector<1x64xf32>
    %240 = arith.divf %238, %239 : vector<1x64xf32>
    %241 = vector.extract_strided_slice %221 {offsets = [0, 256], sizes = [1, 64], strides = [1, 1]} : vector<1x384xf32> to vector<1x64xf32>
    %242 = vector.extract_strided_slice %224 {offsets = [0, 256], sizes = [1, 64], strides = [1, 1]} : vector<1x384xf32> to vector<1x64xf32>
    %243 = arith.mulf %232, %242 : vector<1x64xf32>
    %244 = arith.addf %241, %243 : vector<1x64xf32>
    %245 = math.tanh %244 : vector<1x64xf32>
    %cst_46 = arith.constant 1.000000e+00 : f32
    %246 = vector.broadcast %cst_46 : f32 to vector<1x64xf32>
    %247 = arith.subf %246, %240 : vector<1x64xf32>
    %248 = arith.mulf %247, %245 : vector<1x64xf32>
    %249 = arith.mulf %240, %218 : vector<1x64xf32>
    %250 = arith.addf %248, %249 : vector<1x64xf32>
    %251 = vector.extract_strided_slice %22 {offsets = [7, 0], sizes = [1, 384], strides = [1, 1]} : vector<8x384xf32> to vector<1x384xf32>
    %252 = vector.extract_strided_slice %23 {offsets = [0, 0], sizes = [1, 384], strides = [1, 1]} : vector<8x384xf32> to vector<1x384xf32>
    %253 = arith.addf %251, %252 : vector<1x384xf32>
    %254 = arith.truncf %250 : vector<1x64xf32> to vector<1x64xbf16>
    %cst_47 = arith.constant dense<0.000000e+00> : vector<1x384xf32>
    %255 = tpu.matmul %254, %17, %cst_47 {dimension_numbers = #tpu.dot_dimension_numbers<[1], [0], [0], [1], [0, 0, 1, 1], [], []>} : vector<1x64xbf16>, vector<64x384xbf16>, vector<1x384xf32> -> vector<1x384xf32>
    %256 = arith.addf %255, %25 : vector<1x384xf32>
    %257 = vector.extract_strided_slice %253 {offsets = [0, 0], sizes = [1, 64], strides = [1, 1]} : vector<1x384xf32> to vector<1x64xf32>
    %258 = vector.extract_strided_slice %256 {offsets = [0, 0], sizes = [1, 64], strides = [1, 1]} : vector<1x384xf32> to vector<1x64xf32>
    %259 = arith.addf %257, %258 : vector<1x64xf32>
    %260 = arith.negf %259 : vector<1x64xf32>
    %261 = math.exp %260 : vector<1x64xf32>
    %cst_48 = arith.constant 1.000000e+00 : f32
    %262 = vector.broadcast %cst_48 : f32 to vector<1x64xf32>
    %263 = arith.addf %262, %261 : vector<1x64xf32>
    %264 = arith.divf %262, %263 : vector<1x64xf32>
    %265 = vector.extract_strided_slice %253 {offsets = [0, 128], sizes = [1, 64], strides = [1, 1]} : vector<1x384xf32> to vector<1x64xf32>
    %266 = vector.extract_strided_slice %256 {offsets = [0, 128], sizes = [1, 64], strides = [1, 1]} : vector<1x384xf32> to vector<1x64xf32>
    %267 = arith.addf %265, %266 : vector<1x64xf32>
    %268 = arith.negf %267 : vector<1x64xf32>
    %269 = math.exp %268 : vector<1x64xf32>
    %cst_49 = arith.constant 1.000000e+00 : f32
    %270 = vector.broadcast %cst_49 : f32 to vector<1x64xf32>
    %271 = arith.addf %270, %269 : vector<1x64xf32>
    %272 = arith.divf %270, %271 : vector<1x64xf32>
    %273 = vector.extract_strided_slice %253 {offsets = [0, 256], sizes = [1, 64], strides = [1, 1]} : vector<1x384xf32> to vector<1x64xf32>
    %274 = vector.extract_strided_slice %256 {offsets = [0, 256], sizes = [1, 64], strides = [1, 1]} : vector<1x384xf32> to vector<1x64xf32>
    %275 = arith.mulf %264, %274 : vector<1x64xf32>
    %276 = arith.addf %273, %275 : vector<1x64xf32>
    %277 = math.tanh %276 : vector<1x64xf32>
    %cst_50 = arith.constant 1.000000e+00 : f32
    %278 = vector.broadcast %cst_50 : f32 to vector<1x64xf32>
    %279 = arith.subf %278, %272 : vector<1x64xf32>
    %280 = arith.mulf %279, %277 : vector<1x64xf32>
    %281 = arith.mulf %272, %250 : vector<1x64xf32>
    %282 = arith.addf %280, %281 : vector<1x64xf32>
    %283 = tpu.iota {dimensions = array<i32: 0>} : vector<8x64xi32>
    %cst_51 = arith.constant 0.000000e+00 : f32
    %284 = vector.broadcast %cst_51 : f32 to vector<8x64xf32>
    %c0_i32 = arith.constant 0 : i32
    %285 = vector.broadcast %c0_i32 : i32 to vector<8x64xi32>
    %286 = arith.cmpi eq, %283, %285 : vector<8x64xi32>
    %cst_52 = arith.constant 0.000000e+00 : f32
    %287 = vector.shape_cast %58 : vector<1x64xf32> to vector<1x64xf32>
    %288 = vector.broadcast %287 : vector<1x64xf32> to vector<8x64xf32>
    %289 = vector.broadcast %cst_52 : f32 to vector<8x64xf32>
    %290 = arith.select %286, %288, %289 : vector<8x64xi1>, vector<8x64xf32>
    %291 = arith.addf %284, %290 : vector<8x64xf32>
    %c1_i32 = arith.constant 1 : i32
    %292 = vector.broadcast %c1_i32 : i32 to vector<8x64xi32>
    %293 = arith.cmpi eq, %283, %292 : vector<8x64xi32>
    %cst_53 = arith.constant 0.000000e+00 : f32
    %294 = vector.shape_cast %90 : vector<1x64xf32> to vector<1x64xf32>
    %295 = vector.broadcast %294 : vector<1x64xf32> to vector<8x64xf32>
    %296 = vector.broadcast %cst_53 : f32 to vector<8x64xf32>
    %297 = arith.select %293, %295, %296 : vector<8x64xi1>, vector<8x64xf32>
    %298 = arith.addf %291, %297 : vector<8x64xf32>
    %c2_i32 = arith.constant 2 : i32
    %299 = vector.broadcast %c2_i32 : i32 to vector<8x64xi32>
    %300 = arith.cmpi eq, %283, %299 : vector<8x64xi32>
    %cst_54 = arith.constant 0.000000e+00 : f32
    %301 = vector.shape_cast %122 : vector<1x64xf32> to vector<1x64xf32>
    %302 = vector.broadcast %301 : vector<1x64xf32> to vector<8x64xf32>
    %303 = vector.broadcast %cst_54 : f32 to vector<8x64xf32>
    %304 = arith.select %300, %302, %303 : vector<8x64xi1>, vector<8x64xf32>
    %305 = arith.addf %298, %304 : vector<8x64xf32>
    %c3_i32 = arith.constant 3 : i32
    %306 = vector.broadcast %c3_i32 : i32 to vector<8x64xi32>
    %307 = arith.cmpi eq, %283, %306 : vector<8x64xi32>
    %cst_55 = arith.constant 0.000000e+00 : f32
    %308 = vector.shape_cast %154 : vector<1x64xf32> to vector<1x64xf32>
    %309 = vector.broadcast %308 : vector<1x64xf32> to vector<8x64xf32>
    %310 = vector.broadcast %cst_55 : f32 to vector<8x64xf32>
    %311 = arith.select %307, %309, %310 : vector<8x64xi1>, vector<8x64xf32>
    %312 = arith.addf %305, %311 : vector<8x64xf32>
    %c4_i32 = arith.constant 4 : i32
    %313 = vector.broadcast %c4_i32 : i32 to vector<8x64xi32>
    %314 = arith.cmpi eq, %283, %313 : vector<8x64xi32>
    %cst_56 = arith.constant 0.000000e+00 : f32
    %315 = vector.shape_cast %186 : vector<1x64xf32> to vector<1x64xf32>
    %316 = vector.broadcast %315 : vector<1x64xf32> to vector<8x64xf32>
    %317 = vector.broadcast %cst_56 : f32 to vector<8x64xf32>
    %318 = arith.select %314, %316, %317 : vector<8x64xi1>, vector<8x64xf32>
    %319 = arith.addf %312, %318 : vector<8x64xf32>
    %c5_i32 = arith.constant 5 : i32
    %320 = vector.broadcast %c5_i32 : i32 to vector<8x64xi32>
    %321 = arith.cmpi eq, %283, %320 : vector<8x64xi32>
    %cst_57 = arith.constant 0.000000e+00 : f32
    %322 = vector.shape_cast %218 : vector<1x64xf32> to vector<1x64xf32>
    %323 = vector.broadcast %322 : vector<1x64xf32> to vector<8x64xf32>
    %324 = vector.broadcast %cst_57 : f32 to vector<8x64xf32>
    %325 = arith.select %321, %323, %324 : vector<8x64xi1>, vector<8x64xf32>
    %326 = arith.addf %319, %325 : vector<8x64xf32>
    %c6_i32 = arith.constant 6 : i32
    %327 = vector.broadcast %c6_i32 : i32 to vector<8x64xi32>
    %328 = arith.cmpi eq, %283, %327 : vector<8x64xi32>
    %cst_58 = arith.constant 0.000000e+00 : f32
    %329 = vector.shape_cast %250 : vector<1x64xf32> to vector<1x64xf32>
    %330 = vector.broadcast %329 : vector<1x64xf32> to vector<8x64xf32>
    %331 = vector.broadcast %cst_58 : f32 to vector<8x64xf32>
    %332 = arith.select %328, %330, %331 : vector<8x64xi1>, vector<8x64xf32>
    %333 = arith.addf %326, %332 : vector<8x64xf32>
    %c7_i32 = arith.constant 7 : i32
    %334 = vector.broadcast %c7_i32 : i32 to vector<8x64xi32>
    %335 = arith.cmpi eq, %283, %334 : vector<8x64xi32>
    %cst_59 = arith.constant 0.000000e+00 : f32
    %336 = vector.shape_cast %282 : vector<1x64xf32> to vector<1x64xf32>
    %337 = vector.broadcast %336 : vector<1x64xf32> to vector<8x64xf32>
    %338 = vector.broadcast %cst_59 : f32 to vector<8x64xf32>
    %339 = arith.select %335, %337, %338 : vector<8x64xi1>, vector<8x64xf32>
    %340 = arith.addf %333, %339 : vector<8x64xf32>
    %341 = tpu.iota {dimensions = array<i32: 0>} : vector<64x32xi32>
    %342 = tpu.iota {dimensions = array<i32: 1>} : vector<64x32xi32>
    %c32_i32 = arith.constant 32 : i32
    %343 = vector.broadcast %c32_i32 : i32 to vector<64x32xi32>
    %344 = arith.addi %342, %343 : vector<64x32xi32>
    %345 = arith.cmpi eq, %341, %344 : vector<64x32xi32>
    %346 = arith.extui %345 : vector<64x32xi1> to vector<64x32xi32>
    %347 = arith.sitofp %346 : vector<64x32xi32> to vector<64x32xf32>
    %348 = tpu.iota {dimensions = array<i32: 0>} : vector<8x8xi32>
    %349 = tpu.iota {dimensions = array<i32: 1>} : vector<8x8xi32>
    %c7_i32_60 = arith.constant 7 : i32
    %350 = vector.broadcast %c7_i32_60 : i32 to vector<8x8xi32>
    %351 = arith.subi %350, %348 : vector<8x8xi32>
    %352 = arith.cmpi eq, %349, %351 : vector<8x8xi32>
    %353 = arith.extui %352 : vector<8x8xi1> to vector<8x8xi32>
    %354 = arith.sitofp %353 : vector<8x8xi32> to vector<8x8xf32>
    %355 = vector.extract_strided_slice %340 {offsets = [0, 0], sizes = [8, 32], strides = [1, 1]} : vector<8x64xf32> to vector<8x32xf32>
    %cst_61 = arith.constant dense<0.000000e+00> : vector<8x32xf32>
    %356 = tpu.matmul %340, %347, %cst_61 {dimension_numbers = #tpu.dot_dimension_numbers<[1], [0], [0], [1], [0, 0, 1, 1], [], []>} : vector<8x64xf32>, vector<64x32xf32>, vector<8x32xf32> -> vector<8x32xf32>
    %cst_62 = arith.constant dense<0.000000e+00> : vector<8x32xf32>
    %357 = tpu.matmul %354, %356, %cst_62 {dimension_numbers = #tpu.dot_dimension_numbers<[1], [0], [0], [1], [0, 0, 1, 1], [], []>} : vector<8x8xf32>, vector<8x32xf32>, vector<8x32xf32> -> vector<8x32xf32>
    %358 = arith.addf %355, %357 : vector<8x32xf32>
    %359 = tpu.iota {dimensions = array<i32: 0>} : vector<32x32xi32>
    %360 = tpu.iota {dimensions = array<i32: 1>} : vector<32x32xi32>
    %361 = arith.cmpi eq, %359, %360 : vector<32x32xi32>
    %362 = arith.extui %361 : vector<32x32xi1> to vector<32x32xi32>
    %363 = arith.sitofp %362 : vector<32x32xi32> to vector<32x32xf32>
    %cst_63 = arith.constant dense<0.000000e+00> : vector<32x8xf32>
    %364 = tpu.matmul %363, %358, %cst_63 {dimension_numbers = #tpu.dot_dimension_numbers<[1], [1], [0], [0], [0, 0, 1, 0], [], []>} : vector<32x32xf32>, vector<8x32xf32>, vector<32x8xf32> -> vector<32x8xf32>
    %365 = arith.truncf %364 : vector<32x8xf32> to vector<32x8xbf16>
    %c0_64 = arith.constant 0 : index
    %c0_65 = arith.constant 0 : index
    %c0_66 = arith.constant 0 : index
    %366 = vector.load %arg3[%c0_64, %c0_65, %c0_66] : memref<3x32x32xbf16, #tpu.memory_space<vmem>>, vector<1x32x32xbf16>
    %367 = vector.shape_cast %366 : vector<1x32x32xbf16> to vector<32x32xbf16>
    %c1_67 = arith.constant 1 : index
    %c0_68 = arith.constant 0 : index
    %c0_69 = arith.constant 0 : index
    %368 = vector.load %arg3[%c1_67, %c0_68, %c0_69] : memref<3x32x32xbf16, #tpu.memory_space<vmem>>, vector<1x32x32xbf16>
    %369 = vector.shape_cast %368 : vector<1x32x32xbf16> to vector<32x32xbf16>
    %c2_70 = arith.constant 2 : index
    %c0_71 = arith.constant 0 : index
    %c0_72 = arith.constant 0 : index
    %370 = vector.load %arg3[%c2_70, %c0_71, %c0_72] : memref<3x32x32xbf16, #tpu.memory_space<vmem>>, vector<1x32x32xbf16>
    %371 = vector.shape_cast %370 : vector<1x32x32xbf16> to vector<32x32xbf16>
    %372 = arith.truncf %358 : vector<8x32xf32> to vector<8x32xbf16>
    %cst_73 = arith.constant dense<0.000000e+00> : vector<8x32xf32>
    %373 = tpu.matmul %372, %369, %cst_73 {dimension_numbers = #tpu.dot_dimension_numbers<[1], [0], [0], [1], [0, 0, 1, 1], [], []>} : vector<8x32xbf16>, vector<32x32xbf16>, vector<8x32xf32> -> vector<8x32xf32>
    %374 = arith.truncf %373 : vector<8x32xf32> to vector<8x32xbf16>
    %c4 = arith.constant 4 : index
    %c0_74 = arith.constant 0 : index
    %c0_75 = arith.constant 0 : index
    %375 = vector.load %arg4[%c4, %c0_74, %c0_75] : memref<6x1x384xf32, #tpu.memory_space<vmem>>, vector<1x1x384xf32>
    %376 = vector.shape_cast %375 : vector<1x1x384xf32> to vector<1x384xf32>
    %377 = vector.extract_strided_slice %376 {offsets = [0, 0], sizes = [1, 32], strides = [1, 1]} : vector<1x384xf32> to vector<1x32xf32>
    %c5 = arith.constant 5 : index
    %c0_76 = arith.constant 0 : index
    %c0_77 = arith.constant 0 : index
    %378 = vector.load %arg4[%c5, %c0_76, %c0_77] : memref<6x1x384xf32, #tpu.memory_space<vmem>>, vector<1x1x384xf32>
    %379 = vector.shape_cast %378 : vector<1x1x384xf32> to vector<1x384xf32>
    %380 = vector.extract_strided_slice %379 {offsets = [0, 0], sizes = [1, 32], strides = [1, 1]} : vector<1x384xf32> to vector<1x32xf32>
    %c3 = arith.constant 3 : index
    %c0_78 = arith.constant 0 : index
    %c0_79 = arith.constant 0 : index
    %381 = vector.load %arg2[%c3, %c0_78, %c0_79] : memref<4x64x384xbf16, #tpu.memory_space<vmem>>, vector<1x64x384xbf16>
    %382 = vector.shape_cast %381 : vector<1x64x384xbf16> to vector<64x384xbf16>
    %383 = vector.extract_strided_slice %382 {offsets = [0, 0], sizes = [32, 384], strides = [1, 1]} : vector<64x384xbf16> to vector<32x384xbf16>
    %c3_80 = arith.constant 3 : index
    %c0_81 = arith.constant 0 : index
    %c0_82 = arith.constant 0 : index
    %384 = vector.load %arg2[%c3_80, %c0_81, %c0_82] : memref<4x64x384xbf16, #tpu.memory_space<vmem>>, vector<1x64x384xbf16>
    %385 = vector.shape_cast %384 : vector<1x64x384xbf16> to vector<64x384xbf16>
    %386 = vector.extract_strided_slice %385 {offsets = [32, 0], sizes = [32, 384], strides = [1, 1]} : vector<64x384xbf16> to vector<32x384xbf16>
    %cst_83 = arith.constant dense<0.000000e+00> : vector<32x384xf32>
    %387 = tpu.matmul %0, %383, %cst_83 {dimension_numbers = #tpu.dot_dimension_numbers<[1], [0], [0], [1], [0, 0, 1, 1], [], []>} : vector<32x32xbf16>, vector<32x384xbf16>, vector<32x384xf32> -> vector<32x384xf32>
    %c2_84 = arith.constant 2 : index
    %c0_85 = arith.constant 0 : index
    %c0_86 = arith.constant 0 : index
    %388 = vector.load %arg4[%c2_84, %c0_85, %c0_86] : memref<6x1x384xf32, #tpu.memory_space<vmem>>, vector<1x1x384xf32>
    %389 = vector.shape_cast %388 : vector<1x1x384xf32> to vector<1x384xf32>
    %390 = vector.broadcast %389 : vector<1x384xf32> to vector<32x384xf32>
    %391 = arith.addf %387, %390 : vector<32x384xf32>
    %392 = arith.truncf %391 : vector<32x384xf32> to vector<32x384xbf16>
    %c3_87 = arith.constant 3 : index
    %c0_88 = arith.constant 0 : index
    %c0_89 = arith.constant 0 : index
    %393 = vector.load %arg4[%c3_87, %c0_88, %c0_89] : memref<6x1x384xf32, #tpu.memory_space<vmem>>, vector<1x1x384xf32>
    %394 = vector.shape_cast %393 : vector<1x1x384xf32> to vector<1x384xf32>
    %395 = vector.extract_strided_slice %282 {offsets = [0, 0], sizes = [1, 32], strides = [1, 1]} : vector<1x64xf32> to vector<1x32xf32>
    %396 = tpu.iota {dimensions = array<i32: 1>} : vector<1x32xi32>
    %397 = tpu.iota {dimensions = array<i32: 1>} : vector<1x5xi32>
    %c0_i32_90 = arith.constant 0 : i32
    %398 = vector.broadcast %c0_i32_90 : i32 to vector<1x5xi32>
    %cst_91 = arith.constant 0.000000e+00 : f32
    %399 = vector.broadcast %cst_91 : f32 to vector<1x5xf32>
    %c1_i32_92 = arith.constant 1 : i32
    %400 = vector.broadcast %c1_i32_92 : i32 to vector<1x1xi32>
    %401 = vector.broadcast %400 : vector<1x1xi32> to vector<1x32xi32>
    %402 = arith.cmpi eq, %396, %401 : vector<1x32xi32>
    %403 = arith.extui %402 : vector<1x32xi1> to vector<1x32xi32>
    %404 = arith.sitofp %403 : vector<1x32xi32> to vector<1x32xf32>
    %405 = arith.truncf %404 : vector<1x32xf32> to vector<1x32xbf16>
    %cst_93 = arith.constant dense<0.000000e+00> : vector<1x384xf32>
    %406 = tpu.matmul %405, %392, %cst_93 {dimension_numbers = #tpu.dot_dimension_numbers<[1], [0], [0], [1], [0, 0, 1, 1], [], []>} : vector<1x32xbf16>, vector<32x384xbf16>, vector<1x384xf32> -> vector<1x384xf32>
    %407 = arith.truncf %395 : vector<1x32xf32> to vector<1x32xbf16>
    %cst_94 = arith.constant dense<0.000000e+00> : vector<1x384xf32>
    %408 = tpu.matmul %407, %386, %cst_94 {dimension_numbers = #tpu.dot_dimension_numbers<[1], [0], [0], [1], [0, 0, 1, 1], [], []>} : vector<1x32xbf16>, vector<32x384xbf16>, vector<1x384xf32> -> vector<1x384xf32>
    %409 = arith.addf %408, %394 : vector<1x384xf32>
    %410 = vector.extract_strided_slice %406 {offsets = [0, 0], sizes = [1, 32], strides = [1, 1]} : vector<1x384xf32> to vector<1x32xf32>
    %411 = vector.extract_strided_slice %409 {offsets = [0, 0], sizes = [1, 32], strides = [1, 1]} : vector<1x384xf32> to vector<1x32xf32>
    %412 = arith.addf %410, %411 : vector<1x32xf32>
    %413 = arith.negf %412 : vector<1x32xf32>
    %414 = math.exp %413 : vector<1x32xf32>
    %cst_95 = arith.constant 1.000000e+00 : f32
    %415 = vector.broadcast %cst_95 : f32 to vector<1x32xf32>
    %416 = arith.addf %415, %414 : vector<1x32xf32>
    %417 = arith.divf %415, %416 : vector<1x32xf32>
    %418 = vector.extract_strided_slice %406 {offsets = [0, 128], sizes = [1, 32], strides = [1, 1]} : vector<1x384xf32> to vector<1x32xf32>
    %419 = vector.extract_strided_slice %409 {offsets = [0, 128], sizes = [1, 32], strides = [1, 1]} : vector<1x384xf32> to vector<1x32xf32>
    %420 = arith.addf %418, %419 : vector<1x32xf32>
    %421 = arith.negf %420 : vector<1x32xf32>
    %422 = math.exp %421 : vector<1x32xf32>
    %cst_96 = arith.constant 1.000000e+00 : f32
    %423 = vector.broadcast %cst_96 : f32 to vector<1x32xf32>
    %424 = arith.addf %423, %422 : vector<1x32xf32>
    %425 = arith.divf %423, %424 : vector<1x32xf32>
    %426 = vector.extract_strided_slice %406 {offsets = [0, 256], sizes = [1, 32], strides = [1, 1]} : vector<1x384xf32> to vector<1x32xf32>
    %427 = vector.extract_strided_slice %409 {offsets = [0, 256], sizes = [1, 32], strides = [1, 1]} : vector<1x384xf32> to vector<1x32xf32>
    %428 = arith.mulf %417, %427 : vector<1x32xf32>
    %429 = arith.addf %426, %428 : vector<1x32xf32>
    %430 = math.tanh %429 : vector<1x32xf32>
    %cst_97 = arith.constant 1.000000e+00 : f32
    %431 = vector.broadcast %cst_97 : f32 to vector<1x32xf32>
    %432 = arith.subf %431, %425 : vector<1x32xf32>
    %433 = arith.mulf %432, %430 : vector<1x32xf32>
    %434 = arith.mulf %425, %395 : vector<1x32xf32>
    %435 = arith.addf %433, %434 : vector<1x32xf32>
    %436 = arith.truncf %435 : vector<1x32xf32> to vector<1x32xbf16>
    %cst_98 = arith.constant dense<0.000000e+00> : vector<1x8xf32>
    %437 = tpu.matmul %436, %365, %cst_98 {dimension_numbers = #tpu.dot_dimension_numbers<[1], [0], [0], [1], [0, 0, 1, 1], [], []>} : vector<1x32xbf16>, vector<32x8xbf16>, vector<1x8xf32> -> vector<1x8xf32>
    %cst_99 = arith.constant dense<0xFF800000> : vector<1xf32>
    %438 = vector.multi_reduction <maximumf>, %437, %cst_99 [1] : vector<1x8xf32> to vector<1xf32>
    %439 = vector.shape_cast %438 : vector<1xf32> to vector<1x1xf32>
    %440 = vector.broadcast %439 : vector<1x1xf32> to vector<1x8xf32>
    %441 = arith.subf %437, %440 : vector<1x8xf32>
    %442 = math.exp %441 : vector<1x8xf32>
    %cst_100 = arith.constant dense<0.000000e+00> : vector<1xf32>
    %443 = vector.multi_reduction <add>, %442, %cst_100 [1] : vector<1x8xf32> to vector<1xf32>
    %444 = vector.shape_cast %443 : vector<1xf32> to vector<1x1xf32>
    %445 = tpu.reciprocal %444 {approx = true} : vector<1x1xf32> -> vector<1x1xf32>
    %446 = vector.broadcast %445 : vector<1x1xf32> to vector<1x8xf32>
    %447 = arith.mulf %442, %446 : vector<1x8xf32>
    %448 = arith.truncf %447 : vector<1x8xf32> to vector<1x8xbf16>
    %cst_101 = arith.constant dense<0.000000e+00> : vector<1x32xf32>
    %449 = tpu.matmul %448, %374, %cst_101 {dimension_numbers = #tpu.dot_dimension_numbers<[1], [0], [0], [1], [0, 0, 1, 1], [], []>} : vector<1x8xbf16>, vector<8x32xbf16>, vector<1x32xf32> -> vector<1x32xf32>
    %cst_102 = arith.constant dense<0.000000e+00> : vector<1x32xf32>
    %450 = tpu.matmul %436, %367, %cst_102 {dimension_numbers = #tpu.dot_dimension_numbers<[1], [0], [0], [1], [0, 0, 1, 1], [], []>} : vector<1x32xbf16>, vector<32x32xbf16>, vector<1x32xf32> -> vector<1x32xf32>
    %451 = arith.addf %450, %449 : vector<1x32xf32>
    %452 = arith.addf %451, %377 : vector<1x32xf32>
    %453 = math.tanh %452 : vector<1x32xf32>
    %454 = arith.truncf %453 : vector<1x32xf32> to vector<1x32xbf16>
    %cst_103 = arith.constant dense<0.000000e+00> : vector<1x32xf32>
    %455 = tpu.matmul %454, %371, %cst_103 {dimension_numbers = #tpu.dot_dimension_numbers<[1], [0], [0], [1], [0, 0, 1, 1], [], []>} : vector<1x32xbf16>, vector<32x32xbf16>, vector<1x32xf32> -> vector<1x32xf32>
    %456 = arith.addf %455, %380 : vector<1x32xf32>
    %cst_104 = arith.constant dense<0xFF800000> : vector<1xf32>
    %457 = vector.multi_reduction <maximumf>, %456, %cst_104 [1] : vector<1x32xf32> to vector<1xf32>
    %458 = vector.shape_cast %457 : vector<1xf32> to vector<1x1xf32>
    %459 = vector.broadcast %458 : vector<1x1xf32> to vector<1x32xf32>
    %460 = arith.subf %456, %459 : vector<1x32xf32>
    %461 = math.exp %460 : vector<1x32xf32>
    %cst_105 = arith.constant dense<0.000000e+00> : vector<1xf32>
    %462 = vector.multi_reduction <add>, %461, %cst_105 [1] : vector<1x32xf32> to vector<1xf32>
    %463 = vector.shape_cast %462 : vector<1xf32> to vector<1x1xf32>
    %464 = tpu.reciprocal %463 : vector<1x1xf32> -> vector<1x1xf32>
    %465 = vector.broadcast %458 : vector<1x1xf32> to vector<1x32xf32>
    %466 = arith.cmpf oeq, %456, %465 : vector<1x32xf32>
    %c32_i32_106 = arith.constant 32 : i32
    %467 = vector.broadcast %c32_i32_106 : i32 to vector<1x32xi32>
    %468 = arith.select %466, %396, %467 : vector<1x32xi1>, vector<1x32xi32>
    %cst_107 = arith.constant dense<2147483647> : vector<1xi32>
    %469 = vector.multi_reduction <minsi>, %468, %cst_107 [1] : vector<1x32xi32> to vector<1xi32>
    %470 = vector.shape_cast %469 : vector<1xi32> to vector<1x1xi32>
    %c0_i32_108 = arith.constant 0 : i32
    %471 = vector.broadcast %c0_i32_108 : i32 to vector<1x5xi32>
    %472 = arith.cmpi eq, %397, %471 : vector<1x5xi32>
    %473 = vector.shape_cast %470 : vector<1x1xi32> to vector<1x1xi32>
    %474 = vector.broadcast %473 : vector<1x1xi32> to vector<1x5xi32>
    %475 = arith.select %472, %474, %398 : vector<1x5xi1>, vector<1x5xi32>
    %c0_i32_109 = arith.constant 0 : i32
    %476 = vector.broadcast %c0_i32_109 : i32 to vector<1x5xi32>
    %477 = arith.cmpi eq, %397, %476 : vector<1x5xi32>
    %478 = vector.shape_cast %464 : vector<1x1xf32> to vector<1x1xf32>
    %479 = vector.broadcast %478 : vector<1x1xf32> to vector<1x5xf32>
    %480 = arith.select %477, %479, %399 : vector<1x5xi1>, vector<1x5xf32>
    %481 = vector.broadcast %470 : vector<1x1xi32> to vector<1x32xi32>
    %482 = arith.cmpi eq, %396, %481 : vector<1x32xi32>
    %483 = arith.extui %482 : vector<1x32xi1> to vector<1x32xi32>
    %484 = arith.sitofp %483 : vector<1x32xi32> to vector<1x32xf32>
    %485 = arith.truncf %484 : vector<1x32xf32> to vector<1x32xbf16>
    %cst_110 = arith.constant dense<0.000000e+00> : vector<1x384xf32>
    %486 = tpu.matmul %485, %392, %cst_110 {dimension_numbers = #tpu.dot_dimension_numbers<[1], [0], [0], [1], [0, 0, 1, 1], [], []>} : vector<1x32xbf16>, vector<32x384xbf16>, vector<1x384xf32> -> vector<1x384xf32>
    %487 = arith.truncf %435 : vector<1x32xf32> to vector<1x32xbf16>
    %cst_111 = arith.constant dense<0.000000e+00> : vector<1x384xf32>
    %488 = tpu.matmul %487, %386, %cst_111 {dimension_numbers = #tpu.dot_dimension_numbers<[1], [0], [0], [1], [0, 0, 1, 1], [], []>} : vector<1x32xbf16>, vector<32x384xbf16>, vector<1x384xf32> -> vector<1x384xf32>
    %489 = arith.addf %488, %394 : vector<1x384xf32>
    %490 = vector.extract_strided_slice %486 {offsets = [0, 0], sizes = [1, 32], strides = [1, 1]} : vector<1x384xf32> to vector<1x32xf32>
    %491 = vector.extract_strided_slice %489 {offsets = [0, 0], sizes = [1, 32], strides = [1, 1]} : vector<1x384xf32> to vector<1x32xf32>
    %492 = arith.addf %490, %491 : vector<1x32xf32>
    %493 = arith.negf %492 : vector<1x32xf32>
    %494 = math.exp %493 : vector<1x32xf32>
    %cst_112 = arith.constant 1.000000e+00 : f32
    %495 = vector.broadcast %cst_112 : f32 to vector<1x32xf32>
    %496 = arith.addf %495, %494 : vector<1x32xf32>
    %497 = arith.divf %495, %496 : vector<1x32xf32>
    %498 = vector.extract_strided_slice %486 {offsets = [0, 128], sizes = [1, 32], strides = [1, 1]} : vector<1x384xf32> to vector<1x32xf32>
    %499 = vector.extract_strided_slice %489 {offsets = [0, 128], sizes = [1, 32], strides = [1, 1]} : vector<1x384xf32> to vector<1x32xf32>
    %500 = arith.addf %498, %499 : vector<1x32xf32>
    %501 = arith.negf %500 : vector<1x32xf32>
    %502 = math.exp %501 : vector<1x32xf32>
    %cst_113 = arith.constant 1.000000e+00 : f32
    %503 = vector.broadcast %cst_113 : f32 to vector<1x32xf32>
    %504 = arith.addf %503, %502 : vector<1x32xf32>
    %505 = arith.divf %503, %504 : vector<1x32xf32>
    %506 = vector.extract_strided_slice %486 {offsets = [0, 256], sizes = [1, 32], strides = [1, 1]} : vector<1x384xf32> to vector<1x32xf32>
    %507 = vector.extract_strided_slice %489 {offsets = [0, 256], sizes = [1, 32], strides = [1, 1]} : vector<1x384xf32> to vector<1x32xf32>
    %508 = arith.mulf %497, %507 : vector<1x32xf32>
    %509 = arith.addf %506, %508 : vector<1x32xf32>
    %510 = math.tanh %509 : vector<1x32xf32>
    %cst_114 = arith.constant 1.000000e+00 : f32
    %511 = vector.broadcast %cst_114 : f32 to vector<1x32xf32>
    %512 = arith.subf %511, %505 : vector<1x32xf32>
    %513 = arith.mulf %512, %510 : vector<1x32xf32>
    %514 = arith.mulf %505, %435 : vector<1x32xf32>
    %515 = arith.addf %513, %514 : vector<1x32xf32>
    %516 = arith.truncf %515 : vector<1x32xf32> to vector<1x32xbf16>
    %cst_115 = arith.constant dense<0.000000e+00> : vector<1x8xf32>
    %517 = tpu.matmul %516, %365, %cst_115 {dimension_numbers = #tpu.dot_dimension_numbers<[1], [0], [0], [1], [0, 0, 1, 1], [], []>} : vector<1x32xbf16>, vector<32x8xbf16>, vector<1x8xf32> -> vector<1x8xf32>
    %cst_116 = arith.constant dense<0xFF800000> : vector<1xf32>
    %518 = vector.multi_reduction <maximumf>, %517, %cst_116 [1] : vector<1x8xf32> to vector<1xf32>
    %519 = vector.shape_cast %518 : vector<1xf32> to vector<1x1xf32>
    %520 = vector.broadcast %519 : vector<1x1xf32> to vector<1x8xf32>
    %521 = arith.subf %517, %520 : vector<1x8xf32>
    %522 = math.exp %521 : vector<1x8xf32>
    %cst_117 = arith.constant dense<0.000000e+00> : vector<1xf32>
    %523 = vector.multi_reduction <add>, %522, %cst_117 [1] : vector<1x8xf32> to vector<1xf32>
    %524 = vector.shape_cast %523 : vector<1xf32> to vector<1x1xf32>
    %525 = tpu.reciprocal %524 {approx = true} : vector<1x1xf32> -> vector<1x1xf32>
    %526 = vector.broadcast %525 : vector<1x1xf32> to vector<1x8xf32>
    %527 = arith.mulf %522, %526 : vector<1x8xf32>
    %528 = arith.truncf %527 : vector<1x8xf32> to vector<1x8xbf16>
    %cst_118 = arith.constant dense<0.000000e+00> : vector<1x32xf32>
    %529 = tpu.matmul %528, %374, %cst_118 {dimension_numbers = #tpu.dot_dimension_numbers<[1], [0], [0], [1], [0, 0, 1, 1], [], []>} : vector<1x8xbf16>, vector<8x32xbf16>, vector<1x32xf32> -> vector<1x32xf32>
    %cst_119 = arith.constant dense<0.000000e+00> : vector<1x32xf32>
    %530 = tpu.matmul %516, %367, %cst_119 {dimension_numbers = #tpu.dot_dimension_numbers<[1], [0], [0], [1], [0, 0, 1, 1], [], []>} : vector<1x32xbf16>, vector<32x32xbf16>, vector<1x32xf32> -> vector<1x32xf32>
    %531 = arith.addf %530, %529 : vector<1x32xf32>
    %532 = arith.addf %531, %377 : vector<1x32xf32>
    %533 = math.tanh %532 : vector<1x32xf32>
    %534 = arith.truncf %533 : vector<1x32xf32> to vector<1x32xbf16>
    %cst_120 = arith.constant dense<0.000000e+00> : vector<1x32xf32>
    %535 = tpu.matmul %534, %371, %cst_120 {dimension_numbers = #tpu.dot_dimension_numbers<[1], [0], [0], [1], [0, 0, 1, 1], [], []>} : vector<1x32xbf16>, vector<32x32xbf16>, vector<1x32xf32> -> vector<1x32xf32>
    %536 = arith.addf %535, %380 : vector<1x32xf32>
    %cst_121 = arith.constant dense<0xFF800000> : vector<1xf32>
    %537 = vector.multi_reduction <maximumf>, %536, %cst_121 [1] : vector<1x32xf32> to vector<1xf32>
    %538 = vector.shape_cast %537 : vector<1xf32> to vector<1x1xf32>
    %539 = vector.broadcast %538 : vector<1x1xf32> to vector<1x32xf32>
    %540 = arith.subf %536, %539 : vector<1x32xf32>
    %541 = math.exp %540 : vector<1x32xf32>
    %cst_122 = arith.constant dense<0.000000e+00> : vector<1xf32>
    %542 = vector.multi_reduction <add>, %541, %cst_122 [1] : vector<1x32xf32> to vector<1xf32>
    %543 = vector.shape_cast %542 : vector<1xf32> to vector<1x1xf32>
    %544 = tpu.reciprocal %543 : vector<1x1xf32> -> vector<1x1xf32>
    %545 = vector.broadcast %538 : vector<1x1xf32> to vector<1x32xf32>
    %546 = arith.cmpf oeq, %536, %545 : vector<1x32xf32>
    %c32_i32_123 = arith.constant 32 : i32
    %547 = vector.broadcast %c32_i32_123 : i32 to vector<1x32xi32>
    %548 = arith.select %546, %396, %547 : vector<1x32xi1>, vector<1x32xi32>
    %cst_124 = arith.constant dense<2147483647> : vector<1xi32>
    %549 = vector.multi_reduction <minsi>, %548, %cst_124 [1] : vector<1x32xi32> to vector<1xi32>
    %550 = vector.shape_cast %549 : vector<1xi32> to vector<1x1xi32>
    %c1_i32_125 = arith.constant 1 : i32
    %551 = vector.broadcast %c1_i32_125 : i32 to vector<1x5xi32>
    %552 = arith.cmpi eq, %397, %551 : vector<1x5xi32>
    %553 = vector.shape_cast %550 : vector<1x1xi32> to vector<1x1xi32>
    %554 = vector.broadcast %553 : vector<1x1xi32> to vector<1x5xi32>
    %555 = arith.select %552, %554, %475 : vector<1x5xi1>, vector<1x5xi32>
    %c1_i32_126 = arith.constant 1 : i32
    %556 = vector.broadcast %c1_i32_126 : i32 to vector<1x5xi32>
    %557 = arith.cmpi eq, %397, %556 : vector<1x5xi32>
    %558 = vector.shape_cast %544 : vector<1x1xf32> to vector<1x1xf32>
    %559 = vector.broadcast %558 : vector<1x1xf32> to vector<1x5xf32>
    %560 = arith.select %557, %559, %480 : vector<1x5xi1>, vector<1x5xf32>
    %561 = vector.broadcast %550 : vector<1x1xi32> to vector<1x32xi32>
    %562 = arith.cmpi eq, %396, %561 : vector<1x32xi32>
    %563 = arith.extui %562 : vector<1x32xi1> to vector<1x32xi32>
    %564 = arith.sitofp %563 : vector<1x32xi32> to vector<1x32xf32>
    %565 = arith.truncf %564 : vector<1x32xf32> to vector<1x32xbf16>
    %cst_127 = arith.constant dense<0.000000e+00> : vector<1x384xf32>
    %566 = tpu.matmul %565, %392, %cst_127 {dimension_numbers = #tpu.dot_dimension_numbers<[1], [0], [0], [1], [0, 0, 1, 1], [], []>} : vector<1x32xbf16>, vector<32x384xbf16>, vector<1x384xf32> -> vector<1x384xf32>
    %567 = arith.truncf %515 : vector<1x32xf32> to vector<1x32xbf16>
    %cst_128 = arith.constant dense<0.000000e+00> : vector<1x384xf32>
    %568 = tpu.matmul %567, %386, %cst_128 {dimension_numbers = #tpu.dot_dimension_numbers<[1], [0], [0], [1], [0, 0, 1, 1], [], []>} : vector<1x32xbf16>, vector<32x384xbf16>, vector<1x384xf32> -> vector<1x384xf32>
    %569 = arith.addf %568, %394 : vector<1x384xf32>
    %570 = vector.extract_strided_slice %566 {offsets = [0, 0], sizes = [1, 32], strides = [1, 1]} : vector<1x384xf32> to vector<1x32xf32>
    %571 = vector.extract_strided_slice %569 {offsets = [0, 0], sizes = [1, 32], strides = [1, 1]} : vector<1x384xf32> to vector<1x32xf32>
    %572 = arith.addf %570, %571 : vector<1x32xf32>
    %573 = arith.negf %572 : vector<1x32xf32>
    %574 = math.exp %573 : vector<1x32xf32>
    %cst_129 = arith.constant 1.000000e+00 : f32
    %575 = vector.broadcast %cst_129 : f32 to vector<1x32xf32>
    %576 = arith.addf %575, %574 : vector<1x32xf32>
    %577 = arith.divf %575, %576 : vector<1x32xf32>
    %578 = vector.extract_strided_slice %566 {offsets = [0, 128], sizes = [1, 32], strides = [1, 1]} : vector<1x384xf32> to vector<1x32xf32>
    %579 = vector.extract_strided_slice %569 {offsets = [0, 128], sizes = [1, 32], strides = [1, 1]} : vector<1x384xf32> to vector<1x32xf32>
    %580 = arith.addf %578, %579 : vector<1x32xf32>
    %581 = arith.negf %580 : vector<1x32xf32>
    %582 = math.exp %581 : vector<1x32xf32>
    %cst_130 = arith.constant 1.000000e+00 : f32
    %583 = vector.broadcast %cst_130 : f32 to vector<1x32xf32>
    %584 = arith.addf %583, %582 : vector<1x32xf32>
    %585 = arith.divf %583, %584 : vector<1x32xf32>
    %586 = vector.extract_strided_slice %566 {offsets = [0, 256], sizes = [1, 32], strides = [1, 1]} : vector<1x384xf32> to vector<1x32xf32>
    %587 = vector.extract_strided_slice %569 {offsets = [0, 256], sizes = [1, 32], strides = [1, 1]} : vector<1x384xf32> to vector<1x32xf32>
    %588 = arith.mulf %577, %587 : vector<1x32xf32>
    %589 = arith.addf %586, %588 : vector<1x32xf32>
    %590 = math.tanh %589 : vector<1x32xf32>
    %cst_131 = arith.constant 1.000000e+00 : f32
    %591 = vector.broadcast %cst_131 : f32 to vector<1x32xf32>
    %592 = arith.subf %591, %585 : vector<1x32xf32>
    %593 = arith.mulf %592, %590 : vector<1x32xf32>
    %594 = arith.mulf %585, %515 : vector<1x32xf32>
    %595 = arith.addf %593, %594 : vector<1x32xf32>
    %596 = arith.truncf %595 : vector<1x32xf32> to vector<1x32xbf16>
    %cst_132 = arith.constant dense<0.000000e+00> : vector<1x8xf32>
    %597 = tpu.matmul %596, %365, %cst_132 {dimension_numbers = #tpu.dot_dimension_numbers<[1], [0], [0], [1], [0, 0, 1, 1], [], []>} : vector<1x32xbf16>, vector<32x8xbf16>, vector<1x8xf32> -> vector<1x8xf32>
    %cst_133 = arith.constant dense<0xFF800000> : vector<1xf32>
    %598 = vector.multi_reduction <maximumf>, %597, %cst_133 [1] : vector<1x8xf32> to vector<1xf32>
    %599 = vector.shape_cast %598 : vector<1xf32> to vector<1x1xf32>
    %600 = vector.broadcast %599 : vector<1x1xf32> to vector<1x8xf32>
    %601 = arith.subf %597, %600 : vector<1x8xf32>
    %602 = math.exp %601 : vector<1x8xf32>
    %cst_134 = arith.constant dense<0.000000e+00> : vector<1xf32>
    %603 = vector.multi_reduction <add>, %602, %cst_134 [1] : vector<1x8xf32> to vector<1xf32>
    %604 = vector.shape_cast %603 : vector<1xf32> to vector<1x1xf32>
    %605 = tpu.reciprocal %604 {approx = true} : vector<1x1xf32> -> vector<1x1xf32>
    %606 = vector.broadcast %605 : vector<1x1xf32> to vector<1x8xf32>
    %607 = arith.mulf %602, %606 : vector<1x8xf32>
    %608 = arith.truncf %607 : vector<1x8xf32> to vector<1x8xbf16>
    %cst_135 = arith.constant dense<0.000000e+00> : vector<1x32xf32>
    %609 = tpu.matmul %608, %374, %cst_135 {dimension_numbers = #tpu.dot_dimension_numbers<[1], [0], [0], [1], [0, 0, 1, 1], [], []>} : vector<1x8xbf16>, vector<8x32xbf16>, vector<1x32xf32> -> vector<1x32xf32>
    %cst_136 = arith.constant dense<0.000000e+00> : vector<1x32xf32>
    %610 = tpu.matmul %596, %367, %cst_136 {dimension_numbers = #tpu.dot_dimension_numbers<[1], [0], [0], [1], [0, 0, 1, 1], [], []>} : vector<1x32xbf16>, vector<32x32xbf16>, vector<1x32xf32> -> vector<1x32xf32>
    %611 = arith.addf %610, %609 : vector<1x32xf32>
    %612 = arith.addf %611, %377 : vector<1x32xf32>
    %613 = math.tanh %612 : vector<1x32xf32>
    %614 = arith.truncf %613 : vector<1x32xf32> to vector<1x32xbf16>
    %cst_137 = arith.constant dense<0.000000e+00> : vector<1x32xf32>
    %615 = tpu.matmul %614, %371, %cst_137 {dimension_numbers = #tpu.dot_dimension_numbers<[1], [0], [0], [1], [0, 0, 1, 1], [], []>} : vector<1x32xbf16>, vector<32x32xbf16>, vector<1x32xf32> -> vector<1x32xf32>
    %616 = arith.addf %615, %380 : vector<1x32xf32>
    %cst_138 = arith.constant dense<0xFF800000> : vector<1xf32>
    %617 = vector.multi_reduction <maximumf>, %616, %cst_138 [1] : vector<1x32xf32> to vector<1xf32>
    %618 = vector.shape_cast %617 : vector<1xf32> to vector<1x1xf32>
    %619 = vector.broadcast %618 : vector<1x1xf32> to vector<1x32xf32>
    %620 = arith.subf %616, %619 : vector<1x32xf32>
    %621 = math.exp %620 : vector<1x32xf32>
    %cst_139 = arith.constant dense<0.000000e+00> : vector<1xf32>
    %622 = vector.multi_reduction <add>, %621, %cst_139 [1] : vector<1x32xf32> to vector<1xf32>
    %623 = vector.shape_cast %622 : vector<1xf32> to vector<1x1xf32>
    %624 = tpu.reciprocal %623 : vector<1x1xf32> -> vector<1x1xf32>
    %625 = vector.broadcast %618 : vector<1x1xf32> to vector<1x32xf32>
    %626 = arith.cmpf oeq, %616, %625 : vector<1x32xf32>
    %c32_i32_140 = arith.constant 32 : i32
    %627 = vector.broadcast %c32_i32_140 : i32 to vector<1x32xi32>
    %628 = arith.select %626, %396, %627 : vector<1x32xi1>, vector<1x32xi32>
    %cst_141 = arith.constant dense<2147483647> : vector<1xi32>
    %629 = vector.multi_reduction <minsi>, %628, %cst_141 [1] : vector<1x32xi32> to vector<1xi32>
    %630 = vector.shape_cast %629 : vector<1xi32> to vector<1x1xi32>
    %c2_i32_142 = arith.constant 2 : i32
    %631 = vector.broadcast %c2_i32_142 : i32 to vector<1x5xi32>
    %632 = arith.cmpi eq, %397, %631 : vector<1x5xi32>
    %633 = vector.shape_cast %630 : vector<1x1xi32> to vector<1x1xi32>
    %634 = vector.broadcast %633 : vector<1x1xi32> to vector<1x5xi32>
    %635 = arith.select %632, %634, %555 : vector<1x5xi1>, vector<1x5xi32>
    %c2_i32_143 = arith.constant 2 : i32
    %636 = vector.broadcast %c2_i32_143 : i32 to vector<1x5xi32>
    %637 = arith.cmpi eq, %397, %636 : vector<1x5xi32>
    %638 = vector.shape_cast %624 : vector<1x1xf32> to vector<1x1xf32>
    %639 = vector.broadcast %638 : vector<1x1xf32> to vector<1x5xf32>
    %640 = arith.select %637, %639, %560 : vector<1x5xi1>, vector<1x5xf32>
    %641 = vector.broadcast %630 : vector<1x1xi32> to vector<1x32xi32>
    %642 = arith.cmpi eq, %396, %641 : vector<1x32xi32>
    %643 = arith.extui %642 : vector<1x32xi1> to vector<1x32xi32>
    %644 = arith.sitofp %643 : vector<1x32xi32> to vector<1x32xf32>
    %645 = arith.truncf %644 : vector<1x32xf32> to vector<1x32xbf16>
    %cst_144 = arith.constant dense<0.000000e+00> : vector<1x384xf32>
    %646 = tpu.matmul %645, %392, %cst_144 {dimension_numbers = #tpu.dot_dimension_numbers<[1], [0], [0], [1], [0, 0, 1, 1], [], []>} : vector<1x32xbf16>, vector<32x384xbf16>, vector<1x384xf32> -> vector<1x384xf32>
    %647 = arith.truncf %595 : vector<1x32xf32> to vector<1x32xbf16>
    %cst_145 = arith.constant dense<0.000000e+00> : vector<1x384xf32>
    %648 = tpu.matmul %647, %386, %cst_145 {dimension_numbers = #tpu.dot_dimension_numbers<[1], [0], [0], [1], [0, 0, 1, 1], [], []>} : vector<1x32xbf16>, vector<32x384xbf16>, vector<1x384xf32> -> vector<1x384xf32>
    %649 = arith.addf %648, %394 : vector<1x384xf32>
    %650 = vector.extract_strided_slice %646 {offsets = [0, 0], sizes = [1, 32], strides = [1, 1]} : vector<1x384xf32> to vector<1x32xf32>
    %651 = vector.extract_strided_slice %649 {offsets = [0, 0], sizes = [1, 32], strides = [1, 1]} : vector<1x384xf32> to vector<1x32xf32>
    %652 = arith.addf %650, %651 : vector<1x32xf32>
    %653 = arith.negf %652 : vector<1x32xf32>
    %654 = math.exp %653 : vector<1x32xf32>
    %cst_146 = arith.constant 1.000000e+00 : f32
    %655 = vector.broadcast %cst_146 : f32 to vector<1x32xf32>
    %656 = arith.addf %655, %654 : vector<1x32xf32>
    %657 = arith.divf %655, %656 : vector<1x32xf32>
    %658 = vector.extract_strided_slice %646 {offsets = [0, 128], sizes = [1, 32], strides = [1, 1]} : vector<1x384xf32> to vector<1x32xf32>
    %659 = vector.extract_strided_slice %649 {offsets = [0, 128], sizes = [1, 32], strides = [1, 1]} : vector<1x384xf32> to vector<1x32xf32>
    %660 = arith.addf %658, %659 : vector<1x32xf32>
    %661 = arith.negf %660 : vector<1x32xf32>
    %662 = math.exp %661 : vector<1x32xf32>
    %cst_147 = arith.constant 1.000000e+00 : f32
    %663 = vector.broadcast %cst_147 : f32 to vector<1x32xf32>
    %664 = arith.addf %663, %662 : vector<1x32xf32>
    %665 = arith.divf %663, %664 : vector<1x32xf32>
    %666 = vector.extract_strided_slice %646 {offsets = [0, 256], sizes = [1, 32], strides = [1, 1]} : vector<1x384xf32> to vector<1x32xf32>
    %667 = vector.extract_strided_slice %649 {offsets = [0, 256], sizes = [1, 32], strides = [1, 1]} : vector<1x384xf32> to vector<1x32xf32>
    %668 = arith.mulf %657, %667 : vector<1x32xf32>
    %669 = arith.addf %666, %668 : vector<1x32xf32>
    %670 = math.tanh %669 : vector<1x32xf32>
    %cst_148 = arith.constant 1.000000e+00 : f32
    %671 = vector.broadcast %cst_148 : f32 to vector<1x32xf32>
    %672 = arith.subf %671, %665 : vector<1x32xf32>
    %673 = arith.mulf %672, %670 : vector<1x32xf32>
    %674 = arith.mulf %665, %595 : vector<1x32xf32>
    %675 = arith.addf %673, %674 : vector<1x32xf32>
    %676 = arith.truncf %675 : vector<1x32xf32> to vector<1x32xbf16>
    %cst_149 = arith.constant dense<0.000000e+00> : vector<1x8xf32>
    %677 = tpu.matmul %676, %365, %cst_149 {dimension_numbers = #tpu.dot_dimension_numbers<[1], [0], [0], [1], [0, 0, 1, 1], [], []>} : vector<1x32xbf16>, vector<32x8xbf16>, vector<1x8xf32> -> vector<1x8xf32>
    %cst_150 = arith.constant dense<0xFF800000> : vector<1xf32>
    %678 = vector.multi_reduction <maximumf>, %677, %cst_150 [1] : vector<1x8xf32> to vector<1xf32>
    %679 = vector.shape_cast %678 : vector<1xf32> to vector<1x1xf32>
    %680 = vector.broadcast %679 : vector<1x1xf32> to vector<1x8xf32>
    %681 = arith.subf %677, %680 : vector<1x8xf32>
    %682 = math.exp %681 : vector<1x8xf32>
    %cst_151 = arith.constant dense<0.000000e+00> : vector<1xf32>
    %683 = vector.multi_reduction <add>, %682, %cst_151 [1] : vector<1x8xf32> to vector<1xf32>
    %684 = vector.shape_cast %683 : vector<1xf32> to vector<1x1xf32>
    %685 = tpu.reciprocal %684 {approx = true} : vector<1x1xf32> -> vector<1x1xf32>
    %686 = vector.broadcast %685 : vector<1x1xf32> to vector<1x8xf32>
    %687 = arith.mulf %682, %686 : vector<1x8xf32>
    %688 = arith.truncf %687 : vector<1x8xf32> to vector<1x8xbf16>
    %cst_152 = arith.constant dense<0.000000e+00> : vector<1x32xf32>
    %689 = tpu.matmul %688, %374, %cst_152 {dimension_numbers = #tpu.dot_dimension_numbers<[1], [0], [0], [1], [0, 0, 1, 1], [], []>} : vector<1x8xbf16>, vector<8x32xbf16>, vector<1x32xf32> -> vector<1x32xf32>
    %cst_153 = arith.constant dense<0.000000e+00> : vector<1x32xf32>
    %690 = tpu.matmul %676, %367, %cst_153 {dimension_numbers = #tpu.dot_dimension_numbers<[1], [0], [0], [1], [0, 0, 1, 1], [], []>} : vector<1x32xbf16>, vector<32x32xbf16>, vector<1x32xf32> -> vector<1x32xf32>
    %691 = arith.addf %690, %689 : vector<1x32xf32>
    %692 = arith.addf %691, %377 : vector<1x32xf32>
    %693 = math.tanh %692 : vector<1x32xf32>
    %694 = arith.truncf %693 : vector<1x32xf32> to vector<1x32xbf16>
    %cst_154 = arith.constant dense<0.000000e+00> : vector<1x32xf32>
    %695 = tpu.matmul %694, %371, %cst_154 {dimension_numbers = #tpu.dot_dimension_numbers<[1], [0], [0], [1], [0, 0, 1, 1], [], []>} : vector<1x32xbf16>, vector<32x32xbf16>, vector<1x32xf32> -> vector<1x32xf32>
    %696 = arith.addf %695, %380 : vector<1x32xf32>
    %cst_155 = arith.constant dense<0xFF800000> : vector<1xf32>
    %697 = vector.multi_reduction <maximumf>, %696, %cst_155 [1] : vector<1x32xf32> to vector<1xf32>
    %698 = vector.shape_cast %697 : vector<1xf32> to vector<1x1xf32>
    %699 = vector.broadcast %698 : vector<1x1xf32> to vector<1x32xf32>
    %700 = arith.subf %696, %699 : vector<1x32xf32>
    %701 = math.exp %700 : vector<1x32xf32>
    %cst_156 = arith.constant dense<0.000000e+00> : vector<1xf32>
    %702 = vector.multi_reduction <add>, %701, %cst_156 [1] : vector<1x32xf32> to vector<1xf32>
    %703 = vector.shape_cast %702 : vector<1xf32> to vector<1x1xf32>
    %704 = tpu.reciprocal %703 : vector<1x1xf32> -> vector<1x1xf32>
    %705 = vector.broadcast %698 : vector<1x1xf32> to vector<1x32xf32>
    %706 = arith.cmpf oeq, %696, %705 : vector<1x32xf32>
    %c32_i32_157 = arith.constant 32 : i32
    %707 = vector.broadcast %c32_i32_157 : i32 to vector<1x32xi32>
    %708 = arith.select %706, %396, %707 : vector<1x32xi1>, vector<1x32xi32>
    %cst_158 = arith.constant dense<2147483647> : vector<1xi32>
    %709 = vector.multi_reduction <minsi>, %708, %cst_158 [1] : vector<1x32xi32> to vector<1xi32>
    %710 = vector.shape_cast %709 : vector<1xi32> to vector<1x1xi32>
    %c3_i32_159 = arith.constant 3 : i32
    %711 = vector.broadcast %c3_i32_159 : i32 to vector<1x5xi32>
    %712 = arith.cmpi eq, %397, %711 : vector<1x5xi32>
    %713 = vector.shape_cast %710 : vector<1x1xi32> to vector<1x1xi32>
    %714 = vector.broadcast %713 : vector<1x1xi32> to vector<1x5xi32>
    %715 = arith.select %712, %714, %635 : vector<1x5xi1>, vector<1x5xi32>
    %c3_i32_160 = arith.constant 3 : i32
    %716 = vector.broadcast %c3_i32_160 : i32 to vector<1x5xi32>
    %717 = arith.cmpi eq, %397, %716 : vector<1x5xi32>
    %718 = vector.shape_cast %704 : vector<1x1xf32> to vector<1x1xf32>
    %719 = vector.broadcast %718 : vector<1x1xf32> to vector<1x5xf32>
    %720 = arith.select %717, %719, %640 : vector<1x5xi1>, vector<1x5xf32>
    %721 = vector.broadcast %710 : vector<1x1xi32> to vector<1x32xi32>
    %722 = arith.cmpi eq, %396, %721 : vector<1x32xi32>
    %723 = arith.extui %722 : vector<1x32xi1> to vector<1x32xi32>
    %724 = arith.sitofp %723 : vector<1x32xi32> to vector<1x32xf32>
    %725 = arith.truncf %724 : vector<1x32xf32> to vector<1x32xbf16>
    %cst_161 = arith.constant dense<0.000000e+00> : vector<1x384xf32>
    %726 = tpu.matmul %725, %392, %cst_161 {dimension_numbers = #tpu.dot_dimension_numbers<[1], [0], [0], [1], [0, 0, 1, 1], [], []>} : vector<1x32xbf16>, vector<32x384xbf16>, vector<1x384xf32> -> vector<1x384xf32>
    %727 = arith.truncf %675 : vector<1x32xf32> to vector<1x32xbf16>
    %cst_162 = arith.constant dense<0.000000e+00> : vector<1x384xf32>
    %728 = tpu.matmul %727, %386, %cst_162 {dimension_numbers = #tpu.dot_dimension_numbers<[1], [0], [0], [1], [0, 0, 1, 1], [], []>} : vector<1x32xbf16>, vector<32x384xbf16>, vector<1x384xf32> -> vector<1x384xf32>
    %729 = arith.addf %728, %394 : vector<1x384xf32>
    %730 = vector.extract_strided_slice %726 {offsets = [0, 0], sizes = [1, 32], strides = [1, 1]} : vector<1x384xf32> to vector<1x32xf32>
    %731 = vector.extract_strided_slice %729 {offsets = [0, 0], sizes = [1, 32], strides = [1, 1]} : vector<1x384xf32> to vector<1x32xf32>
    %732 = arith.addf %730, %731 : vector<1x32xf32>
    %733 = arith.negf %732 : vector<1x32xf32>
    %734 = math.exp %733 : vector<1x32xf32>
    %cst_163 = arith.constant 1.000000e+00 : f32
    %735 = vector.broadcast %cst_163 : f32 to vector<1x32xf32>
    %736 = arith.addf %735, %734 : vector<1x32xf32>
    %737 = arith.divf %735, %736 : vector<1x32xf32>
    %738 = vector.extract_strided_slice %726 {offsets = [0, 128], sizes = [1, 32], strides = [1, 1]} : vector<1x384xf32> to vector<1x32xf32>
    %739 = vector.extract_strided_slice %729 {offsets = [0, 128], sizes = [1, 32], strides = [1, 1]} : vector<1x384xf32> to vector<1x32xf32>
    %740 = arith.addf %738, %739 : vector<1x32xf32>
    %741 = arith.negf %740 : vector<1x32xf32>
    %742 = math.exp %741 : vector<1x32xf32>
    %cst_164 = arith.constant 1.000000e+00 : f32
    %743 = vector.broadcast %cst_164 : f32 to vector<1x32xf32>
    %744 = arith.addf %743, %742 : vector<1x32xf32>
    %745 = arith.divf %743, %744 : vector<1x32xf32>
    %746 = vector.extract_strided_slice %726 {offsets = [0, 256], sizes = [1, 32], strides = [1, 1]} : vector<1x384xf32> to vector<1x32xf32>
    %747 = vector.extract_strided_slice %729 {offsets = [0, 256], sizes = [1, 32], strides = [1, 1]} : vector<1x384xf32> to vector<1x32xf32>
    %748 = arith.mulf %737, %747 : vector<1x32xf32>
    %749 = arith.addf %746, %748 : vector<1x32xf32>
    %750 = math.tanh %749 : vector<1x32xf32>
    %cst_165 = arith.constant 1.000000e+00 : f32
    %751 = vector.broadcast %cst_165 : f32 to vector<1x32xf32>
    %752 = arith.subf %751, %745 : vector<1x32xf32>
    %753 = arith.mulf %752, %750 : vector<1x32xf32>
    %754 = arith.mulf %745, %675 : vector<1x32xf32>
    %755 = arith.addf %753, %754 : vector<1x32xf32>
    %756 = arith.truncf %755 : vector<1x32xf32> to vector<1x32xbf16>
    %cst_166 = arith.constant dense<0.000000e+00> : vector<1x8xf32>
    %757 = tpu.matmul %756, %365, %cst_166 {dimension_numbers = #tpu.dot_dimension_numbers<[1], [0], [0], [1], [0, 0, 1, 1], [], []>} : vector<1x32xbf16>, vector<32x8xbf16>, vector<1x8xf32> -> vector<1x8xf32>
    %cst_167 = arith.constant dense<0xFF800000> : vector<1xf32>
    %758 = vector.multi_reduction <maximumf>, %757, %cst_167 [1] : vector<1x8xf32> to vector<1xf32>
    %759 = vector.shape_cast %758 : vector<1xf32> to vector<1x1xf32>
    %760 = vector.broadcast %759 : vector<1x1xf32> to vector<1x8xf32>
    %761 = arith.subf %757, %760 : vector<1x8xf32>
    %762 = math.exp %761 : vector<1x8xf32>
    %cst_168 = arith.constant dense<0.000000e+00> : vector<1xf32>
    %763 = vector.multi_reduction <add>, %762, %cst_168 [1] : vector<1x8xf32> to vector<1xf32>
    %764 = vector.shape_cast %763 : vector<1xf32> to vector<1x1xf32>
    %765 = tpu.reciprocal %764 {approx = true} : vector<1x1xf32> -> vector<1x1xf32>
    %766 = vector.broadcast %765 : vector<1x1xf32> to vector<1x8xf32>
    %767 = arith.mulf %762, %766 : vector<1x8xf32>
    %768 = arith.truncf %767 : vector<1x8xf32> to vector<1x8xbf16>
    %cst_169 = arith.constant dense<0.000000e+00> : vector<1x32xf32>
    %769 = tpu.matmul %768, %374, %cst_169 {dimension_numbers = #tpu.dot_dimension_numbers<[1], [0], [0], [1], [0, 0, 1, 1], [], []>} : vector<1x8xbf16>, vector<8x32xbf16>, vector<1x32xf32> -> vector<1x32xf32>
    %cst_170 = arith.constant dense<0.000000e+00> : vector<1x32xf32>
    %770 = tpu.matmul %756, %367, %cst_170 {dimension_numbers = #tpu.dot_dimension_numbers<[1], [0], [0], [1], [0, 0, 1, 1], [], []>} : vector<1x32xbf16>, vector<32x32xbf16>, vector<1x32xf32> -> vector<1x32xf32>
    %771 = arith.addf %770, %769 : vector<1x32xf32>
    %772 = arith.addf %771, %377 : vector<1x32xf32>
    %773 = math.tanh %772 : vector<1x32xf32>
    %774 = arith.truncf %773 : vector<1x32xf32> to vector<1x32xbf16>
    %cst_171 = arith.constant dense<0.000000e+00> : vector<1x32xf32>
    %775 = tpu.matmul %774, %371, %cst_171 {dimension_numbers = #tpu.dot_dimension_numbers<[1], [0], [0], [1], [0, 0, 1, 1], [], []>} : vector<1x32xbf16>, vector<32x32xbf16>, vector<1x32xf32> -> vector<1x32xf32>
    %776 = arith.addf %775, %380 : vector<1x32xf32>
    %cst_172 = arith.constant dense<0xFF800000> : vector<1xf32>
    %777 = vector.multi_reduction <maximumf>, %776, %cst_172 [1] : vector<1x32xf32> to vector<1xf32>
    %778 = vector.shape_cast %777 : vector<1xf32> to vector<1x1xf32>
    %779 = vector.broadcast %778 : vector<1x1xf32> to vector<1x32xf32>
    %780 = arith.subf %776, %779 : vector<1x32xf32>
    %781 = math.exp %780 : vector<1x32xf32>
    %cst_173 = arith.constant dense<0.000000e+00> : vector<1xf32>
    %782 = vector.multi_reduction <add>, %781, %cst_173 [1] : vector<1x32xf32> to vector<1xf32>
    %783 = vector.shape_cast %782 : vector<1xf32> to vector<1x1xf32>
    %784 = tpu.reciprocal %783 : vector<1x1xf32> -> vector<1x1xf32>
    %785 = vector.broadcast %778 : vector<1x1xf32> to vector<1x32xf32>
    %786 = arith.cmpf oeq, %776, %785 : vector<1x32xf32>
    %c32_i32_174 = arith.constant 32 : i32
    %787 = vector.broadcast %c32_i32_174 : i32 to vector<1x32xi32>
    %788 = arith.select %786, %396, %787 : vector<1x32xi1>, vector<1x32xi32>
    %cst_175 = arith.constant dense<2147483647> : vector<1xi32>
    %789 = vector.multi_reduction <minsi>, %788, %cst_175 [1] : vector<1x32xi32> to vector<1xi32>
    %790 = vector.shape_cast %789 : vector<1xi32> to vector<1x1xi32>
    %c4_i32_176 = arith.constant 4 : i32
    %791 = vector.broadcast %c4_i32_176 : i32 to vector<1x5xi32>
    %792 = arith.cmpi eq, %397, %791 : vector<1x5xi32>
    %793 = vector.shape_cast %790 : vector<1x1xi32> to vector<1x1xi32>
    %794 = vector.broadcast %793 : vector<1x1xi32> to vector<1x5xi32>
    %795 = arith.select %792, %794, %715 : vector<1x5xi1>, vector<1x5xi32>
    %c4_i32_177 = arith.constant 4 : i32
    %796 = vector.broadcast %c4_i32_177 : i32 to vector<1x5xi32>
    %797 = arith.cmpi eq, %397, %796 : vector<1x5xi32>
    %798 = vector.shape_cast %784 : vector<1x1xf32> to vector<1x1xf32>
    %799 = vector.broadcast %798 : vector<1x1xf32> to vector<1x5xf32>
    %800 = arith.select %797, %799, %720 : vector<1x5xi1>, vector<1x5xf32>
    %c0_178 = arith.constant 0 : index
    %c0_179 = arith.constant 0 : index
    %801 = vector.load %arg5[%c0_178, %c0_179] : memref<1x5xi32, #tpu.memory_space<vmem>>, vector<1x5xi32>
    tpu.vector_store %arg5[%c0_178, %c0_179], %795 {strides = array<i32>} : memref<1x5xi32, #tpu.memory_space<vmem>>, vector<1x5xi32>,
    %c0_180 = arith.constant 0 : index
    %c0_181 = arith.constant 0 : index
    %802 = vector.load %arg6[%c0_180, %c0_181] : memref<1x5xf32, #tpu.memory_space<vmem>>, vector<1x5xf32>
    tpu.vector_store %arg6[%c0_180, %c0_181], %800 {strides = array<i32>} : memref<1x5xf32, #tpu.memory_space<vmem>>, vector<1x5xf32>,
    return
  }
}

</mosaic_0001>

<bundles_post_ra>
// kernel: greedy_search_decode.1
= control target key start
LH: loop header
LB: loop body
LE: loop exit
PB: predicated region body
PF: predicated region fallthrough
CT: control target
= control target key end

     0   :  { %12 = vsyncpa [#allocation3], 0  ;;  %s6412_s0 = inlined_call_operand.vmem [shape: s32[8,1], index: 0, kind: input, shape index: {}]   ;;  %s6413_s1 = inlined_call_operand.hbm [shape: bf16[32,32], index: 1, kind: input, shape index: {}]   ;;  %s6414_s2 = inlined_call_operand.hbm [shape: bf16[4,64,384], index: 2, kind: input, shape index: {}]   ;;  %s6415_s3 = inlined_call_operand.hbm [shape: bf16[3,32,32], index: 3, kind: input, shape index: {}]   ;;  %s6416_s4 = inlined_call_operand.hbm [shape: f32[6,1,384], index: 4, kind: input, shape index: {}]   ;;  %s6417_s5 = inlined_call_operand.hbm [shape: s32[1,5], index: 5, kind: output, shape index: {0}]   ;;  %s6418_s6 = inlined_call_operand.hbm [shape: f32[1,5], index: 6, kind: output, shape index: {1}]  }
   0x1   :  { %13 = vsyncpa [#allocation6], 0 }
   0x2   :  { %14 = vsyncpa [#allocation9], 0 }
   0x3   :  { %15 = vsyncpa [#allocation4], 0 }
   0x4   :  { %16 = vsyncpa [#allocation12], 0  ;;  %s5374_s21 = smov [#allocation5]  }
   0x5   :  { %s36_s22 = sshll.u32 %s5374_s21, 4  ;;  %s37_s22 = int_to_ptr.vmem [resolvable:$true] %s36_s22 }
   0x6   :  { %s5252_s23 = scalar_lea.vmem %s37_s22, 6144  ;;  %p5257_p1 = scmp.lt.s32.totalorder %s37_s22, %s37_s22 }
   0x7   :  { %p5253_p0 = scmp.ne.s32.totalorder %s37_s22, %s5252_s23  ;;  %p5258_p2 = scmp.lt.s32.totalorder %s5252_s23, %s5252_s23 }
   0x9   :  { %p5259_p3 = por %p5258_p2, %p5257_p1 }
   0xb   :  { %p5260_p4 = pnand %p5259_p3, %p5253_p0 }
   0xd   :  { %5263 = shalt.err (!%p5260_p4)
}
   0xe   :  { %s5375_s24 = smov 192   ;;  %s5376_s25 = smov 12  }
   0xf   :  { %42 = dma.hbm_to_vmem [thread:$0]  %s6414_s2, 6144, %s37_s22, [#allocation6], %s5375_s24, %s5375_s24, %s5376_s25  }
  0x10   :  { %s5377_s28 = smov [#allocation2]  }
  0x11   :  { %s24_s29 = sshll.u32 %s5377_s28, 4  ;;  %s25_s29 = int_to_ptr.vmem [resolvable:$true] %s24_s29 }
  0x12   :  { %s5272_s30 = scalar_lea.vmem %s25_s29, 256  ;;  %p5277_p6 = scmp.lt.s32.totalorder %s25_s29, %s25_s29 }
  0x13   :  { %p5273_p5 = scmp.ne.s32.totalorder %s25_s29, %s5272_s30  ;;  %p5278_p7 = scmp.lt.s32.totalorder %s5272_s30, %s5272_s30 }
  0x15   :  { %p5279_p8 = por %p5278_p7, %p5277_p6 }
  0x17   :  { %p5280_p9 = pnand %p5279_p8, %p5273_p5 }
  0x19   :  { %5283 = shalt.err (!%p5280_p9)
}
  0x1a   :  { %s5378_s7 = smov 64   ;;  %s5379_s8 = smov 4  }
  0x1b   :  { %30 = dma.hbm_to_vmem [thread:$0]  %s6413_s1, 256, %s25_s29, [#allocation3], %s5378_s7, %s5378_s7, %s5379_s8  }
  0x1c   :  { %s5380_s11 = smov [#allocation7]   ;;  %s5381_s13 = smov [#allocation8]  }
  0x1d   :  { %s48_s12 = sshll.u32 %s5380_s11, 4  ;;  %s60_s2 = sshll.u32 %s5381_s13, 4  ;;  %s49_s12 = int_to_ptr.vmem [resolvable:$true] %s48_s12  ;;  %s61_s2 = int_to_ptr.vmem [resolvable:$true] %s60_s2 }
  0x1e   :  { %s5292_s14 = scalar_lea.vmem %s49_s12, 768  ;;  %p5297_p11 = scmp.lt.s32.totalorder %s49_s12, %s49_s12 }
  0x1f   :  { %p5293_p10 = scmp.ne.s32.totalorder %s49_s12, %s5292_s14  ;;  %p5298_p12 = scmp.lt.s32.totalorder %s5292_s14, %s5292_s14 }
  0x21   :  { %p5299_p13 = por %p5298_p12, %p5297_p11 }
  0x23   :  { %p5300_p0 = pnand %p5299_p13, %p5293_p10 }
  0x25   :  { %5303 = shalt.err (!%p5300_p0)
}
  0x26   :  { %54 = dma.hbm_to_vmem [thread:$0]  %s6415_s3, 768, %s49_s12, [#allocation6], %s5378_s7, %s5378_s7, %s5379_s8  }
  0x27   :  { %s5312_s17 = scalar_lea.vmem %s61_s2, 288  ;;  %p5317_p2 = scmp.lt.s32.totalorder %s61_s2, %s61_s2 }
  0x28   :  { %p5313_p1 = scmp.ne.s32.totalorder %s61_s2, %s5312_s17  ;;  %p5318_p3 = scmp.lt.s32.totalorder %s5312_s17, %s5312_s17 }
  0x2a   :  { %p5319_p4 = por %p5318_p3, %p5317_p2 }
  0x2c   :  { %p5320_p5 = pnand %p5319_p4, %p5313_p1 }
  0x2e   :  { %5323 = shalt.err (!%p5320_p5)
}
  0x2f   :  { %s5382_s1 = smov 48   ;;  %s5383_s18 = smov 3  }
  0x30   :  { %66 = dma.hbm_to_vmem [thread:$0]  %s6416_s4, 288, %s61_s2, [#allocation9], %s5382_s1, %s5382_s1, %s5383_s18  }
  0x31   :  { %5364 = dma.done.wait [#allocation3], 256  }
  0x32   :  { %5365 = vsyncadd [#allocation3], 4294967040 }
  0x33   :  { %5366 = dma.done.wait [#allocation6], 6912  }
  0x34   :  { %5367 = vsyncadd [#allocation6], 4294960384 }
  0x35   :  { %5368 = dma.done.wait [#allocation9], 288  }
  0x36   :  { %5369 = vsyncadd [#allocation9], 4294967008  ;;  %v5384_v0 = vmov 0   ;;  %v5385_v1 = vmov 0.0   ;;  %v86_v2 = vld [vmem:[%s6412_s0] sm:$0xff]  ;;  %vm5386_vm0 = vmmov 0   ;;  %v84_v9 = vlaneseq }
  0x37   :  { %4993 = vset.pattern.permute.xlu0 %v5384_v0  ;;  %4579 = vmatprep.subr.bf16.mxu0 %v5385_v1  ;;  %v4994_v3 = vld [vmem:[#allocation2 + $0x8] sm:$0xff]   ;;  %v4995_v4 = vld [vmem:[#allocation2] sm:$0xff]   ;;  %v5002_v8 = vld [vmem:[#allocation5] ss:$12 sps:$4 sm:$0xff]   ;;  %vm106_vm2 = vcmask 261120   ;;  %vm525_vm3 = vcmask 523264  }
  0x38   :  { %269 = vmatprep.mubr.bf16.mxu1 %v5384_v0  ;;  %4583 = vmatprep.mubr.msk.bf16.mxu0 %vm5386_vm0, %v5385_v1  ;;  %v4996_v5 = vld [vmem:[#allocation5 + $0x1c] ss:$12 sps:$4 sm:$0xff]   ;;  %v4998_v6 = vld [vmem:[#allocation5 + $0x18] ss:$12 sps:$4 sm:$0xff]   ;;  %v5448_v10 = vand.u32 127, %v84_v9  ;;  %v5532_v39 = vshrl.u32 %v84_v9, 7 }
  0x39   :  { %88 = vperm.xlu0 %4993, %v86_v2   ;;  %4580 = vmatpush3.bf16.msra.mxu0 %v4994_v3  ;;  %v5000_v7 = vld [vmem:[#allocation5 + $0x4] ss:$12 sps:$4 sm:$0xff]   ;;  %v4999_v13 = vld [vmem:[#allocation5 + $0x20] ss:$12 sps:$4 sm:$0xff]   ;;  %v5003_v15 = vld [vmem:[#allocation5 + $0x8] ss:$12 sps:$4 sm:$0xff]  }
  0x3a   :  { %4581 = vmatprep.subr.bf16.mxu0 %v5385_v1  ;;  %249 = vmatprep.subr.bf16.mxu1 %v4996_v5  ;;  %v5006_v16 = vld [vmem:[#allocation5 + $0x7c] ss:$12 sps:$4 sm:$0xff]   ;;  %v5004_v18 = vld [vmem:[#allocation5 + $0x78] ss:$12 sps:$4 sm:$0xff]   ;;  %v5007_v19 = vld [vmem:[#allocation5 + $0x80] ss:$12 sps:$4 sm:$0xff]  }
  0x3b   :  { %250 = vmatpush1.bf16.msra.mxu1 %v4998_v6  ;;  %v5010_v21 = vld [vmem:[#allocation5 + $0x64] ss:$12 sps:$4 sm:$0xff]   ;;  %v5008_v24 = vld [vmem:[#allocation5 + $0x60] ss:$12 sps:$4 sm:$0xff]   ;;  %v5011_v25 = vld [vmem:[#allocation5 + $0x68] ss:$12 sps:$4 sm:$0xff]  }
  0x3c   :  { %251 = vmatprep.subr.bf16.mxu1 %v5000_v7  ;;  %v5460_v26 = vld [vmem:[#allocation5 + $0x10c] ss:$12 sps:$4 sm:$0xff]   ;;  %v5465_v28 = vld [vmem:[#allocation5 + $0x108] ss:$12 sps:$4 sm:$0xff]   ;;  %v5471_v30 = vld [vmem:[#allocation5 + $0x110] ss:$12 sps:$4 sm:$0xff]  }
  0x3d   :  { %4582 = vmatpush3.bf16.msra.mxu0 %v4995_v4  ;;  %v5468_v29 = vld [vmem:[#allocation5 + $0xf4] ss:$12 sps:$4 sm:$0xff]   ;;  %v5476_v31 = vld [vmem:[#allocation5 + $0xf0] ss:$12 sps:$4 sm:$0xff]   ;;  %v5483_v33 = vld [vmem:[#allocation5 + $0xf8] ss:$12 sps:$4 sm:$0xff]  }
  0x3e   :  { %4587 = vmatprep.subr.bf16.mxu0 %v5385_v1  ;;  %v5480_v32 = vld [vmem:[#allocation5 + $0xdc] ss:$12 sps:$4 sm:$0xff]   ;;  %v5489_v34 = vld [vmem:[#allocation5 + $0xd8] ss:$12 sps:$4 sm:$0xff]   ;;  %v5495_v36 = vld [vmem:[#allocation5 + $0xe0] ss:$12 sps:$4 sm:$0xff]  }
  0x3f   :  { %252 = vmatpush1.bf16.msra.mxu1 %v5002_v8  ;;  %v5492_v35 = vld [vmem:[#allocation5 + $0xc4] ss:$12 sps:$4 sm:$0xff]   ;;  %v5499_v37 = vld [vmem:[#allocation5 + $0xc0] ss:$12 sps:$4 sm:$0xff]   ;;  %v5503_v38 = vld [vmem:[#allocation5 + $0xc8] ss:$12 sps:$4 sm:$0xff]  }
  0x40   :  { %362 = vmatprep.subr.bf16.mxu1 %v5006_v16  ;;  %v5535_v42 = vsub.s32 0, %v5532_v39  ;;  %v185_v43 = vld [vmem:[#allocation8] sm:$0x7]  ;;  %v5538_v44 = vsub.s32 2, %v5532_v39  ;;  %v5560_v16 = vsub.s32 1, %v5532_v39  ;;  %vm1503_vm4 = vcmp.eq.s32.totalorder %v5532_v39, 0 }
  0x41   :  { %vm1510_vm5 = vcmp.eq.s32.totalorder %v5532_v39, 1  ;;  %vm1517_vm6 = vcmp.eq.s32.totalorder %v5532_v39, 2  ;;  %vm1524_vm7 = vcmp.eq.s32.totalorder %v5532_v39, 3  ;;  %vm1531_vm8 = vcmp.eq.s32.totalorder %v5532_v39, 4  ;;  %s5388_s0 = smov [#allocation11]  }
  0x42   :  { %v190_v49 = vrot.slane %v185_v43, %v5535_v42  ;;  %v198_v50 = vrot.slane %v185_v43, %v5538_v44  ;;  %vm1538_vm9 = vcmp.eq.s32.totalorder %v5532_v39, 5  ;;  %vm1545_vm10 = vcmp.eq.s32.totalorder %v5532_v39, 6  ;;  %s4247_s4 = sshll.u32 %s5388_s0, 4  ;;  %s4248_s4 = int_to_ptr.vmem [resolvable:$true] %s4247_s4 }
  0x43   :  { %vm1552_vm15 = vcmp.eq.s32.totalorder %v5532_v39, 7  ;;  %s5324_s22 = scalar_lea.vmem %s4248_s4, 16  ;;  %s5328_s23 = scalar_lea.vmem %s4248_s4, 32 }
  0x44   :  { %p5325_p6 = scmp.ne.s32.totalorder %s4248_s4, %s5324_s22  ;;  %p5329_p7 = scmp.lt.s32.totalorder %s4248_s4, %s4248_s4 }
  0x45   :  { %p5330_p8 = scmp.lt.s32.totalorder %s5328_s23, %s5324_s22 }
  0x47   :  { %p5331_p9 = por %p5330_p8, %p5329_p7 }
  0x49   :  { %p5332_p10 = pnand %p5331_p9, %p5325_p6 }
  0xb4   :  { %v89_v11 = vpop.permute.xlu0 %88 }
  0xb5   :  { %vm90_vm1 = vcmp.eq.s32.totalorder %v5448_v10, %v89_v11 }
  0xb6   :  { %v4262_v12 = vsel %vm90_vm1, 1.0, %v5385_v1 }
  0xb7   :  { %v93_v14 = vpack.c.bf16 %v4262_v12, %v4262_v12 }
  0xb9   :  { %4584 = vmatmul.mubr.msk.bf16.vlgmr.msra.gmra.mxu0 %vm106_vm2, %v93_v14  ;;  %v432_v14 = vld [vmem:[#allocation8 + $0x3] sm:$0x7] }
  0xba   :  { %4588 = vmatpush3.bf16.msra.mxu0 %v4999_v13  ;;  %4591 = vmatprep.mubr.msk.bf16.mxu0 %vm5386_vm0, %v5385_v1 }
  0xbb   :  { %4589 = vmatprep.subr.bf16.mxu0 %v5385_v1 }
  0xbe   :  { %4590 = vmatpush3.bf16.msra.mxu0 %v5003_v15  ;;  %v5557_v15 = vrot.slane %v432_v14, %v5535_v42 }
  0xbf   :  { %4595 = vmatprep.subr.bf16.mxu0 %v5385_v1 }
 0x179   :  { %v144_v17 = vpop.f32.mrf.mxu0 }
 0x17a   :  { %v150_v20 = vpack.c.bf16 %v144_v17, %v144_v17 }
 0x17b   :  { %v4585_v22 = vpop.f32.mrf.mxu0 }
 0x17c   :  { %4272 = vmatmul.mubr.msk.bf16.vlgmr.msra.gmra.mxu1 %vm106_vm2, %v150_v20  ;;  %4592 = vmatmul.mubr.msk.bf16.vlgmr.msra.gmra.mxu0 %vm106_vm2, %v150_v20 }
 0x17d   :  { %363 = vmatpush1.bf16.msra.mxu1 %v5004_v18  ;;  %v147_v23 = vpop.f32.mrf.mxu0  ;;  %4596 = vmatpush3.bf16.msra.mxu0 %v5007_v19  ;;  %v194_v19 = vrot.slane %v185_v43, %v5560_v16 }
 0x17e   :  { %364 = vmatprep.subr.bf16.mxu1 %v5010_v21  ;;  %4597 = vmatprep.subr.bf16.mxu0 %v5385_v1 }
 0x17f   :  { %v4586_v27 = vpop.f32.mrf.mxu0  ;;  %382 = vmatprep.mubr.bf16.mxu1 %v5384_v0  ;;  %4599 = vmatprep.mubr.msk.bf16.mxu0 %vm5386_vm0, %v5385_v1 }
 0x181   :  { %365 = vmatpush1.bf16.msra.mxu1 %v5008_v24  ;;  %4598 = vmatpush3.bf16.msra.mxu0 %v5011_v25 }
 0x182   :  { %537 = vmatprep.subr.bf16.mxu1 %v5460_v26  ;;  %4603 = vmatprep.subr.bf16.mxu0 %v5385_v1 }
 0x184   :  { %4280 = vmatmul.mubr.msk.bf16.vlgmr.msra.gmra.mxu1 %vm106_vm2, %v150_v20  ;;  %4600 = vmatmul.mubr.msk.bf16.vlgmr.msra.gmra.mxu0 %vm106_vm2, %v150_v20  ;;  %v5564_v20 = vrot.slane %v432_v14, %v5560_v16 }
 0x185   :  { %538 = vmatpush1.bf16.msra.mxu1 %v5465_v28  ;;  %561 = vmatprep.mubr.bf16.mxu1 %v5384_v0 }
 0x186   :  { %539 = vmatprep.subr.bf16.mxu1 %v5468_v29  ;;  %4604 = vmatpush3.bf16.msra.mxu0 %v5471_v30 }
 0x187   :  { %4605 = vmatprep.subr.bf16.mxu0 %v5385_v1  ;;  %4611 = vmatprep.mubr.msk.bf16.mxu0 %vm5386_vm0, %v5385_v1 }
 0x189   :  { %540 = vmatpush1.bf16.msra.mxu1 %v5476_v31 }
 0x18a   :  { %541 = vmatprep.subr.bf16.mxu1 %v5480_v32  ;;  %4606 = vmatpush3.bf16.msra.mxu0 %v5483_v33 }
 0x18b   :  { %4607 = vmatprep.subr.bf16.mxu0 %v5385_v1 }
 0x18d   :  { %542 = vmatpush1.bf16.msra.mxu1 %v5489_v34 }
 0x18e   :  { %543 = vmatprep.subr.bf16.mxu1 %v5492_v35  ;;  %4608 = vmatpush3.bf16.msra.mxu0 %v5495_v36 }
 0x18f   :  { %4609 = vmatprep.subr.bf16.mxu0 %v5385_v1 }
 0x191   :  { %544 = vmatpush1.bf16.msra.mxu1 %v5499_v37 }
 0x192   :  { %4610 = vmatpush3.bf16.msra.mxu0 %v5503_v38  ;;  %652 = vmatprep.subr.bf16.mxu1 %v5460_v26 }
 0x193   :  { %4615 = vmatprep.subr.bf16.mxu0 %v5385_v1 }
 0x194   :  { %562 = vmatmul.mubr.bf16.vlgmr.msra.gmra.mxu1 %v5384_v0 }
 0x195   :  { %4612 = vmatmul.mubr.bf16.vlgmr.msra.gmra.mxu0 %v5384_v0  ;;  %653 = vmatpush1.bf16.msra.mxu1 %v5465_v28 }
 0x196   :  { %4616 = vmatpush3.bf16.msra.mxu0 %v5471_v30  ;;  %654 = vmatprep.subr.bf16.mxu1 %v5468_v29 }
 0x197   :  { %4617 = vmatprep.subr.bf16.mxu0 %v5385_v1  ;;  %676 = vmatprep.mubr.bf16.mxu1 %v5384_v0 }
 0x198   :  { %4623 = vmatprep.mubr.msk.bf16.mxu0 %vm5386_vm0, %v5385_v1 }
 0x199   :  { %655 = vmatpush1.bf16.msra.mxu1 %v5476_v31 }
 0x19a   :  { %4618 = vmatpush3.bf16.msra.mxu0 %v5483_v33  ;;  %656 = vmatprep.subr.bf16.mxu1 %v5480_v32 }
 0x19b   :  { %4619 = vmatprep.subr.bf16.mxu0 %v5385_v1 }
 0x19d   :  { %657 = vmatpush1.bf16.msra.mxu1 %v5489_v34 }
 0x19e   :  { %4620 = vmatpush3.bf16.msra.mxu0 %v5495_v36  ;;  %658 = vmatprep.subr.bf16.mxu1 %v5492_v35 }
 0x19f   :  { %4621 = vmatprep.subr.bf16.mxu0 %v5385_v1 }
 0x1a1   :  { %659 = vmatpush1.bf16.msra.mxu1 %v5499_v37 }
 0x1a2   :  { %4622 = vmatpush3.bf16.msra.mxu0 %v5503_v38  ;;  %782 = vmatprep.subr.bf16.mxu1 %v5460_v26 }
 0x1a3   :  { %4627 = vmatprep.subr.bf16.mxu0 %v5385_v1 }
 0x23c   :  { %v271_v40 = vpop.f32.mrf.mxu1  ;;  %v312_v41 = vpop.f32.mrf.mxu0 }
 0x23d   :  { %v272_v55 = vadd.f32 %v271_v40, %v190_v49  ;;  %v313_v59 = vadd.f32 %v312_v41, %v198_v50 }
 0x23e   :  { %v273_v45 = vpop.f32.mrf.mxu1  ;;  %v4593_v46 = vpop.f32.mrf.mxu0 }
 0x23f   :  { %v5571_v46 = vadd.f32 %v273_v45, %v194_v19  ;;  %v5579_v45 = vrot.slane %v432_v14, %v5538_v44 }
 0x240   :  { %v275_v47 = vpop.f32.mrf.mxu1  ;;  %v315_v48 = vpop.f32.mrf.mxu0 }
 0x242   :  { %v276_v51 = vpop.f32.mrf.mxu1  ;;  %v4594_v52 = vpop.f32.mrf.mxu0 }
 0x244   :  { %v384_v53 = vpop.f32.mrf.mxu1  ;;  %v425_v54 = vpop.f32.mrf.mxu0 }
 0x245   :  { %v631_v56 = vrot.slane %v384_v53, 5  ;;  %v758_v57 = vrot.slane %v384_v53, 3  ;;  %v888_v58 = vrot.slane %v384_v53, 1  ;;  %v633_v60 = vrot.slane %v425_v54, 5 }
 0x246   :  { %v760_v61 = vrot.slane %v425_v54, 3  ;;  %v890_v62 = vrot.slane %v425_v54, 1  ;;  %v5542_v63 = vpop.f32.mrf.mxu1  ;;  %v4601_v2 = vpop.f32.mrf.mxu0  ;;  %v436_v17 = vrot.slane %v384_v53, 7 }
 0x247   :  { %v5544_v3 = vadd.f32 %v631_v56, %v272_v55  ;;  %v5546_v6 = vadd.f32 %v633_v60, %v313_v59  ;;  %v5548_v7 = vadd.f32 %v758_v57, %v272_v55  ;;  %v5552_v9 = vadd.f32 %v888_v58, %v272_v55 }
 0x248   :  { %v388_v4 = vpop.f32.mrf.mxu1  ;;  %v428_v5 = vpop.f32.mrf.mxu0  ;;  %v5550_v8 = vadd.f32 %v760_v61, %v313_v59  ;;  %v5554_v13 = vadd.f32 %v890_v62, %v313_v59  ;;  %v5566_v21 = vadd.f32 %v436_v17, %v272_v55  ;;  %v437_v27 = vrot.slane %v5542_v63, 7 }
 0x249   :  { %v438_v58 = vrot.slane %v425_v54, 7 }
 0x24a   :  { %v389_v11 = vpop.f32.mrf.mxu1  ;;  %v4602_v12 = vpop.f32.mrf.mxu0  ;;  %v5575_v50 = vadd.f32 %v437_v27, %v5571_v46 }
 0x24b   :  { %v5582_v2 = vadd.f32 %v438_v58, %v313_v59 }
 0x254   :  { %v563_v18 = vpop.f32.mrf.mxu1 }
 0x255   :  { %v564_v22 = vadd.f32 %v563_v18, %v5557_v15  ;;  %v604_v23 = vpop.f32.mrf.mxu0 }
 0x256   :  { %v565_v24 = vpop.f32.mrf.mxu1  ;;  %v605_v61 = vadd.f32 %v604_v23, %v5579_v45 }
 0x257   :  { %v610_v25 = vadd.f32 %v564_v22, %v5566_v21  ;;  %v4613_v40 = vpop.f32.mrf.mxu0  ;;  %v566_v43 = vadd.f32 %v565_v24, %v5564_v20 }
 0x258   :  { %v567_v41 = vpop.f32.mrf.mxu1 }
 0x259   :  { %v4294_v47 = vmul.f32 -1.442695, %v610_v25  ;;  %v607_v48 = vpop.f32.mrf.mxu0  ;;  %v617_v52 = vadd.f32 %v566_v43, %v5575_v50 }
 0x25a   :  { %v568_v49 = vpop.f32.mrf.mxu1  ;;  %v632_v48 = vrot.slane %v5542_v63, 5 }
 0x25b   :  { %5050 = vpow2.f32 %v4294_v47  ;;  %v4614_v51 = vpop.f32.mrf.mxu0  ;;  %v4295_v53 = vmul.f32 -1.442695, %v617_v52 }
 0x25d   :  { %5052 = vpow2.f32 %v4295_v53 }
 0x268   :  { %v5051_v55 = vpop.eup %5050 }
 0x269   :  { %v614_v56 = vadd.f32 1.0, %v5051_v55  ;;  %v5615_v55 = vadd.f32 %v632_v48, %v5571_v46 }
 0x26a   :  { %v5053_v57 = vpop.eup %5052 }
 0x26b   :  { %5054 = vrcp.f32 %v614_v56  ;;  %v621_v60 = vadd.f32 1.0, %v5053_v57 }
 0x26d   :  { %5056 = vrcp.f32 %v621_v60 }
 0x278   :  { %v5055_v62 = vpop.eup %5054 }
 0x279   :  { %v624_v4 = vmul.f32 %v5055_v62, %v605_v61 }
 0x27a   :  { %v5057_v11 = vpop.eup %5056 }
 0x27b   :  { %v625_v5 = vadd.f32 %v624_v4, %v5582_v2  ;;  %v627_v12 = vsub.f32 1.0, %v5057_v11  ;;  %v629_v19 = vmul.f32 0.0, %v5057_v11 }
 0x27d   :  { %5058 = vtanh.f32 %v625_v5 }
 0x28a   :  { %v5059_v17 = vpop.eup %5058 }
 0x28b   :  { %v628_v18 = vmul.f32 %v5059_v17, %v627_v12 }
 0x28d   :  { %v5585_v14 = vadd.f32 %v629_v19, %v628_v18 }
 0x28f   :  { %v640_v54 = vpack.c.bf16 %v5585_v14, %v5585_v14 }
 0x291   :  { %4296 = vmatmul.mubr.msk.bf16.vlgmr.msra.gmra.mxu1 %vm525_vm3, %v640_v54  ;;  %4624 = vmatmul.mubr.msk.bf16.vlgmr.msra.gmra.mxu0 %vm525_vm3, %v640_v54  ;;  %v754_v54 = vrot.slane %v5585_v14, 7 }
 0x292   :  { %783 = vmatpush1.bf16.msra.mxu1 %v5465_v28  ;;  %4628 = vmatpush3.bf16.msra.mxu0 %v5471_v30 }
 0x293   :  { %784 = vmatprep.subr.bf16.mxu1 %v5468_v29  ;;  %4629 = vmatprep.subr.bf16.mxu0 %v5385_v1 }
 0x294   :  { %806 = vmatprep.mubr.bf16.mxu1 %v5384_v0  ;;  %4635 = vmatprep.mubr.msk.bf16.mxu0 %vm5386_vm0, %v5385_v1 }
 0x296   :  { %785 = vmatpush1.bf16.msra.mxu1 %v5476_v31  ;;  %4630 = vmatpush3.bf16.msra.mxu0 %v5483_v33 }
 0x297   :  { %786 = vmatprep.subr.bf16.mxu1 %v5480_v32  ;;  %4631 = vmatprep.subr.bf16.mxu0 %v5385_v1 }
 0x29a   :  { %787 = vmatpush1.bf16.msra.mxu1 %v5489_v34  ;;  %4632 = vmatpush3.bf16.msra.mxu0 %v5495_v36 }
 0x29b   :  { %788 = vmatprep.subr.bf16.mxu1 %v5492_v35  ;;  %4633 = vmatprep.subr.bf16.mxu0 %v5385_v1 }
 0x29e   :  { %789 = vmatpush1.bf16.msra.mxu1 %v5499_v37  ;;  %4634 = vmatpush3.bf16.msra.mxu0 %v5503_v38 }
 0x29f   :  { %911 = vmatprep.subr.bf16.mxu1 %v5460_v26  ;;  %4639 = vmatprep.subr.bf16.mxu0 %v5385_v1 }
 0x351   :  { %v678_v59 = vpop.f32.mrf.mxu1  ;;  %v719_v22 = vpop.f32.mrf.mxu0 }
 0x352   :  { %v679_v23 = vadd.f32 %v678_v59, %v5557_v15  ;;  %v720_v62 = vadd.f32 %v719_v22, %v5579_v45 }
 0x353   :  { %v680_v24 = vpop.f32.mrf.mxu1  ;;  %v4625_v25 = vpop.f32.mrf.mxu0 }
 0x354   :  { %v726_v27 = vrot.slane %v679_v23, 7  ;;  %v681_v40 = vadd.f32 %v680_v24, %v5564_v20  ;;  %v746_v5 = vrot.slane %v720_v62, 7  ;;  %v1507_v25 = vrot.slane %v5585_v14, %v5535_v42 }
 0x355   :  { %v682_v41 = vpop.f32.mrf.mxu1  ;;  %v722_v47 = vpop.f32.mrf.mxu0  ;;  %v759_v62 = vrot.slane %v5542_v63, 3 }
 0x356   :  { %v728_v43 = vadd.f32 %v726_v27, %v5544_v3  ;;  %v736_v53 = vrot.slane %v681_v40, 7  ;;  %v1508_v41 = vsel %vm1503_vm4, %v1507_v25, 0.0  ;;  %vm1668_vm4 = vcmask 64512  }
 0x357   :  { %v683_v49 = vpop.f32.mrf.mxu1  ;;  %v4626_v51 = vpop.f32.mrf.mxu0 }
 0x358   :  { %v4298_v52 = vmul.f32 -1.442695, %v728_v43  ;;  %v738_v56 = vadd.f32 %v736_v53, %v5615_v55 }
 0x35a   :  { %5060 = vpow2.f32 %v4298_v52  ;;  %v4299_v57 = vmul.f32 -1.442695, %v738_v56 }
 0x35c   :  { %5062 = vpow2.f32 %v4299_v57 }
 0x367   :  { %v5061_v58 = vpop.eup %5060 }
 0x368   :  { %v732_v60 = vadd.f32 1.0, %v5061_v58 }
 0x369   :  { %v5063_v61 = vpop.eup %5062 }
 0x36a   :  { %5064 = vrcp.f32 %v732_v60  ;;  %v742_v4 = vadd.f32 1.0, %v5063_v61 }
 0x36c   :  { %5066 = vrcp.f32 %v742_v4 }
 0x377   :  { %v5065_v11 = vpop.eup %5064 }
 0x378   :  { %v748_v12 = vmul.f32 %v5065_v11, %v746_v5 }
 0x379   :  { %v5067_v18 = vpop.eup %5066 }
 0x37a   :  { %v749_v17 = vadd.f32 %v748_v12, %v5546_v6  ;;  %v751_v19 = vsub.f32 1.0, %v5067_v18  ;;  %v756_v24 = vmul.f32 %v5067_v18, %v754_v54 }
 0x37c   :  { %5068 = vtanh.f32 %v749_v17  ;;  %v5659_v17 = vadd.f32 %v759_v62, %v5571_v46 }
 0x389   :  { %v5069_v59 = vpop.eup %5068 }
 0x38a   :  { %v752_v23 = vmul.f32 %v5069_v59, %v751_v19 }
 0x38c   :  { %v5623_v27 = vadd.f32 %v756_v24, %v752_v23 }
 0x38e   :  { %v767_v22 = vpack.c.bf16 %v5623_v27, %v5623_v27  ;;  %v1514_v40 = vrot.slane %v5623_v27, %v5560_v16 }
 0x390   :  { %v769_v47 = vshrl.u32 %v767_v22, 16  ;;  %v1515_v43 = vsel %vm1510_vm5, %v1514_v40, 0.0 }
 0x391   :  { %v5631_v48 = vadd.f32 %v1515_v43, %v1508_v41 }
 0x392   :  { %4300 = vmatmul.mubr.msk.bf16.vlgmr.msra.gmra.mxu1 %vm525_vm3, %v769_v47  ;;  %4636 = vmatmul.mubr.msk.bf16.vlgmr.msra.gmra.mxu0 %vm525_vm3, %v769_v47 }
 0x393   :  { %912 = vmatpush1.bf16.msra.mxu1 %v5465_v28  ;;  %4640 = vmatpush3.bf16.msra.mxu0 %v5471_v30 }
 0x394   :  { %913 = vmatprep.subr.bf16.mxu1 %v5468_v29  ;;  %4641 = vmatprep.subr.bf16.mxu0 %v5385_v1 }
 0x395   :  { %935 = vmatprep.mubr.bf16.mxu1 %v5384_v0  ;;  %4647 = vmatprep.mubr.msk.bf16.mxu0 %vm5386_vm0, %v5385_v1 }
 0x397   :  { %914 = vmatpush1.bf16.msra.mxu1 %v5476_v31  ;;  %4642 = vmatpush3.bf16.msra.mxu0 %v5483_v33 }
 0x398   :  { %915 = vmatprep.subr.bf16.mxu1 %v5480_v32  ;;  %4643 = vmatprep.subr.bf16.mxu0 %v5385_v1 }
 0x39b   :  { %916 = vmatpush1.bf16.msra.mxu1 %v5489_v34  ;;  %4644 = vmatpush3.bf16.msra.mxu0 %v5495_v36 }
 0x39c   :  { %917 = vmatprep.subr.bf16.mxu1 %v5492_v35  ;;  %4645 = vmatprep.subr.bf16.mxu0 %v5385_v1 }
 0x39f   :  { %918 = vmatpush1.bf16.msra.mxu1 %v5499_v37  ;;  %4646 = vmatpush3.bf16.msra.mxu0 %v5503_v38 }
 0x3a0   :  { %1033 = vmatprep.subr.bf16.mxu1 %v5460_v26  ;;  %4651 = vmatprep.subr.bf16.mxu0 %v5385_v1 }
 0x452   :  { %v808_v14 = vpop.f32.mrf.mxu1  ;;  %v849_v49 = vpop.f32.mrf.mxu0 }
 0x453   :  { %v809_v51 = vadd.f32 %v808_v14, %v5557_v15  ;;  %v850_v24 = vadd.f32 %v849_v49, %v5579_v45 }
 0x454   :  { %v810_v52 = vpop.f32.mrf.mxu1  ;;  %v4637_v53 = vpop.f32.mrf.mxu0 }
 0x455   :  { %v856_v56 = vrot.slane %v809_v51, 6  ;;  %v811_v57 = vadd.f32 %v810_v52, %v5564_v20  ;;  %v876_v22 = vrot.slane %v850_v24, 6  ;;  %v884_v51 = vrot.slane %v5623_v27, 7 }
 0x456   :  { %v812_v58 = vpop.f32.mrf.mxu1  ;;  %v852_v60 = vpop.f32.mrf.mxu0 }
 0x457   :  { %v858_v61 = vadd.f32 %v856_v56, %v5548_v7  ;;  %v866_v12 = vrot.slane %v811_v57, 6 }
 0x458   :  { %v813_v4 = vpop.f32.mrf.mxu1  ;;  %v4638_v5 = vpop.f32.mrf.mxu0 }
 0x459   :  { %v4302_v11 = vmul.f32 -1.442695, %v858_v61  ;;  %v868_v18 = vadd.f32 %v866_v12, %v5659_v17 }
 0x45b   :  { %5070 = vpow2.f32 %v4302_v11  ;;  %v4303_v19 = vmul.f32 -1.442695, %v868_v18 }
 0x45d   :  { %5072 = vpow2.f32 %v4303_v19 }
 0x468   :  { %v5071_v54 = vpop.eup %5070 }
 0x469   :  { %v862_v59 = vadd.f32 1.0, %v5071_v54 }
 0x46a   :  { %v5073_v23 = vpop.eup %5072 }
 0x46b   :  { %5074 = vrcp.f32 %v862_v59  ;;  %v872_v25 = vadd.f32 1.0, %v5073_v23  ;;  %v889_v23 = vrot.slane %v5542_v63, 1 }
 0x46d   :  { %5076 = vrcp.f32 %v872_v25 }
 0x478   :  { %v5075_v40 = vpop.eup %5074 }
 0x479   :  { %v878_v41 = vmul.f32 %v5075_v40, %v876_v22 }
 0x47a   :  { %v5077_v43 = vpop.eup %5076 }
 0x47b   :  { %v879_v47 = vadd.f32 %v878_v41, %v5550_v8  ;;  %v881_v14 = vsub.f32 1.0, %v5077_v43  ;;  %v886_v56 = vmul.f32 %v5077_v43, %v884_v51  ;;  %v5701_v41 = vadd.f32 %v889_v23, %v5571_v46 }
 0x47d   :  { %5078 = vtanh.f32 %v879_v47 }
 0x48a   :  { %v5079_v52 = vpop.eup %5078 }
 0x48b   :  { %v882_v53 = vmul.f32 %v5079_v52, %v881_v14 }
 0x48d   :  { %v5665_v57 = vadd.f32 %v886_v56, %v882_v53 }
 0x48f   :  { %v897_v49 = vpack.c.bf16 %v5665_v57, %v5665_v57  ;;  %v1521_v58 = vrot.slane %v5665_v57, %v5538_v44 }
 0x491   :  { %v899_v60 = vrot.slane %v897_v49, 1  ;;  %v1522_v61 = vsel %vm1517_vm6, %v1521_v58, 0.0 }
 0x492   :  { %v5673_v62 = vadd.f32 %v1522_v61, %v5631_v48 }
 0x493   :  { %4304 = vmatmul.mubr.msk.bf16.vlgmr.msra.gmra.mxu1 %vm525_vm3, %v899_v60  ;;  %4648 = vmatmul.mubr.msk.bf16.vlgmr.msra.gmra.mxu0 %vm525_vm3, %v899_v60 }
 0x494   :  { %1034 = vmatpush1.bf16.msra.mxu1 %v5465_v28  ;;  %4652 = vmatpush3.bf16.msra.mxu0 %v5471_v30 }
 0x495   :  { %1035 = vmatprep.subr.bf16.mxu1 %v5468_v29  ;;  %4653 = vmatprep.subr.bf16.mxu0 %v5385_v1 }
 0x496   :  { %1057 = vmatprep.mubr.bf16.mxu1 %v5384_v0  ;;  %4659 = vmatprep.mubr.msk.bf16.mxu0 %vm5386_vm0, %v5385_v1 }
 0x498   :  { %1036 = vmatpush1.bf16.msra.mxu1 %v5476_v31  ;;  %4654 = vmatpush3.bf16.msra.mxu0 %v5483_v33 }
 0x499   :  { %1037 = vmatprep.subr.bf16.mxu1 %v5480_v32  ;;  %4655 = vmatprep.subr.bf16.mxu0 %v5385_v1 }
 0x49c   :  { %1038 = vmatpush1.bf16.msra.mxu1 %v5489_v34  ;;  %4656 = vmatpush3.bf16.msra.mxu0 %v5495_v36 }
 0x49d   :  { %1039 = vmatprep.subr.bf16.mxu1 %v5492_v35  ;;  %4657 = vmatprep.subr.bf16.mxu0 %v5385_v1 }
 0x4a0   :  { %1040 = vmatpush1.bf16.msra.mxu1 %v5499_v37  ;;  %4658 = vmatpush3.bf16.msra.mxu0 %v5503_v38 }
 0x4a1   :  { %1153 = vmatprep.subr.bf16.mxu1 %v5460_v26  ;;  %4663 = vmatprep.subr.bf16.mxu0 %v5385_v1 }
 0x553   :  { %v937_v27 = vpop.f32.mrf.mxu1  ;;  %v978_v48 = vpop.f32.mrf.mxu0 }
 0x554   :  { %v938_v4 = vadd.f32 %v937_v27, %v5557_v15  ;;  %v979_v53 = vadd.f32 %v978_v48, %v5579_v45  ;;  %v1013_v27 = vrot.slane %v5665_v57, 7 }
 0x555   :  { %v939_v5 = vpop.f32.mrf.mxu1  ;;  %v4649_v11 = vpop.f32.mrf.mxu0 }
 0x556   :  { %v985_v12 = vrot.slane %v938_v4, 5  ;;  %v940_v18 = vadd.f32 %v939_v5, %v5564_v20  ;;  %v1005_v63 = vrot.slane %v979_v53, 5 }
 0x557   :  { %v941_v19 = vpop.f32.mrf.mxu1  ;;  %v981_v54 = vpop.f32.mrf.mxu0 }
 0x558   :  { %v987_v59 = vadd.f32 %v985_v12, %v5552_v9  ;;  %v995_v40 = vrot.slane %v940_v18, 5  ;;  %v1527_v12 = vsub.s32 3, %v5532_v39 }
 0x559   :  { %v942_v24 = vpop.f32.mrf.mxu1  ;;  %v4650_v25 = vpop.f32.mrf.mxu0 }
 0x55a   :  { %v4306_v22 = vmul.f32 -1.442695, %v987_v59  ;;  %v997_v47 = vadd.f32 %v995_v40, %v5701_v41 }
 0x55c   :  { %5080 = vpow2.f32 %v4306_v22  ;;  %v4307_v43 = vmul.f32 -1.442695, %v997_v47 }
 0x55e   :  { %5082 = vpow2.f32 %v4307_v43 }
 0x569   :  { %v5081_v14 = vpop.eup %5080 }
 0x56a   :  { %v991_v51 = vadd.f32 1.0, %v5081_v14 }
 0x56b   :  { %v5083_v52 = vpop.eup %5082 }
 0x56c   :  { %5084 = vrcp.f32 %v991_v51  ;;  %v1001_v56 = vadd.f32 1.0, %v5083_v52 }
 0x56e   :  { %5086 = vrcp.f32 %v1001_v56 }
 0x579   :  { %v5085_v49 = vpop.eup %5084 }
 0x57a   :  { %v1007_v58 = vmul.f32 %v5085_v49, %v1005_v63 }
 0x57b   :  { %v5087_v46 = vpop.eup %5086 }
 0x57c   :  { %v1008_v60 = vadd.f32 %v1007_v58, %v5554_v13  ;;  %v1010_v61 = vsub.f32 1.0, %v5087_v46  ;;  %v1015_v11 = vmul.f32 %v5087_v46, %v1013_v27 }
 0x57e   :  { %5088 = vtanh.f32 %v1008_v60 }
 0x58b   :  { %v5089_v4 = vpop.eup %5088 }
 0x58c   :  { %v1011_v5 = vmul.f32 %v5089_v4, %v1010_v61 }
 0x58e   :  { %v5708_v18 = vadd.f32 %v1015_v11, %v1011_v5 }
 0x590   :  { %v1017_v48 = vpack.c.bf16 %v5708_v18, %v5708_v18  ;;  %v1528_v19 = vrot.slane %v5708_v18, %v1527_v12 }
 0x592   :  { %v1019_v54 = vshrl.u32 %v1017_v48, 16  ;;  %v1529_v59 = vsel %vm1524_vm7, %v1528_v19, 0.0 }
 0x593   :  { %v5715_v23 = vadd.f32 %v1529_v59, %v5673_v62 }
 0x594   :  { %v1021_v57 = vrot.slane %v1019_v54, 1 }
 0x596   :  { %4308 = vmatmul.mubr.msk.bf16.vlgmr.msra.gmra.mxu1 %vm525_vm3, %v1021_v57  ;;  %4660 = vmatmul.mubr.msk.bf16.vlgmr.msra.gmra.mxu0 %vm525_vm3, %v1021_v57 }
 0x597   :  { %1154 = vmatpush1.bf16.msra.mxu1 %v5465_v28  ;;  %4664 = vmatpush3.bf16.msra.mxu0 %v5471_v30 }
 0x598   :  { %1155 = vmatprep.subr.bf16.mxu1 %v5468_v29  ;;  %4665 = vmatprep.subr.bf16.mxu0 %v5385_v1 }
 0x599   :  { %1177 = vmatprep.mubr.bf16.mxu1 %v5384_v0  ;;  %4671 = vmatprep.mubr.msk.bf16.mxu0 %vm5386_vm0, %v5385_v1 }
 0x59b   :  { %1156 = vmatpush1.bf16.msra.mxu1 %v5476_v31  ;;  %4666 = vmatpush3.bf16.msra.mxu0 %v5483_v33 }
 0x59c   :  { %1157 = vmatprep.subr.bf16.mxu1 %v5480_v32  ;;  %4667 = vmatprep.subr.bf16.mxu0 %v5385_v1 }
 0x59f   :  { %1158 = vmatpush1.bf16.msra.mxu1 %v5489_v34  ;;  %4668 = vmatpush3.bf16.msra.mxu0 %v5495_v36 }
 0x5a0   :  { %1159 = vmatprep.subr.bf16.mxu1 %v5492_v35  ;;  %4669 = vmatprep.subr.bf16.mxu0 %v5385_v1 }
 0x5a3   :  { %1160 = vmatpush1.bf16.msra.mxu1 %v5499_v37  ;;  %4670 = vmatpush3.bf16.msra.mxu0 %v5503_v38 }
 0x5a4   :  { %1275 = vmatprep.subr.bf16.mxu1 %v5460_v26  ;;  %4675 = vmatprep.subr.bf16.mxu0 %v5385_v1 }
 0x656   :  { %v1059_v62 = vpop.f32.mrf.mxu1  ;;  %v1100_v24 = vpop.f32.mrf.mxu0 }
 0x657   :  { %v1060_v25 = vadd.f32 %v1059_v62, %v5557_v15  ;;  %v1101_v4 = vadd.f32 %v1100_v24, %v5579_v45 }
 0x658   :  { %v1061_v22 = vpop.f32.mrf.mxu1  ;;  %v4661_v40 = vpop.f32.mrf.mxu0 }
 0x659   :  { %v1107_v47 = vrot.slane %v1060_v25, 4  ;;  %v1062_v43 = vadd.f32 %v1061_v22, %v5564_v20  ;;  %v1127_v11 = vrot.slane %v1101_v4, 4  ;;  %v1534_v25 = vsub.s32 4, %v5532_v39 }
 0x65a   :  { %v1063_v14 = vpop.f32.mrf.mxu1  ;;  %v1103_v51 = vpop.f32.mrf.mxu0 }
 0x65b   :  { %v1109_v52 = vadd.f32 %v1107_v47, %v5566_v21  ;;  %v1117_v49 = vrot.slane %v1062_v43, 4 }
 0x65c   :  { %v1064_v53 = vpop.f32.mrf.mxu1  ;;  %v4662_v56 = vpop.f32.mrf.mxu0 }
 0x65d   :  { %v4310_v63 = vmul.f32 -1.442695, %v1109_v52  ;;  %v1119_v58 = vadd.f32 %v1117_v49, %v5575_v50  ;;  %v1135_v50 = vrot.slane %v5708_v18, 7 }
 0x65f   :  { %5090 = vpow2.f32 %v4310_v63  ;;  %v4311_v60 = vmul.f32 -1.442695, %v1119_v58 }
 0x661   :  { %5092 = vpow2.f32 %v4311_v60 }
 0x66c   :  { %v5091_v46 = vpop.eup %5090 }
 0x66d   :  { %v1113_v61 = vadd.f32 1.0, %v5091_v46 }
 0x66e   :  { %v5093_v27 = vpop.eup %5092 }
 0x66f   :  { %5094 = vrcp.f32 %v1113_v61  ;;  %v1123_v5 = vadd.f32 1.0, %v5093_v27 }
 0x671   :  { %5096 = vrcp.f32 %v1123_v5 }
 0x67c   :  { %v5095_v12 = vpop.eup %5094 }
 0x67d   :  { %v1129_v48 = vmul.f32 %v5095_v12, %v1127_v11 }
 0x67e   :  { %v5097_v19 = vpop.eup %5096 }
 0x67f   :  { %v1130_v21 = vadd.f32 %v1129_v48, %v5582_v2  ;;  %v1132_v54 = vsub.f32 1.0, %v5097_v19  ;;  %v1137_v62 = vmul.f32 %v5097_v19, %v1135_v50 }
 0x681   :  { %5098 = vtanh.f32 %v1130_v21 }
 0x68e   :  { %v5099_v59 = vpop.eup %5098 }
 0x68f   :  { %v1133_v57 = vmul.f32 %v5099_v59, %v1132_v54 }
 0x691   :  { %v5746_v22 = vadd.f32 %v1137_v62, %v1133_v57 }
 0x693   :  { %v1139_v24 = vpack.c.bf16 %v5746_v22, %v5746_v22  ;;  %v1535_v40 = vrot.slane %v5746_v22, %v1534_v25 }
 0x695   :  { %v1141_v2 = vrot.slane %v1139_v24, 2  ;;  %v1536_v47 = vsel %vm1531_vm8, %v1535_v40, 0.0  ;;  %v1541_v40 = vsub.s32 5, %v5532_v39  ;;  %vm2115_vm8 = vcmp.eq.s32.totalorder %v5448_v10, 1 }
 0x696   :  { %v5753_v43 = vadd.f32 %v1536_v47, %v5715_v23 }
 0x697   :  { %4312 = vmatmul.mubr.msk.bf16.vlgmr.msra.gmra.mxu1 %vm525_vm3, %v1141_v2  ;;  %4672 = vmatmul.mubr.msk.bf16.vlgmr.msra.gmra.mxu0 %vm525_vm3, %v1141_v2 }
 0x698   :  { %1276 = vmatpush1.bf16.msra.mxu1 %v5465_v28  ;;  %4676 = vmatpush3.bf16.msra.mxu0 %v5471_v30 }
 0x699   :  { %1277 = vmatprep.subr.bf16.mxu1 %v5468_v29  ;;  %4677 = vmatprep.subr.bf16.mxu0 %v5385_v1 }
 0x69a   :  { %1299 = vmatprep.mubr.bf16.mxu1 %v5384_v0  ;;  %4683 = vmatprep.mubr.msk.bf16.mxu0 %vm5386_vm0, %v5385_v1 }
 0x69c   :  { %1278 = vmatpush1.bf16.msra.mxu1 %v5476_v31  ;;  %4678 = vmatpush3.bf16.msra.mxu0 %v5483_v33 }
 0x69d   :  { %1279 = vmatprep.subr.bf16.mxu1 %v5480_v32  ;;  %4679 = vmatprep.subr.bf16.mxu0 %v5385_v1 }
 0x6a0   :  { %1280 = vmatpush1.bf16.msra.mxu1 %v5489_v34  ;;  %4680 = vmatpush3.bf16.msra.mxu0 %v5495_v36 }
 0x6a1   :  { %1281 = vmatprep.subr.bf16.mxu1 %v5492_v35  ;;  %4681 = vmatprep.subr.bf16.mxu0 %v5385_v1 }
 0x6a4   :  { %1282 = vmatpush1.bf16.msra.mxu1 %v5499_v37  ;;  %4682 = vmatpush3.bf16.msra.mxu0 %v5503_v38 }
 0x6a5   :  { %1395 = vmatprep.subr.bf16.mxu1 %v5460_v26  ;;  %4687 = vmatprep.subr.bf16.mxu0 %v5385_v1 }
 0x757   :  { %v1179_v18 = vpop.f32.mrf.mxu1  ;;  %v1220_v23 = vpop.f32.mrf.mxu0 }
 0x758   :  { %v1180_v14 = vadd.f32 %v1179_v18, %v5557_v15  ;;  %v1221_v48 = vadd.f32 %v1220_v23, %v5579_v45 }
 0x759   :  { %v1181_v51 = vpop.f32.mrf.mxu1  ;;  %v4673_v52 = vpop.f32.mrf.mxu0 }
 0x75a   :  { %v1227_v53 = vrot.slane %v1180_v14, 3  ;;  %v1182_v56 = vadd.f32 %v1181_v51, %v5564_v20  ;;  %v1247_v19 = vrot.slane %v1221_v48, 3 }
 0x75b   :  { %v1183_v63 = vpop.f32.mrf.mxu1  ;;  %v1223_v49 = vpop.f32.mrf.mxu0 }
 0x75c   :  { %v1229_v58 = vadd.f32 %v1227_v53, %v5544_v3  ;;  %v1237_v27 = vrot.slane %v1182_v56, 3 }
 0x75d   :  { %v1184_v60 = vpop.f32.mrf.mxu1  ;;  %v4674_v46 = vpop.f32.mrf.mxu0 }
 0x75e   :  { %v4314_v61 = vmul.f32 -1.442695, %v1229_v58  ;;  %v1239_v26 = vadd.f32 %v1237_v27, %v5615_v55  ;;  %v1255_v55 = vrot.slane %v5746_v22, 7 }
 0x760   :  { %5100 = vpow2.f32 %v4314_v61  ;;  %v4315_v4 = vmul.f32 -1.442695, %v1239_v26 }
 0x762   :  { %5102 = vpow2.f32 %v4315_v4 }
 0x76d   :  { %v5101_v5 = vpop.eup %5100 }
 0x76e   :  { %v1233_v11 = vadd.f32 1.0, %v5101_v5 }
 0x76f   :  { %v5103_v12 = vpop.eup %5102 }
 0x770   :  { %5104 = vrcp.f32 %v1233_v11  ;;  %v1243_v21 = vadd.f32 1.0, %v5103_v12 }
 0x772   :  { %5106 = vrcp.f32 %v1243_v21  ;;  %v1548_v21 = vsub.s32 6, %v5532_v39 }
 0x77d   :  { %v5105_v54 = vpop.eup %5104 }
 0x77e   :  { %v1249_v50 = vmul.f32 %v5105_v54, %v1247_v19 }
 0x77f   :  { %v5107_v59 = vpop.eup %5106 }
 0x780   :  { %v1250_v3 = vadd.f32 %v1249_v50, %v5546_v6  ;;  %v1252_v57 = vsub.f32 1.0, %v5107_v59  ;;  %v1257_v24 = vmul.f32 %v5107_v59, %v1255_v55  ;;  %v1566_v55 = vadd.s32 32, %v5448_v10 }
 0x782   :  { %5108 = vtanh.f32 %v1250_v3 }
 0x78f   :  { %v5109_v62 = vpop.eup %5108 }
 0x790   :  { %v1253_v25 = vmul.f32 %v5109_v62, %v1252_v57  ;;  %v1565_v57 = vadd.s32 56, %v5532_v39  ;;  %v1564_v62 = vadd.s32 48, %v5532_v39 }
 0x792   :  { %v5784_v2 = vadd.f32 %v1257_v24, %v1253_v25  ;;  %v1563_v25 = vadd.s32 40, %v5532_v39  ;;  %vm1574_vm11 = vcmp.eq.s32.totalorder %v1565_v57, %v1566_v55  ;;  %vm1573_vm12 = vcmp.eq.s32.totalorder %v1564_v62, %v1566_v55  ;;  %v5034_v57 = vld [vmem:[#allocation5 + $0x128] ss:$12 sps:$4 sm:$0xff]   ;;  %v5031_v62 = vld [vmem:[#allocation5 + $0x138] ss:$12 sps:$4 sm:$0xff]  }
 0x793   :  { %v1562_v24 = vadd.s32 32, %v5532_v39 }
 0x794   :  { %v1259_v47 = vpack.c.bf16 %v5784_v2, %v5784_v2  ;;  %v1542_v18 = vrot.slane %v5784_v2, %v1541_v40  ;;  %v5387_v40 = vmov 1.0   ;;  %vm1572_vm13 = vcmp.eq.s32.totalorder %v1563_v25, %v1566_v55 }
 0x795   :  { %vm1571_vm14 = vcmp.eq.s32.totalorder %v1562_v24, %v1566_v55  ;;  %v5230_v24 = vld [vmem:[#allocation2] sm:$0xff]  }
 0x796   :  { %v1261_v6 = vshrl.u32 %v1259_v47, 16  ;;  %v1543_v23 = vsel %vm1538_vm9, %v1542_v18, 0.0  ;;  %vm2424_vm9 = vcmask 1043456  }
 0x797   :  { %v5791_v14 = vadd.f32 %v1543_v23, %v5753_v43 }
 0x798   :  { %v1263_v22 = vrot.slane %v1261_v6, 2 }
 0x79a   :  { %4316 = vmatmul.mubr.msk.bf16.vlgmr.msra.gmra.mxu1 %vm525_vm3, %v1263_v22  ;;  %4684 = vmatmul.mubr.msk.bf16.vlgmr.msra.gmra.mxu0 %vm525_vm3, %v1263_v22 }
 0x79b   :  { %1396 = vmatpush1.bf16.msra.mxu1 %v5465_v28  ;;  %4688 = vmatpush3.bf16.msra.mxu0 %v5471_v30 }
 0x79c   :  { %1397 = vmatprep.subr.bf16.mxu1 %v5468_v29  ;;  %4689 = vmatprep.subr.bf16.mxu0 %v5385_v1 }
 0x79d   :  { %1419 = vmatprep.mubr.bf16.mxu1 %v5384_v0  ;;  %4695 = vmatprep.mubr.msk.bf16.mxu0 %vm5386_vm0, %v5385_v1 }
 0x79f   :  { %1398 = vmatpush1.bf16.msra.mxu1 %v5476_v31  ;;  %4690 = vmatpush3.bf16.msra.mxu0 %v5483_v33 }
 0x7a0   :  { %1399 = vmatprep.subr.bf16.mxu1 %v5480_v32  ;;  %4691 = vmatprep.subr.bf16.mxu0 %v5385_v1 }
 0x7a3   :  { %1400 = vmatpush1.bf16.msra.mxu1 %v5489_v34  ;;  %4692 = vmatpush3.bf16.msra.mxu0 %v5495_v36 }
 0x7a4   :  { %1401 = vmatprep.subr.bf16.mxu1 %v5492_v35  ;;  %4693 = vmatprep.subr.bf16.mxu0 %v5385_v1 }
 0x7a7   :  { %1402 = vmatpush1.bf16.msra.mxu1 %v5499_v37  ;;  %4694 = vmatpush3.bf16.msra.mxu0 %v5503_v38 }
 0x7a8   :  { %4699 = vmatprep.subr.mxu1 %v5385_v1  ;;  %4718 = vmatprep.subr.mxu0 %v5385_v1 }
 0x85a   :  { %v1301_v28 = vpop.f32.mrf.mxu1  ;;  %v1342_v29 = vpop.f32.mrf.mxu0 }
 0x85b   :  { %v1302_v30 = vadd.f32 %v1301_v28, %v5557_v15  ;;  %v1343_v60 = vadd.f32 %v1342_v29, %v5579_v45 }
 0x85c   :  { %v1303_v31 = vpop.f32.mrf.mxu1  ;;  %v4685_v32 = vpop.f32.mrf.mxu0 }
 0x85d   :  { %v1349_v33 = vrot.slane %v1302_v30, 2  ;;  %v1304_v34 = vadd.f32 %v1303_v31, %v5564_v20  ;;  %v1369_v61 = vrot.slane %v1343_v60, 2 }
 0x85e   :  { %v1305_v35 = vpop.f32.mrf.mxu1  ;;  %v1345_v36 = vpop.f32.mrf.mxu0 }
 0x85f   :  { %v1351_v43 = vadd.f32 %v1349_v33, %v5548_v7  ;;  %v1359_v52 = vrot.slane %v1304_v34, 2 }
 0x860   :  { %v1306_v37 = vpop.f32.mrf.mxu1  ;;  %v4686_v51 = vpop.f32.mrf.mxu0 }
 0x861   :  { %v4318_v38 = vmul.f32 -1.442695, %v1351_v43  ;;  %v1361_v53 = vadd.f32 %v1359_v52, %v5659_v17  ;;  %v1377_v17 = vrot.slane %v5784_v2, 7 }
 0x863   :  { %5110 = vpow2.f32 %v4318_v38  ;;  %v4319_v56 = vmul.f32 -1.442695, %v1361_v53 }
 0x865   :  { %5112 = vpow2.f32 %v4319_v56 }
 0x870   :  { %v5111_v63 = vpop.eup %5110 }
 0x871   :  { %v1355_v49 = vadd.f32 1.0, %v5111_v63 }
 0x872   :  { %v5113_v58 = vpop.eup %5112 }
 0x873   :  { %5114 = vrcp.f32 %v1355_v49  ;;  %v1365_v46 = vadd.f32 1.0, %v5113_v58 }
 0x875   :  { %5116 = vrcp.f32 %v1365_v46  ;;  %v1555_v46 = vsub.s32 7, %v5532_v39 }
 0x877   :  { %vm1592_vm1 = vcmp.eq.s32.totalorder %v5448_v10, %v1555_v46 }
 0x880   :  { %v5115_v27 = vpop.eup %5114 }
 0x881   :  { %v1371_v26 = vmul.f32 %v5115_v27, %v1369_v61 }
 0x882   :  { %v5117_v4 = vpop.eup %5116 }
 0x883   :  { %v1372_v7 = vadd.f32 %v1371_v26, %v5550_v8  ;;  %v1374_v5 = vsub.f32 1.0, %v5117_v4  ;;  %v1379_v48 = vmul.f32 %v5117_v4, %v1377_v17  ;;  %v5029_v17 = vld [vmem:[#allocation7 + $0x10] sm:$0xff]  }
 0x885   :  { %5118 = vtanh.f32 %v1372_v7  ;;  %v4328_v7 = vsel %vm1592_vm1, 1.0, %v5385_v1 }
 0x892   :  { %v5119_v11 = vpop.eup %5118 }
 0x893   :  { %v1375_v12 = vmul.f32 %v5119_v11, %v1374_v5  ;;  %v5030_v11 = vld [vmem:[#allocation5 + $0x140] ss:$12 sps:$4 sm:$0xff]  }
 0x895   :  { %v5822_v19 = vadd.f32 %v1379_v48, %v1375_v12  ;;  %v1559_v48 = vadd.s32 8, %v5532_v39 }
 0x897   :  { %v1381_v54 = vpack.c.bf16 %v5822_v19, %v5822_v19  ;;  %v1549_v50 = vrot.slane %v5822_v19, %v1548_v21  ;;  %v1497_v63 = vrot.slane %v5822_v19, 7  ;;  %v1560_v21 = vadd.s32 16, %v5532_v39 }
 0x898   :  { %vm1744_vm5 = vcmp.eq.s32.totalorder %v1559_v48, %v5448_v10 }
 0x899   :  { %v1383_v8 = vrot.slane %v1381_v54, 3  ;;  %v1550_v3 = vsel %vm1545_vm10, %v1549_v50, 0.0  ;;  %v5033_v50 = vld [vmem:[#allocation5 + $0x13c] ss:$12 sps:$4 sm:$0xff]   ;;  %vm1745_vm6 = vcmp.eq.s32.totalorder %v1560_v21, %v5448_v10  ;;  %v4336_v55 = vsel %vm1744_vm5, 1.0, %v5385_v1 }
 0x89a   :  { %v5829_v59 = vadd.f32 %v1550_v3, %v5791_v14  ;;  %v4337_v25 = vsel %vm1745_vm6, 1.0, %v5385_v1  ;;  %vm2408_vm10 = vcmask 57344  }
 0x89b   :  { %4320 = vmatmul.mubr.msk.bf16.vlgmr.msra.gmra.mxu1 %vm525_vm3, %v1383_v8  ;;  %4696 = vmatmul.mubr.msk.bf16.vlgmr.msra.gmra.mxu0 %vm525_vm3, %v1383_v8  ;;  %v1561_v8 = vadd.s32 24, %v5532_v39 }
 0x89c   :  { %4715 = vmatprep.mubr.msk.f32.mxu1 %vm5386_vm0, %v5385_v1  ;;  %4720 = vmatprep.mubr.msk.f32.mxu0 %vm5386_vm0, %v5385_v1 }
 0x89d   :  { %4700 = vmatpush3.msk.msra.mxu1 %vm1574_vm11, %v5387_v40  ;;  %vm1746_vm7 = vcmp.eq.s32.totalorder %v1561_v8, %v5448_v10  ;;  %vm2578_vm11 = vcmask 253952  }
 0x89e   :  { %4701 = vmatprep.subr.mxu1 %v5385_v1 }
 0x89f   :  { %4702 = vmatpush3.msk.msra.mxu1 %vm1573_vm12, %v5387_v40 }
 0x8a0   :  { %4703 = vmatprep.subr.mxu1 %v5385_v1 }
 0x8a1   :  { %4704 = vmatpush3.msk.msra.mxu1 %vm1572_vm13, %v5387_v40 }
 0x8a2   :  { %4705 = vmatprep.subr.mxu1 %v5385_v1 }
 0x8a3   :  { %4706 = vmatpush3.msk.msra.mxu1 %vm1571_vm14, %v5387_v40  ;;  %v4338_v40 = vsel %vm1746_vm7, 1.0, %v5385_v1 }
 0x8a4   :  { %4707 = vmatprep.subr.mxu1 %v5385_v1 }
 0x8a5   :  { %4708 = vmatpush3.msra.mxu1 %v5385_v1 }
 0x8a6   :  { %4709 = vmatprep.subr.mxu1 %v5385_v1 }
 0x8a7   :  { %4710 = vmatpush3.msra.mxu1 %v5385_v1 }
 0x8a8   :  { %4711 = vmatprep.subr.mxu1 %v5385_v1 }
 0x8a9   :  { %4712 = vmatpush3.msra.mxu1 %v5385_v1 }
 0x8aa   :  { %4713 = vmatprep.subr.mxu1 %v5385_v1 }
 0x8ab   :  { %4714 = vmatpush3.msra.mxu1 %v5385_v1 }
 0x8ac   :  { %4731 = vmatprep.subr.bf16.mxu1 %v5385_v1 }
 0x95b   :  { %v1421_v2 = vpop.f32.mrf.mxu1  ;;  %v1462_v47 = vpop.f32.mrf.mxu0 }
 0x95c   :  { %v1422_v18 = vadd.f32 %v1421_v2, %v5557_v15  ;;  %v1463_v51 = vadd.f32 %v1462_v47, %v5579_v45  ;;  %v5035_v2 = vld [vmem:[#allocation5 + $0x120] ss:$12 sps:$4 sm:$0xff]   ;;  %v5231_v47 = vld [vmem:[#allocation2 + $0x8] sm:$0xff]  }
 0x95d   :  { %v1423_v6 = vpop.f32.mrf.mxu1  ;;  %v4697_v23 = vpop.f32.mrf.mxu0 }
 0x95e   :  { %v1469_v14 = vrot.slane %v1422_v18, 1  ;;  %v1424_v22 = vadd.f32 %v1423_v6, %v5564_v20  ;;  %v1489_v38 = vrot.slane %v1463_v51, 1 }
 0x95f   :  { %v1425_v28 = vpop.f32.mrf.mxu1  ;;  %v1465_v29 = vpop.f32.mrf.mxu0 }
 0x960   :  { %v1471_v30 = vadd.f32 %v1469_v14, %v5552_v9  ;;  %v1479_v34 = vrot.slane %v1424_v22, 1 }
 0x961   :  { %v1426_v31 = vpop.f32.mrf.mxu1  ;;  %v4698_v32 = vpop.f32.mrf.mxu0 }
 0x962   :  { %v4322_v33 = vmul.f32 -1.442695, %v1471_v30  ;;  %v1481_v35 = vadd.f32 %v1479_v34, %v5701_v41  ;;  %v1950_v30 = vld [vmem:[#allocation8 + $0x6] sm:$0x7] }
 0x963   :  { %v1963_v31 = vrot.slane %v1950_v30, %v5538_v44 }
 0x964   :  { %5120 = vpow2.f32 %v4322_v33  ;;  %v4323_v36 = vmul.f32 -1.442695, %v1481_v35 }
 0x966   :  { %5122 = vpow2.f32 %v4323_v36 }
 0x971   :  { %v5121_v43 = vpop.eup %5120 }
 0x972   :  { %v1475_v15 = vadd.f32 1.0, %v5121_v43 }
 0x973   :  { %v5123_v37 = vpop.eup %5122 }
 0x974   :  { %5124 = vrcp.f32 %v1475_v15  ;;  %v1485_v20 = vadd.f32 1.0, %v5123_v37 }
 0x976   :  { %5126 = vrcp.f32 %v1485_v20 }
 0x981   :  { %v5125_v52 = vpop.eup %5124 }
 0x982   :  { %v1491_v53 = vmul.f32 %v5125_v52, %v1489_v38 }
 0x983   :  { %v5127_v56 = vpop.eup %5126 }
 0x984   :  { %v1492_v9 = vadd.f32 %v1491_v53, %v5554_v13  ;;  %v1494_v41 = vsub.f32 1.0, %v5127_v56  ;;  %v1499_v60 = vmul.f32 %v5127_v56, %v1497_v63  ;;  %v5028_v13 = vld [vmem:[#allocation7 + $0x18] sm:$0xff]   ;;  %v4357_v63 = vsel %vm2115_vm8, 1.0, %v5385_v1 }
 0x986   :  { %5128 = vtanh.f32 %v1492_v9 }
 0x993   :  { %v5129_v49 = vpop.eup %5128 }
 0x994   :  { %v1495_v58 = vmul.f32 %v5129_v49, %v1494_v41 }
 0x996   :  { %v5862_v61 = vadd.f32 %v1499_v60, %v1495_v58  ;;  %v2118_v58 = vpack.c.bf16 %v4357_v63, %v4357_v63  ;;  %v5925_v60 = vld [vmem:[#allocation5 + $0x170] ss:$12 sps:$4 sm:$0xff]  }
 0x998   :  { %v1556_v45 = vrot.slane %v5862_v61, %v1555_v46  ;;  %v1955_v46 = vrot.slane %v1950_v30, %v5535_v42 }
 0x99a   :  { %v1557_v27 = vsel %vm1552_vm15, %v1556_v45, 0.0 }
 0x99b   :  { %v1558_v26 = vadd.f32 %v1557_v27, %v5829_v59  ;;  %v2203_v27 = vpack.c.bf16 %v5862_v61, %v5862_v61 }
 0x99d   :  { %4716 = vmatmul.mubr.msk.f32.vlgmr.msra.gmra.mxu1 %vm525_vm3, %v1558_v26  ;;  %vm1743_vm3 = vcmp.eq.s32.totalorder %v5532_v39, %v5448_v10  ;;  %v5037_v39 = vld [vmem:[#allocation5 + $0x124] ss:$12 sps:$4 sm:$0xff]   ;;  %v2205_v48 = vshrl.u32 %v2203_v27, 16 }
 0x99e   :  { %4735 = vmatprep.mubr.msk.bf16.mxu1 %vm5386_vm0, %v5385_v1  ;;  %4732 = vmatpush3.bf16.msra.mxu1 %v5028_v13  ;;  %v4335_v12 = vsel %vm1743_vm3, 1.0, %v5385_v1  ;;  %vm2606_vm3 = vcmp.eq.s32.totalorder %v5448_v10, 0 }
 0x99f   :  { %4733 = vmatprep.subr.bf16.mxu1 %v5385_v1 }
 0x9a2   :  { %4734 = vmatpush3.bf16.msra.mxu1 %v5029_v17 }
 0x9a3   :  { %4739 = vmatprep.subr.bf16.mxu1 %v5030_v11 }
 0xa5d   :  { %v1664_v4 = vpop.f32.mrf.mxu1 }
 0xa5e   :  { %4719 = vmatpush3.msra.mxu0 %v1664_v4 }
 0xa5f   :  { %v4717_v5 = vpop.f32.mrf.mxu1  ;;  %4721 = vmatmul.mubr.msk.f32.vlgmr.msra.gmra.mxu0 %vm1668_vm4, %v4328_v7 }
 0xa60   :  { %4725 = vmatprep.mubr.msk.f32.mxu0 %vm106_vm2, %v4335_v12 }
 0xb1f   :  { %v1738_v19 = vpop.f32.mrf.mxu0 }
 0xb20   :  { %v1742_v54 = vadd.f32 %v1738_v19, %v1558_v26  ;;  %v1959_v26 = vrot.slane %v1950_v30, %v5560_v16 }
 0xb21   :  { %v4722_v3 = vpop.f32.mrf.mxu0 }
 0xb22   :  { %v1871_v59 = vpack.c.bf16 %v1742_v54, %v1742_v54  ;;  %4723 = vmatprep.subr.msk.mxu0 %vm106_vm2, %v1742_v54 }
 0xb23   :  { %4724 = vmatpush3.xpose.msk.msra.mxu0 %vm106_vm2, %v1742_v54 }
 0xb24   :  { %4736 = vmatmul.mubr.msk.bf16.vlgmr.msra.gmra.mxu1 %vm106_vm2, %v1871_v59  ;;  %2017 = vmatprep.subr.bf16.mxu0 %v5033_v50 }
 0xb25   :  { %4740 = vmatpush3.bf16.msra.mxu1 %v5030_v11  ;;  %4743 = vmatprep.mubr.msk.bf16.mxu1 %vm106_vm2, %v5230_v24  ;;  %v5934_v11 = vld [vmem:[#allocation5 + $0x158] ss:$12 sps:$4 sm:$0xff]  }
 0xb26   :  { %4726 = vmatmul.mubr.msk.f32.vlgmr.msra.gmra.mxu0 %vm106_vm2, %v4336_v55  ;;  %4741 = vmatprep.subr.bf16.mxu1 %v5034_v57  ;;  %v5952_v55 = vld [vmem:[#allocation5 + $0x16c] ss:$12 sps:$4 sm:$0xff]  }
 0xb27   :  { %2018 = vmatpush1.bf16.msra.mxu0 %v5031_v62  ;;  %4728 = vmatprep.mubr.msk.f32.mxu0 %vm106_vm2, %v4337_v25 }
 0xb28   :  { %2019 = vmatprep.subr.bf16.mxu0 %v5037_v39  ;;  %v5963_v39 = vld [vmem:[#allocation5 + $0x168] ss:$12 sps:$4 sm:$0xff]  }
 0xb29   :  { %4742 = vmatpush3.bf16.msra.mxu1 %v5034_v57  ;;  %v2207_v57 = vrot.slane %v2205_v48, 3 }
 0xb2a   :  { %4729 = vmatmul.mubr.msk.f32.gmra.mxu0 %vm106_vm2, %v4338_v40  ;;  %v5971_v40 = vld [vmem:[#allocation5 + $0x150] ss:$12 sps:$4 sm:$0xff]  }
 0xb2b   :  { %2020 = vmatpush1.bf16.msra.mxu0 %v5035_v2  ;;  %2037 = vmatprep.mubr.bf16.mxu0 %v5384_v0 }
 0xb2c   :  { %4744 = vmatmul.mubr.msk.bf16.vlgmr.msra.gmra.mxu1 %vm106_vm2, %v5231_v47  ;;  %4747 = vmatprep.subr.bf16.mxu0 %v5385_v1 }
 0xb2d   :  { %2154 = vmatprep.mubr.bf16.mxu1 %v5384_v0 }
 0xb2e   :  { %4353 = vmatmul.mubr.msk.bf16.vlgmr.msra.gmra.mxu0 %vm106_vm2, %v5230_v24  ;;  %v5967_v24 = vld [vmem:[#allocation5 + $0x154] ss:$12 sps:$4 sm:$0xff]  }
 0xb2f   :  { %2047 = vmatprep.mubr.bf16.mxu0 %v5384_v0 }
 0xb36   :  { %4354 = vmatmul.mubr.msk.bf16.gmra.mxu0 %vm106_vm2, %v5231_v47 }
 0xb37   :  { %4751 = vmatprep.mubr.msk.bf16.mxu0 %vm5386_vm0, %v5385_v1 }
 0xbe4   :  { %v5903_v18 = vpop.f32.mrf.mxu1 }
 0xbe5   :  { %v1927_v54 = vpack.c.bf16 %v5903_v18, %v5903_v18 }
 0xbe6   :  { %v5905_v6 = vpop.f32.mrf.mxu0  ;;  %v4737_v23 = vpop.f32.mrf.mxu1 }
 0xbe7   :  { %v5954_v62 = vsel %vm2424_vm9, %v1927_v54, 0  ;;  %vm3415_vm9 = vcmp.eq.s32.totalorder %v5448_v10, 2 }
 0xbe8   :  { %v5907_v14 = vpop.f32.mrf.mxu0  ;;  %v1924_v22 = vpop.f32.mrf.mxu1 }
 0xbe9   :  { %v5988_v47 = vpack.c.bf16 %v5905_v6, %v5907_v14 }
 0xbea   :  { %v5909_v28 = vpop.f32.mrf.mxu0  ;;  %v4738_v29 = vpop.f32.mrf.mxu1 }
 0xbec   :  { %v5912_v32 = vpop.f32.mrf.mxu0  ;;  %v4745_v33 = vpop.f32.mrf.mxu1 }
 0xbed   :  { %v2101_v36 = vadd.f32 %v4745_v33, %v1963_v31  ;;  %v5979_v2 = vpack.c.bf16 %v5909_v28, %v5912_v32 }
 0xbee   :  { %v2039_v34 = vpop.f32.mrf.mxu0  ;;  %v2092_v35 = vpop.f32.mrf.mxu1 }
 0xbef   :  { %v2093_v37 = vadd.f32 %v2092_v35, %v1963_v31  ;;  %v2040_v59 = vadd.f32 %v2039_v34, %v1955_v46  ;;  %v2114_v35 = vld [vmem:[#allocation8 + $0x9] sm:$0x7] }
 0xbf0   :  { %v2041_v43 = vpop.f32.mrf.mxu0  ;;  %v4746_v15 = vpop.f32.mrf.mxu1 }
 0xbf1   :  { %v2104_v51 = vadd.f32 %v4746_v15, %v1963_v31  ;;  %v2042_v21 = vadd.f32 %v2041_v43, %v1959_v26  ;;  %v5993_v43 = vrot.slane %v2114_v35, %v5535_v42 }
 0xbf2   :  { %v2043_v20 = vpop.f32.mrf.mxu0  ;;  %v2095_v38 = vpop.f32.mrf.mxu1 }
 0xbf3   :  { %v5915_v52 = vpack.c.bf16 %v2104_v51, %v2101_v36  ;;  %v2096_v53 = vadd.f32 %v2095_v38, %v1963_v31  ;;  %v2044_v50 = vadd.f32 %v2043_v20, %v1955_v46 }
 0xbf4   :  { %v2045_v9 = vpop.f32.mrf.mxu0 }
 0xbf5   :  { %v5917_v56 = vpack.c.bf16 %v2096_v53, %v2093_v37  ;;  %4748 = vmatpush3.bf16.msra.mxu0 %v5915_v52  ;;  %v2046_v4 = vadd.f32 %v2045_v9, %v1959_v26  ;;  %v5956_v25 = vpack.c.bf16 %v2044_v50, %v2040_v59  ;;  %v5997_v37 = vrot.slane %v2114_v35, %v5560_v16  ;;  %v6007_v50 = vld [vmem:[#allocation7 + $0x8] sm:$0xff]   ;;  %v6016_v59 = vld [vmem:[#allocation7] sm:$0xff]  }
 0xbf6   :  { %v2049_v41 = vpop.f32.mrf.mxu0  ;;  %4749 = vmatprep.subr.bf16.mxu0 %v5385_v1 }
 0xbf7   :  { %v2050_v12 = vadd.f32 %v2049_v41, %v1955_v46  ;;  %v5945_v3 = vpack.c.bf16 %v2046_v4, %v2042_v21 }
 0xbf8   :  { %v2051_v49 = vpop.f32.mrf.mxu0 }
 0xbf9   :  { %4750 = vmatpush3.bf16.msra.mxu0 %v5917_v56  ;;  %v2052_v5 = vadd.f32 %v2051_v49, %v1959_v26 }
 0xbfa   :  { %v2053_v45 = vpop.f32.mrf.mxu0  ;;  %4755 = vmatprep.subr.bf16.mxu0 %v5385_v1 }
 0xbfb   :  { %v2054_v13 = vadd.f32 %v2053_v45, %v1955_v46  ;;  %v6001_v45 = vrot.slane %v2114_v35, %v5538_v44 }
 0xbfc   :  { %v2055_v7 = vpop.f32.mrf.mxu0  ;;  %4752 = vmatmul.mubr.msk.bf16.vlgmr.msra.gmra.mxu0 %vm106_vm2, %v2118_v58 }
 0xbfd   :  { %v2056_v17 = vadd.f32 %v2055_v7, %v1959_v26  ;;  %4756 = vmatpush3.bf16.msra.mxu0 %v5925_v60  ;;  %4759 = vmatprep.mubr.msk.bf16.mxu0 %vm5386_vm0, %v5385_v1  ;;  %v5943_v8 = vpack.c.bf16 %v2054_v13, %v2050_v12 }
 0xbfe   :  { %4757 = vmatprep.subr.bf16.mxu0 %v5385_v1 }
 0xbff   :  { %v5939_v19 = vpack.c.bf16 %v2056_v17, %v2052_v5  ;;  %v2360_v17 = vrot.slane %v5862_v61, 7 }
 0xc01   :  { %2134 = vmatprep.subr.bf16.mxu1 %v5939_v19  ;;  %4758 = vmatpush3.bf16.msra.mxu0 %v5934_v11 }
 0xc02   :  { %2135 = vmatpush1.bf16.msra.mxu1 %v5943_v8  ;;  %4771 = vmatprep.subr.bf16.mxu0 %v5385_v1 }
 0xc03   :  { %2136 = vmatprep.subr.bf16.mxu1 %v5945_v3 }
 0xc04   :  { %4760 = vmatmul.mubr.msk.bf16.vlgmr.msra.gmra.mxu0 %vm106_vm2, %v2207_v57 }
 0xc05   :  { %4772 = vmatpush3.bf16.msra.mxu0 %v5954_v62  ;;  %4773 = vmatprep.mubr.msk.bf16.mxu0 %vm5386_vm0, %v5385_v1 }
 0xc06   :  { %2137 = vmatpush1.bf16.msra.mxu1 %v5956_v25  ;;  %4785 = vmatprep.subr.bf16.mxu0 %v5385_v1 }
 0xc07   :  { %2271 = vmatprep.subr.bf16.mxu1 %v5952_v55 }
 0xc09   :  { %4358 = vmatmul.mubr.msk.bf16.vlgmr.msra.gmra.mxu1 %vm106_vm2, %v2118_v58 }
 0xc0a   :  { %2272 = vmatpush1.bf16.msra.mxu1 %v5963_v39  ;;  %2291 = vmatprep.mubr.bf16.mxu1 %v5384_v0 }
 0xc0b   :  { %2273 = vmatprep.subr.bf16.mxu1 %v5967_v24 }
 0xc0e   :  { %2274 = vmatpush1.bf16.msra.mxu1 %v5971_v40 }
 0xc0f   :  { %4763 = vmatprep.subr.bf16.mxu1 %v5385_v1 }
 0xc11   :  { %4366 = vmatmul.mubr.msk.bf16.vlgmr.msra.gmra.mxu1 %vm106_vm2, %v2207_v57 }
 0xc12   :  { %4764 = vmatpush3.bf16.msra.mxu1 %v5979_v2  ;;  %4767 = vmatprep.mubr.msk.bf16.mxu1 %vm5386_vm0, %v5385_v1 }
 0xc13   :  { %4765 = vmatprep.subr.bf16.mxu1 %v5385_v1 }
 0xc16   :  { %4766 = vmatpush3.bf16.msra.mxu1 %v5988_v47 }
 0xc17   :  { %4777 = vmatprep.subr.bf16.mxu1 %v5385_v1 }
 0xcbc   :  { %v2197_v18 = vpop.f32.mrf.mxu0 }
 0xcbe   :  { %v4753_v23 = vpop.f32.mrf.mxu0 }
 0xcc0   :  { %v2200_v22 = vpop.f32.mrf.mxu0 }
 0xcc2   :  { %v4754_v28 = vpop.f32.mrf.mxu0 }
 0xcc4   :  { %v2334_v29 = vpop.f32.mrf.mxu0 }
 0xcc5   :  { %v2335_v27 = vadd.f32 %v2334_v29, %v6001_v45 }
 0xcc6   :  { %v4761_v30 = vpop.f32.mrf.mxu0 }
 0xcc8   :  { %v2337_v31 = vpop.f32.mrf.mxu0 }
 0xcc9   :  { %v2156_v32 = vpop.f32.mrf.mxu1 }
 0xcca   :  { %v4762_v33 = vpop.f32.mrf.mxu0 }
 0xccb   :  { %v2158_v34 = vpop.f32.mrf.mxu1 }
 0xccd   :  { %v2160_v36 = vpop.f32.mrf.mxu1 }
 0xccf   :  { %v2161_v6 = vpop.f32.mrf.mxu1 }
 0xcd1   :  { %v2293_v14 = vpop.f32.mrf.mxu1 }
 0xcd2   :  { %v2294_v15 = vadd.f32 %v2293_v14, %v5993_v43 }
 0xcd3   :  { %v2295_v51 = vpop.f32.mrf.mxu1 }
 0xcd4   :  { %v2340_v20 = vadd.f32 %v2294_v15, %v2156_v32  ;;  %v2296_v9 = vadd.f32 %v2295_v51, %v5997_v37 }
 0xcd5   :  { %v2297_v38 = vpop.f32.mrf.mxu1 }
 0xcd6   :  { %v4368_v53 = vmul.f32 -1.442695, %v2340_v20  ;;  %v2347_v41 = vadd.f32 %v2296_v9, %v2158_v34  ;;  %v6035_v20 = vld [vmem:[#allocation7 + $0x28] sm:$0xff]   ;;  %v6039_v38 = vld [vmem:[#allocation7 + $0x20] sm:$0xff]  }
 0xcd7   :  { %v2298_v63 = vpop.f32.mrf.mxu1 }
 0xcd8   :  { %5130 = vpow2.f32 %v4368_v53  ;;  %v4369_v49 = vmul.f32 -1.442695, %v2347_v41  ;;  %v6043_v53 = vld [vmem:[#allocation8 + $0xc] sm:$0x7] }
 0xcda   :  { %5132 = vpow2.f32 %v4369_v49 }
 0xce5   :  { %v5131_v42 = vpop.eup %5130 }
 0xce6   :  { %v2344_v58 = vadd.f32 1.0, %v5131_v42 }
 0xce7   :  { %v5133_v46 = vpop.eup %5132 }
 0xce8   :  { %5134 = vrcp.f32 %v2344_v58  ;;  %v2351_v16 = vadd.f32 1.0, %v5133_v46 }
 0xcea   :  { %5136 = vrcp.f32 %v2351_v16 }
 0xcf5   :  { %v5135_v26 = vpop.eup %5134 }
 0xcf6   :  { %v2354_v13 = vmul.f32 %v5135_v26, %v2335_v27  ;;  %v6053_v27 = vld [vmem:[#allocation8 + $0xf] sm:$0x7] }
 0xcf7   :  { %v5137_v4 = vpop.eup %5136 }
 0xcf8   :  { %v2355_v7 = vadd.f32 %v2354_v13, %v2197_v18  ;;  %v2357_v5 = vsub.f32 1.0, %v5137_v4  ;;  %v2362_v21 = vmul.f32 %v5137_v4, %v2360_v17 }
 0xcfa   :  { %5138 = vtanh.f32 %v2355_v7 }
 0xd07   :  { %v5139_v12 = vpop.eup %5138 }
 0xd08   :  { %v2358_v48 = vmul.f32 %v5139_v12, %v2357_v5 }
 0xd0a   :  { %v6005_v54 = vadd.f32 %v2362_v21, %v2358_v48 }
 0xd0c   :  { %v6011_v44 = vpack.c.bf16 %v6005_v54, %v6005_v54 }
 0xd0e   :  { %4768 = vmatmul.mubr.msk.bf16.vlgmr.msra.gmra.mxu1 %vm106_vm2, %v6011_v44 }
 0xd0f   :  { %4778 = vmatpush3.bf16.msra.mxu1 %v6007_v50  ;;  %4781 = vmatprep.mubr.msk.bf16.mxu1 %vm5386_vm0, %v5385_v1 }
 0xd10   :  { %4779 = vmatprep.subr.bf16.mxu1 %v5385_v1 }
 0xd13   :  { %4780 = vmatpush3.bf16.msra.mxu1 %v6016_v59 }
 0xd14   :  { %2628 = vmatprep.subr.bf16.mxu1 %v5939_v19 }
 0xd16   :  { %4782 = vmatmul.mubr.msk.bf16.vlgmr.msra.gmra.mxu1 %vm106_vm2, %v6011_v44 }
 0xd17   :  { %2629 = vmatpush1.bf16.msra.mxu1 %v5943_v8  ;;  %2648 = vmatprep.mubr.bf16.mxu1 %v5384_v0 }
 0xd18   :  { %2630 = vmatprep.subr.bf16.mxu1 %v5945_v3 }
 0xd1b   :  { %2631 = vmatpush1.bf16.msra.mxu1 %v5956_v25 }
 0xd1c   :  { %2709 = vmatprep.subr.bf16.mxu1 %v5952_v55 }
 0xdce   :  { %v2402_v61 = vpop.f32.mrf.mxu1 }
 0xdcf   :  { %v2409_v57 = vsel %vm2408_vm10, %v2402_v61, -inf }
 0xdd0   :  { %2410 = vmax.xlane.f32.xlu0 %v2409_v57  ;;  %v4769_v18 = vpop.f32.mrf.mxu1 }
 0xdd2   :  { %v2405_v23 = vpop.f32.mrf.mxu1 }
 0xdd4   :  { %v4770_v22 = vpop.f32.mrf.mxu1 }
 0xdd6   :  { %v2514_v28 = vpop.f32.mrf.mxu1 }
 0xdd8   :  { %v4783_v29 = vpop.f32.mrf.mxu1 }
 0xdda   :  { %v2517_v30 = vpop.f32.mrf.mxu1 }
 0xddc   :  { %v4784_v31 = vpop.f32.mrf.mxu1 }
 0xe59   :  { %v2411_v32 = vpop.xlane.xlu0 %2410 }
 0xe5a   :  { %v2412_v33 = vsub.f32 %v2402_v61, %v2411_v32 }
 0xe5c   :  { %v2413_v34 = vmul.f32 1.442695, %v2412_v33 }
 0xe5e   :  { %5140 = vpow2.f32 %v2413_v34 }
 0xe6b   :  { %v5141_v35 = vpop.eup %5140 }
 0xe6c   :  { %v2415_v36 = vsel %vm2408_vm10, %v5141_v35, 0.0 }
 0xe6d   :  { %2416 = vadd.xlane.f32.xlu1 %v2415_v36 }
 0xef6   :  { %v2417_v6 = vpop.xlane.xlu1 %2416 }
 0xef7   :  { %5142 = vrcp.f32 %v2417_v6 }
 0xf04   :  { %v5143_v14 = vpop.eup %5142 }
 0xf05   :  { %v2419_v15 = vmul.f32 %v5143_v14, %v5141_v35 }
 0xf07   :  { %v2420_v51 = vpack.c.bf16 %v2419_v15, %v2419_v15 }
 0xf09   :  { %4774 = vmatmul.mubr.msk.bf16.vlgmr.msra.gmra.mxu0 %vm1668_vm4, %v2420_v51 }
 0xf0a   :  { %4789 = vmatprep.mubr.msk.bf16.mxu0 %vm5386_vm0, %v5385_v1  ;;  %4786 = vmatpush3.bf16.msra.mxu0 %v6035_v20 }
 0xf0b   :  { %4787 = vmatprep.subr.bf16.mxu0 %v5385_v1 }
 0xf0e   :  { %4788 = vmatpush3.bf16.msra.mxu0 %v6039_v38 }
 0xf0f   :  { %4793 = vmatprep.subr.bf16.mxu0 %v5385_v1 }
 0xfc9   :  { %v2462_v9 = vpop.f32.mrf.mxu0 }
 0xfca   :  { %v2515_v63 = vadd.f32 %v2514_v28, %v2462_v9 }
 0xfcb   :  { %v4775_v41 = vpop.f32.mrf.mxu0 }
 0xfcc   :  { %v2520_v49 = vadd.f32 %v2515_v63, %v6043_v53 }
 0xfcd   :  { %v2465_v42 = vpop.f32.mrf.mxu0 }
 0xfce   :  { %5144 = vtanh.f32 %v2520_v49 }
 0xfcf   :  { %v4776_v58 = vpop.f32.mrf.mxu0 }
 0xfdb   :  { %v5145_v46 = vpop.eup %5144 }
 0xfdc   :  { %v2522_v16 = vpack.c.bf16 %v5145_v46, %v5145_v46 }
 0xfde   :  { %4790 = vmatmul.mubr.msk.bf16.vlgmr.msra.gmra.mxu0 %vm106_vm2, %v2522_v16 }
 0xfdf   :  { %4794 = vmatpush3.bf16.msra.mxu0 %v5915_v52  ;;  %4797 = vmatprep.mubr.msk.bf16.mxu0 %vm5386_vm0, %v5385_v1 }
 0xfe0   :  { %4795 = vmatprep.subr.bf16.mxu0 %v5385_v1 }
 0xfe3   :  { %4796 = vmatpush3.bf16.msra.mxu0 %v5917_v56 }
 0xfe4   :  { %4801 = vmatprep.subr.bf16.mxu0 %v5385_v1 }
0x109e   :  { %v2572_v26 = vpop.f32.mrf.mxu0 }
0x109f   :  { %v6056_v13 = vadd.f32 %v2572_v26, %v6053_v27 }
0x10a0   :  { %v4791_v7 = vpop.f32.mrf.mxu0 }
0x10a1   :  { %v2579_v4 = vsel %vm2578_vm11, %v6056_v13, -inf }
0x10a2   :  { %2580 = vmax.xlane.f32.xlu1 %v2579_v4  ;;  %v2575_v5 = vpop.f32.mrf.mxu0 }
0x10a4   :  { %v4792_v17 = vpop.f32.mrf.mxu0 }
0x112b   :  { %v6060_v12 = vpop.xlane.xlu1 %2580 }
0x112c   :  { %vm2589_vm12 = vcmp.eq.f32.partialorder %v6056_v13, %v6060_v12 }
0x112d   :  { %v2590_v48 = vsel %vm2589_vm12, %v5448_v10, 32 }
0x112e   :  { %v2591_v21 = vsel %vm2578_vm11, %v2590_v48, 2147483647 }
0x112f   :  { %v2593_v61 = vshra.s32 %v2591_v21, 16  ;;  %v2592_v18 = vand.u32 65535, %v2591_v21 }
0x1131   :  { %v2595_v57 = vcvt.s32.f32 %v2593_v61  ;;  %v2594_v22 = vcvt.s32.f32 %v2592_v18 }
0x1133   :  { %2596 = vmin.xlane.f32.xlu1 %v2595_v57 }
0x11bc   :  { %v2597_v23 = vpop.xlane.xlu1 %2596 }
0x11bd   :  { %vm2598_vm13 = vcmp.eq.f32.partialorder %v2595_v57, %v2597_v23  ;;  %v2603_v29 = vcvt.f32.s32 %v2597_v23 }
0x11be   :  { %v2599_v28 = vsel %vm2598_vm13, %v2594_v22, inf }
0x11bf   :  { %2600 = vmin.xlane.f32.xlu1 %v2599_v28  ;;  %v2604_v31 = vshll.u32 %v2603_v29, 16 }
0x1248   :  { %v2601_v30 = vpop.xlane.xlu1 %2600 }
0x1249   :  { %v2602_v32 = vcvt.f32.s32 %v2601_v30 }
0x124b   :  { %v6066_v33 = vadd.s32 %v2604_v31, %v2602_v32 }
0x124d   :  { %vm2609_vm14 = vcmp.eq.s32.totalorder %v5448_v10, %v6066_v33 }
0x124e   :  { %v4378_v34 = vsel %vm2609_vm14, 1.0, %v5385_v1 }
0x124f   :  { %v2612_v35 = vpack.c.bf16 %v4378_v34, %v4378_v34 }
0x1251   :  { %4379 = vmatmul.mubr.msk.bf16.vlgmr.msra.gmra.mxu1 %vm106_vm2, %v2612_v35  ;;  %4798 = vmatmul.mubr.msk.bf16.vlgmr.msra.gmra.mxu0 %vm106_vm2, %v2612_v35 }
0x1252   :  { %2710 = vmatpush1.bf16.msra.mxu1 %v5963_v39  ;;  %4802 = vmatpush3.bf16.msra.mxu0 %v5925_v60 }
0x1253   :  { %2711 = vmatprep.subr.bf16.mxu1 %v5967_v24  ;;  %4803 = vmatprep.subr.bf16.mxu0 %v5385_v1 }
0x1254   :  { %2729 = vmatprep.mubr.bf16.mxu1 %v5384_v0  ;;  %4805 = vmatprep.mubr.msk.bf16.mxu0 %vm5386_vm0, %v5385_v1 }
0x1256   :  { %2712 = vmatpush1.bf16.msra.mxu1 %v5971_v40  ;;  %4804 = vmatpush3.bf16.msra.mxu0 %v5934_v11 }
0x1257   :  { %4809 = vmatprep.subr.bf16.mxu1 %v5385_v1  ;;  %4817 = vmatprep.subr.bf16.mxu0 %v5385_v1 }
0x1259   :  { %4381 = vmatmul.mubr.msk.bf16.vlgmr.msra.gmra.mxu1 %vm106_vm2, %v6011_v44  ;;  %4806 = vmatmul.mubr.msk.bf16.vlgmr.msra.gmra.mxu0 %vm106_vm2, %v6011_v44 }
0x125a   :  { %4810 = vmatpush3.bf16.msra.mxu1 %v5979_v2  ;;  %4818 = vmatpush3.bf16.msra.mxu0 %v5954_v62 }
0x125b   :  { %4811 = vmatprep.subr.bf16.mxu1 %v5385_v1  ;;  %4813 = vmatprep.mubr.msk.bf16.mxu1 %vm5386_vm0, %v5385_v1 }
0x125c   :  { %4819 = vmatprep.mubr.msk.bf16.mxu0 %vm5386_vm0, %v5385_v1  ;;  %4831 = vmatprep.subr.bf16.mxu0 %v5385_v1 }
0x125e   :  { %4812 = vmatpush3.bf16.msra.mxu1 %v5988_v47 }
0x125f   :  { %4823 = vmatprep.subr.bf16.mxu1 %v5385_v1 }
0x1311   :  { %v2650_v36 = vpop.f32.mrf.mxu1  ;;  %v2691_v44 = vpop.f32.mrf.mxu0 }
0x1313   :  { %v2652_v6 = vpop.f32.mrf.mxu1  ;;  %v4799_v14 = vpop.f32.mrf.mxu0 }
0x1315   :  { %v2654_v15 = vpop.f32.mrf.mxu1  ;;  %v2694_v51 = vpop.f32.mrf.mxu0 }
0x1317   :  { %v2655_v9 = vpop.f32.mrf.mxu1  ;;  %v4800_v63 = vpop.f32.mrf.mxu0 }
0x1319   :  { %v2731_v41 = vpop.f32.mrf.mxu1  ;;  %v2772_v49 = vpop.f32.mrf.mxu0 }
0x131a   :  { %v2732_v42 = vadd.f32 %v2731_v41, %v5993_v43  ;;  %v2773_v28 = vadd.f32 %v2772_v49, %v6001_v45 }
0x131b   :  { %v2733_v58 = vpop.f32.mrf.mxu1  ;;  %v4807_v46 = vpop.f32.mrf.mxu0 }
0x131c   :  { %v2778_v16 = vadd.f32 %v2732_v42, %v2650_v36  ;;  %v2734_v5 = vadd.f32 %v2733_v58, %v5997_v37 }
0x131d   :  { %v2735_v26 = vpop.f32.mrf.mxu1  ;;  %v2775_v7 = vpop.f32.mrf.mxu0 }
0x131e   :  { %v4383_v4 = vmul.f32 -1.442695, %v2778_v16  ;;  %v2785_v21 = vadd.f32 %v2734_v5, %v2652_v6 }
0x131f   :  { %v2736_v17 = vpop.f32.mrf.mxu1  ;;  %v4808_v48 = vpop.f32.mrf.mxu0 }
0x1320   :  { %5146 = vpow2.f32 %v4383_v4  ;;  %v4384_v61 = vmul.f32 -1.442695, %v2785_v21 }
0x1322   :  { %5148 = vpow2.f32 %v4384_v61 }
0x132d   :  { %v5147_v57 = vpop.eup %5146 }
0x132e   :  { %v2782_v18 = vadd.f32 1.0, %v5147_v57 }
0x132f   :  { %v5149_v23 = vpop.eup %5148 }
0x1330   :  { %5150 = vrcp.f32 %v2782_v18  ;;  %v2789_v22 = vadd.f32 1.0, %v5149_v23 }
0x1332   :  { %5152 = vrcp.f32 %v2789_v22 }
0x133d   :  { %v5151_v29 = vpop.eup %5150 }
0x133e   :  { %v2792_v30 = vmul.f32 %v5151_v29, %v2773_v28 }
0x133f   :  { %v5153_v32 = vpop.eup %5152 }
0x1340   :  { %v2793_v31 = vadd.f32 %v2792_v30, %v2691_v44  ;;  %v2795_v34 = vsub.f32 1.0, %v5153_v32  ;;  %v2797_v6 = vmul.f32 %v5153_v32, %v6005_v54 }
0x1342   :  { %5154 = vtanh.f32 %v2793_v31 }
0x134f   :  { %v5155_v35 = vpop.eup %5154 }
0x1350   :  { %v2796_v36 = vmul.f32 %v5155_v35, %v2795_v34 }
0x1352   :  { %v6102_v14 = vadd.f32 %v2797_v6, %v2796_v36 }
0x1354   :  { %v6106_v15 = vpack.c.bf16 %v6102_v14, %v6102_v14 }
0x1356   :  { %4814 = vmatmul.mubr.msk.bf16.vlgmr.msra.gmra.mxu1 %vm106_vm2, %v6106_v15 }
0x1357   :  { %4824 = vmatpush3.bf16.msra.mxu1 %v6007_v50  ;;  %4827 = vmatprep.mubr.msk.bf16.mxu1 %vm5386_vm0, %v5385_v1 }
0x1358   :  { %4825 = vmatprep.subr.bf16.mxu1 %v5385_v1 }
0x135b   :  { %4826 = vmatpush3.bf16.msra.mxu1 %v6016_v59 }
0x135c   :  { %3032 = vmatprep.subr.bf16.mxu1 %v5939_v19 }
0x135e   :  { %4828 = vmatmul.mubr.msk.bf16.vlgmr.msra.gmra.mxu1 %vm106_vm2, %v6106_v15 }
0x135f   :  { %3033 = vmatpush1.bf16.msra.mxu1 %v5943_v8  ;;  %3052 = vmatprep.mubr.bf16.mxu1 %v5384_v0 }
0x1360   :  { %3034 = vmatprep.subr.bf16.mxu1 %v5945_v3 }
0x1363   :  { %3035 = vmatpush1.bf16.msra.mxu1 %v5956_v25 }
0x1364   :  { %3113 = vmatprep.subr.bf16.mxu1 %v5952_v55 }
0x1416   :  { %v2837_v54 = vpop.f32.mrf.mxu1 }
0x1417   :  { %v2843_v44 = vsel %vm2408_vm10, %v2837_v54, -inf }
0x1418   :  { %2844 = vmax.xlane.f32.xlu1 %v2843_v44  ;;  %v4815_v51 = vpop.f32.mrf.mxu1 }
0x141a   :  { %v2840_v9 = vpop.f32.mrf.mxu1 }
0x141c   :  { %v4816_v63 = vpop.f32.mrf.mxu1 }
0x141e   :  { %v2932_v41 = vpop.f32.mrf.mxu1 }
0x1420   :  { %v4829_v49 = vpop.f32.mrf.mxu1 }
0x1422   :  { %v2935_v42 = vpop.f32.mrf.mxu1 }
0x1424   :  { %v4830_v58 = vpop.f32.mrf.mxu1 }
0x14a1   :  { %v2845_v46 = vpop.xlane.xlu1 %2844 }
0x14a2   :  { %v2846_v16 = vsub.f32 %v2837_v54, %v2845_v46 }
0x14a4   :  { %v2847_v26 = vmul.f32 1.442695, %v2846_v16 }
0x14a6   :  { %5156 = vpow2.f32 %v2847_v26 }
0x14b3   :  { %v5157_v7 = vpop.eup %5156 }
0x14b4   :  { %v2849_v4 = vsel %vm2408_vm10, %v5157_v7, 0.0 }
0x14b5   :  { %2850 = vadd.xlane.f32.xlu1 %v2849_v4 }
0x153e   :  { %v2851_v5 = vpop.xlane.xlu1 %2850 }
0x153f   :  { %5158 = vrcp.f32 %v2851_v5  ;;  %v2607_v5 = vsel %vm2606_vm3, %v6066_v33, 0 }
0x154c   :  { %v5159_v17 = vpop.eup %5158 }
0x154d   :  { %v2853_v48 = vmul.f32 %v5159_v17, %v5157_v7 }
0x154f   :  { %v2854_v21 = vpack.c.bf16 %v2853_v48, %v2853_v48 }
0x1551   :  { %4820 = vmatmul.mubr.msk.bf16.vlgmr.msra.gmra.mxu0 %vm1668_vm4, %v2854_v21 }
0x1552   :  { %4832 = vmatpush3.bf16.msra.mxu0 %v6035_v20  ;;  %4835 = vmatprep.mubr.msk.bf16.mxu0 %vm5386_vm0, %v5385_v1 }
0x1553   :  { %4833 = vmatprep.subr.bf16.mxu0 %v5385_v1 }
0x1556   :  { %4834 = vmatpush3.bf16.msra.mxu0 %v6039_v38 }
0x1557   :  { %4839 = vmatprep.subr.bf16.mxu0 %v5385_v1 }
0x1611   :  { %v2892_v61 = vpop.f32.mrf.mxu0 }
0x1612   :  { %v2933_v57 = vadd.f32 %v2932_v41, %v2892_v61 }
0x1613   :  { %v4821_v18 = vpop.f32.mrf.mxu0 }
0x1614   :  { %v2938_v23 = vadd.f32 %v2933_v57, %v6043_v53 }
0x1615   :  { %v2895_v22 = vpop.f32.mrf.mxu0 }
0x1616   :  { %5160 = vtanh.f32 %v2938_v23 }
0x1617   :  { %v4822_v28 = vpop.f32.mrf.mxu0 }
0x1623   :  { %v5161_v29 = vpop.eup %5160 }
0x1624   :  { %v2940_v30 = vpack.c.bf16 %v5161_v29, %v5161_v29 }
0x1626   :  { %4836 = vmatmul.mubr.msk.bf16.vlgmr.msra.gmra.mxu0 %vm106_vm2, %v2940_v30 }
0x1627   :  { %4840 = vmatpush3.bf16.msra.mxu0 %v5915_v52  ;;  %4843 = vmatprep.mubr.msk.bf16.mxu0 %vm5386_vm0, %v5385_v1 }
0x1628   :  { %4841 = vmatprep.subr.bf16.mxu0 %v5385_v1 }
0x162b   :  { %4842 = vmatpush3.bf16.msra.mxu0 %v5917_v56 }
0x162c   :  { %4847 = vmatprep.subr.bf16.mxu0 %v5385_v1 }
0x16e6   :  { %v2978_v31 = vpop.f32.mrf.mxu0 }
0x16e7   :  { %v6141_v32 = vadd.f32 %v2978_v31, %v6053_v27 }
0x16e8   :  { %v4837_v34 = vpop.f32.mrf.mxu0 }
0x16e9   :  { %v2984_v35 = vsel %vm2578_vm11, %v6141_v32, -inf }
0x16ea   :  { %2985 = vmax.xlane.f32.xlu1 %v2984_v35  ;;  %v2981_v36 = vpop.f32.mrf.mxu0 }
0x16ec   :  { %v4838_v6 = vpop.f32.mrf.mxu0 }
0x1773   :  { %v6145_v54 = vpop.xlane.xlu1 %2985 }
0x1774   :  { %vm2994_vm15 = vcmp.eq.f32.partialorder %v6141_v32, %v6145_v54 }
0x1775   :  { %v2995_v44 = vsel %vm2994_vm15, %v5448_v10, 32  ;;  %vm3820_vm15 = vcmp.eq.s32.totalorder %v5448_v10, 3 }
0x1776   :  { %v2996_v51 = vsel %vm2578_vm11, %v2995_v44, 2147483647 }
0x1777   :  { %v2998_v9 = vshra.s32 %v2996_v51, 16  ;;  %v2997_v41 = vand.u32 65535, %v2996_v51 }
0x1779   :  { %v3000_v63 = vcvt.s32.f32 %v2998_v9  ;;  %v2999_v42 = vcvt.s32.f32 %v2997_v41 }
0x177b   :  { %3001 = vmin.xlane.f32.xlu1 %v3000_v63 }
0x1804   :  { %v3002_v49 = vpop.xlane.xlu1 %3001 }
0x1805   :  { %vm3003_vm1 = vcmp.eq.f32.partialorder %v3000_v63, %v3002_v49  ;;  %v3008_v46 = vcvt.f32.s32 %v3002_v49 }
0x1806   :  { %v3004_v58 = vsel %vm3003_vm1, %v2999_v42, inf }
0x1807   :  { %3005 = vmin.xlane.f32.xlu1 %v3004_v58  ;;  %v3009_v26 = vshll.u32 %v3008_v46, 16 }
0x1890   :  { %v3006_v16 = vpop.xlane.xlu1 %3005 }
0x1891   :  { %v3007_v7 = vcvt.f32.s32 %v3006_v16 }
0x1893   :  { %v3010_v4 = vadd.s32 %v3009_v26, %v3007_v7 }
0x1895   :  { %v6157_v17 = vsel %vm2115_vm8, %v3010_v4, %v2607_v5  ;;  %vm3013_vm5 = vcmp.eq.s32.totalorder %v5448_v10, %v3010_v4 }
0x1896   :  { %v4389_v48 = vsel %vm3013_vm5, 1.0, %v5385_v1 }
0x1897   :  { %v3016_v21 = vpack.c.bf16 %v4389_v48, %v4389_v48 }
0x1899   :  { %4390 = vmatmul.mubr.msk.bf16.vlgmr.msra.gmra.mxu1 %vm106_vm2, %v3016_v21  ;;  %4844 = vmatmul.mubr.msk.bf16.vlgmr.msra.gmra.mxu0 %vm106_vm2, %v3016_v21 }
0x189a   :  { %3114 = vmatpush1.bf16.msra.mxu1 %v5963_v39  ;;  %4848 = vmatpush3.bf16.msra.mxu0 %v5925_v60 }
0x189b   :  { %3115 = vmatprep.subr.bf16.mxu1 %v5967_v24  ;;  %4849 = vmatprep.subr.bf16.mxu0 %v5385_v1 }
0x189c   :  { %3133 = vmatprep.mubr.bf16.mxu1 %v5384_v0  ;;  %4851 = vmatprep.mubr.msk.bf16.mxu0 %vm5386_vm0, %v5385_v1 }
0x189e   :  { %3116 = vmatpush1.bf16.msra.mxu1 %v5971_v40  ;;  %4850 = vmatpush3.bf16.msra.mxu0 %v5934_v11 }
0x189f   :  { %4855 = vmatprep.subr.bf16.mxu1 %v5385_v1  ;;  %4863 = vmatprep.subr.bf16.mxu0 %v5385_v1 }
0x18a1   :  { %4392 = vmatmul.mubr.msk.bf16.vlgmr.msra.gmra.mxu1 %vm106_vm2, %v6106_v15  ;;  %4852 = vmatmul.mubr.msk.bf16.vlgmr.msra.gmra.mxu0 %vm106_vm2, %v6106_v15 }
0x18a2   :  { %4856 = vmatpush3.bf16.msra.mxu1 %v5979_v2  ;;  %4864 = vmatpush3.bf16.msra.mxu0 %v5954_v62 }
0x18a3   :  { %4857 = vmatprep.subr.bf16.mxu1 %v5385_v1  ;;  %4859 = vmatprep.mubr.msk.bf16.mxu1 %vm5386_vm0, %v5385_v1 }
0x18a4   :  { %4865 = vmatprep.mubr.msk.bf16.mxu0 %vm5386_vm0, %v5385_v1  ;;  %4877 = vmatprep.subr.bf16.mxu0 %v5385_v1 }
0x18a6   :  { %4858 = vmatpush3.bf16.msra.mxu1 %v5988_v47 }
0x18a7   :  { %4869 = vmatprep.subr.bf16.mxu1 %v5385_v1 }
0x1959   :  { %v3054_v33 = vpop.f32.mrf.mxu1  ;;  %v3095_v15 = vpop.f32.mrf.mxu0 }
0x195b   :  { %v3056_v61 = vpop.f32.mrf.mxu1  ;;  %v4845_v57 = vpop.f32.mrf.mxu0 }
0x195d   :  { %v3058_v18 = vpop.f32.mrf.mxu1  ;;  %v3098_v23 = vpop.f32.mrf.mxu0 }
0x195f   :  { %v3059_v22 = vpop.f32.mrf.mxu1  ;;  %v4846_v28 = vpop.f32.mrf.mxu0 }
0x1961   :  { %v3135_v29 = vpop.f32.mrf.mxu1  ;;  %v3176_v30 = vpop.f32.mrf.mxu0 }
0x1962   :  { %v3136_v31 = vadd.f32 %v3135_v29, %v5993_v43  ;;  %v3177_v7 = vadd.f32 %v3176_v30, %v6001_v45 }
0x1963   :  { %v3137_v34 = vpop.f32.mrf.mxu1  ;;  %v4853_v35 = vpop.f32.mrf.mxu0 }
0x1964   :  { %v3182_v36 = vadd.f32 %v3136_v31, %v3054_v33  ;;  %v3138_v9 = vadd.f32 %v3137_v34, %v5997_v37 }
0x1965   :  { %v3139_v6 = vpop.f32.mrf.mxu1  ;;  %v3179_v44 = vpop.f32.mrf.mxu0 }
0x1966   :  { %v4394_v51 = vmul.f32 -1.442695, %v3182_v36  ;;  %v3189_v49 = vadd.f32 %v3138_v9, %v3056_v61 }
0x1967   :  { %v3140_v63 = vpop.f32.mrf.mxu1  ;;  %v4854_v41 = vpop.f32.mrf.mxu0 }
0x1968   :  { %5162 = vpow2.f32 %v4394_v51  ;;  %v4395_v42 = vmul.f32 -1.442695, %v3189_v49 }
0x196a   :  { %5164 = vpow2.f32 %v4395_v42 }
0x1975   :  { %v5163_v58 = vpop.eup %5162 }
0x1976   :  { %v3186_v46 = vadd.f32 1.0, %v5163_v58 }
0x1977   :  { %v5165_v16 = vpop.eup %5164 }
0x1978   :  { %5166 = vrcp.f32 %v3186_v46  ;;  %v3193_v26 = vadd.f32 1.0, %v5165_v16 }
0x197a   :  { %5168 = vrcp.f32 %v3193_v26 }
0x1985   :  { %v5167_v4 = vpop.eup %5166 }
0x1986   :  { %v3196_v5 = vmul.f32 %v5167_v4, %v3177_v7 }
0x1987   :  { %v5169_v21 = vpop.eup %5168 }
0x1988   :  { %v3197_v48 = vadd.f32 %v3196_v5, %v3095_v15  ;;  %v3199_v33 = vsub.f32 1.0, %v5169_v21  ;;  %v3201_v61 = vmul.f32 %v5169_v21, %v6102_v14 }
0x198a   :  { %5170 = vtanh.f32 %v3197_v48 }
0x1997   :  { %v5171_v57 = vpop.eup %5170 }
0x1998   :  { %v3200_v18 = vmul.f32 %v5171_v57, %v3199_v33 }
0x199a   :  { %v6192_v23 = vadd.f32 %v3201_v61, %v3200_v18 }
0x199c   :  { %v6196_v22 = vpack.c.bf16 %v6192_v23, %v6192_v23 }
0x199e   :  { %4860 = vmatmul.mubr.msk.bf16.vlgmr.msra.gmra.mxu1 %vm106_vm2, %v6196_v22 }
0x199f   :  { %4870 = vmatpush3.bf16.msra.mxu1 %v6007_v50  ;;  %4873 = vmatprep.mubr.msk.bf16.mxu1 %vm5386_vm0, %v5385_v1 }
0x19a0   :  { %4871 = vmatprep.subr.bf16.mxu1 %v5385_v1 }
0x19a3   :  { %4872 = vmatpush3.bf16.msra.mxu1 %v6016_v59 }
0x19a4   :  { %3437 = vmatprep.subr.bf16.mxu1 %v5939_v19 }
0x19a6   :  { %4874 = vmatmul.mubr.msk.bf16.vlgmr.msra.gmra.mxu1 %vm106_vm2, %v6196_v22 }
0x19a7   :  { %3438 = vmatpush1.bf16.msra.mxu1 %v5943_v8  ;;  %3457 = vmatprep.mubr.bf16.mxu1 %v5384_v0 }
0x19a8   :  { %3439 = vmatprep.subr.bf16.mxu1 %v5945_v3 }
0x19ab   :  { %3440 = vmatpush1.bf16.msra.mxu1 %v5956_v25 }
0x19ac   :  { %3518 = vmatprep.subr.bf16.mxu1 %v5952_v55 }
0x1a5e   :  { %v3241_v14 = vpop.f32.mrf.mxu1 }
0x1a5f   :  { %v3247_v15 = vsel %vm2408_vm10, %v3241_v14, -inf }
0x1a60   :  { %3248 = vmax.xlane.f32.xlu0 %v3247_v15  ;;  %v4861_v28 = vpop.f32.mrf.mxu1 }
0x1a62   :  { %v3244_v29 = vpop.f32.mrf.mxu1 }
0x1a64   :  { %v4862_v30 = vpop.f32.mrf.mxu1 }
0x1a66   :  { %v3336_v31 = vpop.f32.mrf.mxu1 }
0x1a68   :  { %v4875_v34 = vpop.f32.mrf.mxu1 }
0x1a6a   :  { %v3339_v35 = vpop.f32.mrf.mxu1 }
0x1a6c   :  { %v4876_v36 = vpop.f32.mrf.mxu1 }
0x1ae9   :  { %v3249_v6 = vpop.xlane.xlu0 %3248 }
0x1aea   :  { %v3250_v44 = vsub.f32 %v3241_v14, %v3249_v6 }
0x1aec   :  { %v3251_v51 = vmul.f32 1.442695, %v3250_v44 }
0x1aee   :  { %5172 = vpow2.f32 %v3251_v51 }
0x1afb   :  { %v5173_v9 = vpop.eup %5172 }
0x1afc   :  { %v3253_v63 = vsel %vm2408_vm10, %v5173_v9, 0.0 }
0x1afd   :  { %3254 = vadd.xlane.f32.xlu1 %v3253_v63 }
0x1b86   :  { %v3255_v55 = vpop.xlane.xlu1 %3254 }
0x1b87   :  { %5174 = vrcp.f32 %v3255_v55 }
0x1b94   :  { %v5175_v41 = vpop.eup %5174 }
0x1b95   :  { %v3257_v49 = vmul.f32 %v5175_v41, %v5173_v9 }
0x1b97   :  { %v3258_v42 = vpack.c.bf16 %v3257_v49, %v3257_v49 }
0x1b99   :  { %4866 = vmatmul.mubr.msk.bf16.vlgmr.msra.gmra.mxu0 %vm1668_vm4, %v3258_v42 }
0x1b9a   :  { %4878 = vmatpush3.bf16.msra.mxu0 %v6035_v20  ;;  %4881 = vmatprep.mubr.msk.bf16.mxu0 %vm5386_vm0, %v5385_v1 }
0x1b9b   :  { %4879 = vmatprep.subr.bf16.mxu0 %v5385_v1 }
0x1b9e   :  { %4880 = vmatpush3.bf16.msra.mxu0 %v6039_v38 }
0x1b9f   :  { %4885 = vmatprep.subr.bf16.mxu0 %v5385_v1 }
0x1c59   :  { %v3296_v58 = vpop.f32.mrf.mxu0 }
0x1c5a   :  { %v3337_v46 = vadd.f32 %v3336_v31, %v3296_v58 }
0x1c5b   :  { %v4867_v16 = vpop.f32.mrf.mxu0 }
0x1c5c   :  { %v3342_v26 = vadd.f32 %v3337_v46, %v6043_v53 }
0x1c5d   :  { %v3299_v7 = vpop.f32.mrf.mxu0 }
0x1c5e   :  { %5176 = vtanh.f32 %v3342_v26 }
0x1c5f   :  { %v4868_v4 = vpop.f32.mrf.mxu0 }
0x1c6b   :  { %v5177_v5 = vpop.eup %5176 }
0x1c6c   :  { %v3344_v48 = vpack.c.bf16 %v5177_v5, %v5177_v5 }
0x1c6e   :  { %4882 = vmatmul.mubr.msk.bf16.vlgmr.msra.gmra.mxu0 %vm106_vm2, %v3344_v48 }
0x1c6f   :  { %4886 = vmatpush3.bf16.msra.mxu0 %v5915_v52  ;;  %4889 = vmatprep.mubr.msk.bf16.mxu0 %vm5386_vm0, %v5385_v1 }
0x1c70   :  { %4887 = vmatprep.subr.bf16.mxu0 %v5385_v1 }
0x1c73   :  { %4888 = vmatpush3.bf16.msra.mxu0 %v5917_v56 }
0x1c74   :  { %4893 = vmatprep.subr.bf16.mxu0 %v5385_v1 }
0x1d2e   :  { %v3382_v21 = vpop.f32.mrf.mxu0 }
0x1d2f   :  { %v6231_v33 = vadd.f32 %v3382_v21, %v6053_v27 }
0x1d30   :  { %v4883_v57 = vpop.f32.mrf.mxu0 }
0x1d31   :  { %v3388_v18 = vsel %vm2578_vm11, %v6231_v33, -inf }
0x1d32   :  { %3389 = vmax.xlane.f32.xlu0 %v3388_v18  ;;  %v3385_v61 = vpop.f32.mrf.mxu0 }
0x1d34   :  { %v4884_v14 = vpop.f32.mrf.mxu0 }
0x1dbb   :  { %v6235_v15 = vpop.xlane.xlu0 %3389 }
0x1dbc   :  { %vm3398_vm6 = vcmp.eq.f32.partialorder %v6231_v33, %v6235_v15 }
0x1dbd   :  { %v3399_v28 = vsel %vm3398_vm6, %v5448_v10, 32 }
0x1dbe   :  { %v3400_v29 = vsel %vm2578_vm11, %v3399_v28, 2147483647 }
0x1dbf   :  { %v3402_v30 = vshra.s32 %v3400_v29, 16  ;;  %v3401_v34 = vand.u32 65535, %v3400_v29 }
0x1dc1   :  { %v3404_v31 = vcvt.s32.f32 %v3402_v30  ;;  %v3403_v36 = vcvt.s32.f32 %v3401_v34 }
0x1dc3   :  { %3405 = vmin.xlane.f32.xlu1 %v3404_v31 }
0x1e4c   :  { %v3406_v35 = vpop.xlane.xlu1 %3405 }
0x1e4d   :  { %vm3407_vm7 = vcmp.eq.f32.partialorder %v3404_v31, %v3406_v35  ;;  %v3412_v44 = vcvt.f32.s32 %v3406_v35 }
0x1e4e   :  { %v3408_v6 = vsel %vm3407_vm7, %v3403_v36, inf }
0x1e4f   :  { %3409 = vmin.xlane.f32.xlu0 %v3408_v6  ;;  %v3413_v9 = vshll.u32 %v3412_v44, 16 }
0x1ed8   :  { %v3410_v51 = vpop.xlane.xlu0 %3409 }
0x1ed9   :  { %v3411_v63 = vcvt.f32.s32 %v3410_v51 }
0x1edb   :  { %v3414_v55 = vadd.s32 %v3413_v9, %v3411_v63 }
0x1edd   :  { %v6245_v41 = vsel %vm3415_vm9, %v3414_v55, %v6157_v17  ;;  %vm3418_vm12 = vcmp.eq.s32.totalorder %v5448_v10, %v3414_v55 }
0x1ede   :  { %v4400_v49 = vsel %vm3418_vm12, 1.0, %v5385_v1 }
0x1edf   :  { %v3421_v42 = vpack.c.bf16 %v4400_v49, %v4400_v49 }
0x1ee1   :  { %4401 = vmatmul.mubr.msk.bf16.vlgmr.msra.gmra.mxu1 %vm106_vm2, %v3421_v42  ;;  %4890 = vmatmul.mubr.msk.bf16.vlgmr.msra.gmra.mxu0 %vm106_vm2, %v3421_v42 }
0x1ee2   :  { %3519 = vmatpush1.bf16.msra.mxu1 %v5963_v39  ;;  %4894 = vmatpush3.bf16.msra.mxu0 %v5925_v60 }
0x1ee3   :  { %3520 = vmatprep.subr.bf16.mxu1 %v5967_v24  ;;  %4895 = vmatprep.subr.bf16.mxu0 %v5385_v1 }
0x1ee4   :  { %3538 = vmatprep.mubr.bf16.mxu1 %v5384_v0  ;;  %4897 = vmatprep.mubr.msk.bf16.mxu0 %vm5386_vm0, %v5385_v1 }
0x1ee6   :  { %3521 = vmatpush1.bf16.msra.mxu1 %v5971_v40  ;;  %4896 = vmatpush3.bf16.msra.mxu0 %v5934_v11 }
0x1ee7   :  { %4901 = vmatprep.subr.bf16.mxu1 %v5385_v1  ;;  %4909 = vmatprep.subr.bf16.mxu0 %v5385_v1 }
0x1ee9   :  { %4403 = vmatmul.mubr.msk.bf16.vlgmr.msra.gmra.mxu1 %vm106_vm2, %v6196_v22  ;;  %4898 = vmatmul.mubr.msk.bf16.vlgmr.msra.gmra.mxu0 %vm106_vm2, %v6196_v22 }
0x1eea   :  { %4902 = vmatpush3.bf16.msra.mxu1 %v5979_v2  ;;  %4910 = vmatpush3.bf16.msra.mxu0 %v5954_v62 }
0x1eeb   :  { %4903 = vmatprep.subr.bf16.mxu1 %v5385_v1  ;;  %4905 = vmatprep.mubr.msk.bf16.mxu1 %vm5386_vm0, %v5385_v1 }
0x1eec   :  { %4911 = vmatprep.mubr.msk.bf16.mxu0 %vm5386_vm0, %v5385_v1  ;;  %4923 = vmatprep.subr.bf16.mxu0 %v5385_v1 }
0x1eee   :  { %4904 = vmatpush3.bf16.msra.mxu1 %v5988_v47 }
0x1eef   :  { %4915 = vmatprep.subr.bf16.mxu1 %v5385_v1 }
0x1fa1   :  { %v3459_v60 = vpop.f32.mrf.mxu1  ;;  %v3500_v11 = vpop.f32.mrf.mxu0 }
0x1fa3   :  { %v3461_v39 = vpop.f32.mrf.mxu1  ;;  %v4891_v24 = vpop.f32.mrf.mxu0 }
0x1fa5   :  { %v3463_v40 = vpop.f32.mrf.mxu1  ;;  %v3503_v17 = vpop.f32.mrf.mxu0 }
0x1fa7   :  { %v3464_v22 = vpop.f32.mrf.mxu1  ;;  %v4892_v58 = vpop.f32.mrf.mxu0 }
0x1fa9   :  { %v3540_v46 = vpop.f32.mrf.mxu1  ;;  %v3581_v16 = vpop.f32.mrf.mxu0 }
0x1faa   :  { %v3541_v26 = vadd.f32 %v3540_v46, %v5993_v43  ;;  %v3582_v36 = vadd.f32 %v3581_v16, %v6001_v45 }
0x1fab   :  { %v3542_v7 = vpop.f32.mrf.mxu1  ;;  %v4899_v4 = vpop.f32.mrf.mxu0 }
0x1fac   :  { %v3587_v5 = vadd.f32 %v3541_v26, %v3459_v60  ;;  %v3543_v18 = vadd.f32 %v3542_v7, %v5997_v37 }
0x1fad   :  { %v3544_v48 = vpop.f32.mrf.mxu1  ;;  %v3584_v21 = vpop.f32.mrf.mxu0 }
0x1fae   :  { %v4405_v57 = vmul.f32 -1.442695, %v3587_v5  ;;  %v3594_v28 = vadd.f32 %v3543_v18, %v3461_v39 }
0x1faf   :  { %v3545_v61 = vpop.f32.mrf.mxu1  ;;  %v4900_v14 = vpop.f32.mrf.mxu0 }
0x1fb0   :  { %5178 = vpow2.f32 %v4405_v57  ;;  %v4406_v29 = vmul.f32 -1.442695, %v3594_v28 }
0x1fb2   :  { %5180 = vpow2.f32 %v4406_v29 }
0x1fbd   :  { %v5179_v30 = vpop.eup %5178 }
0x1fbe   :  { %v3591_v31 = vadd.f32 1.0, %v5179_v30 }
0x1fbf   :  { %v5181_v34 = vpop.eup %5180 }
0x1fc0   :  { %5182 = vrcp.f32 %v3591_v31  ;;  %v3598_v35 = vadd.f32 1.0, %v5181_v34 }
0x1fc2   :  { %5184 = vrcp.f32 %v3598_v35 }
0x1fcd   :  { %v5183_v6 = vpop.eup %5182 }
0x1fce   :  { %v3601_v44 = vmul.f32 %v5183_v6, %v3582_v36 }
0x1fcf   :  { %v5185_v9 = vpop.eup %5184 }
0x1fd0   :  { %v3602_v51 = vadd.f32 %v3601_v44, %v3500_v11  ;;  %v3604_v63 = vsub.f32 1.0, %v5185_v9  ;;  %v3606_v42 = vmul.f32 %v5185_v9, %v6192_v23 }
0x1fd2   :  { %5186 = vtanh.f32 %v3602_v51 }
0x1fdf   :  { %v5187_v55 = vpop.eup %5186 }
0x1fe0   :  { %v3605_v49 = vmul.f32 %v5187_v55, %v3604_v63 }
0x1fe2   :  { %v6280_v60 = vadd.f32 %v3606_v42, %v3605_v49 }
0x1fe4   :  { %v6284_v39 = vpack.c.bf16 %v6280_v60, %v6280_v60 }
0x1fe6   :  { %4906 = vmatmul.mubr.msk.bf16.vlgmr.msra.gmra.mxu1 %vm106_vm2, %v6284_v39 }
0x1fe7   :  { %4916 = vmatpush3.bf16.msra.mxu1 %v6007_v50  ;;  %4919 = vmatprep.mubr.msk.bf16.mxu1 %vm5386_vm0, %v5385_v1  ;;  %v5232_v50 = vld [vmem:[#allocation5 + $0x16c] ss:$12 sps:$4 sm:$0xff]  }
0x1fe8   :  { %4917 = vmatprep.subr.bf16.mxu1 %v5385_v1 }
0x1feb   :  { %4918 = vmatpush3.bf16.msra.mxu1 %v6016_v59 }
0x1fec   :  { %3842 = vmatprep.subr.bf16.mxu1 %v5939_v19 }
0x1fee   :  { %4920 = vmatmul.mubr.msk.bf16.vlgmr.msra.gmra.mxu1 %vm106_vm2, %v6284_v39 }
0x1fef   :  { %3843 = vmatpush1.bf16.msra.mxu1 %v5943_v8  ;;  %3862 = vmatprep.mubr.bf16.mxu1 %v5384_v0 }
0x1ff0   :  { %3844 = vmatprep.subr.bf16.mxu1 %v5945_v3 }
0x1ff3   :  { %3845 = vmatpush1.bf16.msra.mxu1 %v5956_v25 }
0x1ff4   :  { %3923 = vmatprep.subr.bf16.mxu1 %v5232_v50 }
0x20a6   :  { %v3646_v23 = vpop.f32.mrf.mxu1 }
0x20a7   :  { %v3652_v11 = vsel %vm2408_vm10, %v3646_v23, -inf }
0x20a8   :  { %3653 = vmax.xlane.f32.xlu1 %v3652_v11  ;;  %v4907_v59 = vpop.f32.mrf.mxu1 }
0x20aa   :  { %v3649_v24 = vpop.f32.mrf.mxu1 }
0x20ab   :  { %v5233_v24 = vld [vmem:[#allocation5 + $0x168] ss:$12 sps:$4 sm:$0xff]  }
0x20ac   :  { %v4908_v19 = vpop.f32.mrf.mxu1 }
0x20ad   :  { %v5234_v19 = vld [vmem:[#allocation5 + $0x170] ss:$12 sps:$4 sm:$0xff]  }
0x20ae   :  { %v3741_v40 = vpop.f32.mrf.mxu1 }
0x20b0   :  { %v4921_v17 = vpop.f32.mrf.mxu1 }
0x20b1   :  { %v5237_v17 = vld [vmem:[#allocation5 + $0x158] ss:$12 sps:$4 sm:$0xff]  }
0x20b2   :  { %v3744_v22 = vpop.f32.mrf.mxu1 }
0x20b4   :  { %v4922_v58 = vpop.f32.mrf.mxu1 }
0x2131   :  { %v3654_v8 = vpop.xlane.xlu1 %3653 }
0x2132   :  { %v3655_v46 = vsub.f32 %v3646_v23, %v3654_v8 }
0x2134   :  { %v3656_v16 = vmul.f32 1.442695, %v3655_v46 }
0x2136   :  { %5188 = vpow2.f32 %v3656_v16 }
0x2143   :  { %v5189_v3 = vpop.eup %5188 }
0x2144   :  { %v3658_v25 = vsel %vm2408_vm10, %v5189_v3, 0.0 }
0x2145   :  { %3659 = vadd.xlane.f32.xlu0 %v3658_v25 }
0x21ce   :  { %v3660_v26 = vpop.xlane.xlu0 %3659 }
0x21cf   :  { %5190 = vrcp.f32 %v3660_v26 }
0x21dc   :  { %v5191_v7 = vpop.eup %5190 }
0x21dd   :  { %v3662_v4 = vmul.f32 %v5191_v7, %v5189_v3 }
0x21df   :  { %v3663_v5 = vpack.c.bf16 %v3662_v4, %v3662_v4 }
0x21e1   :  { %4912 = vmatmul.mubr.msk.bf16.vlgmr.msra.gmra.mxu0 %vm1668_vm4, %v3663_v5 }
0x21e2   :  { %4924 = vmatpush3.bf16.msra.mxu0 %v6035_v20  ;;  %4927 = vmatprep.mubr.msk.bf16.mxu0 %vm5386_vm0, %v5385_v1 }
0x21e3   :  { %4925 = vmatprep.subr.bf16.mxu0 %v5385_v1 }
0x21e6   :  { %4926 = vmatpush3.bf16.msra.mxu0 %v6039_v38 }
0x21e7   :  { %4931 = vmatprep.subr.bf16.mxu0 %v5385_v1 }
0x22a1   :  { %v3701_v48 = vpop.f32.mrf.mxu0 }
0x22a2   :  { %v3742_v21 = vadd.f32 %v3741_v40, %v3701_v48  ;;  %v5235_v40 = vld [vmem:[#allocation5 + $0x154] ss:$12 sps:$4 sm:$0xff]  }
0x22a3   :  { %v4913_v57 = vpop.f32.mrf.mxu0 }
0x22a4   :  { %v3747_v18 = vadd.f32 %v3742_v21, %v6043_v53 }
0x22a5   :  { %v3704_v61 = vpop.f32.mrf.mxu0 }
0x22a6   :  { %5192 = vtanh.f32 %v3747_v18 }
0x22a7   :  { %v4914_v14 = vpop.f32.mrf.mxu0 }
0x22b3   :  { %v5193_v28 = vpop.eup %5192 }
0x22b4   :  { %v3749_v29 = vpack.c.bf16 %v5193_v28, %v5193_v28 }
0x22b6   :  { %4928 = vmatmul.mubr.msk.bf16.vlgmr.msra.gmra.mxu0 %vm106_vm2, %v3749_v29 }
0x22b7   :  { %4932 = vmatpush3.bf16.msra.mxu0 %v5915_v52  ;;  %4935 = vmatprep.mubr.msk.bf16.mxu0 %vm5386_vm0, %v5385_v1 }
0x22b8   :  { %4933 = vmatprep.subr.bf16.mxu0 %v5385_v1 }
0x22bb   :  { %4934 = vmatpush3.bf16.msra.mxu0 %v5917_v56 }
0x22bc   :  { %4939 = vmatprep.subr.bf16.mxu0 %v5385_v1 }
0x2376   :  { %v3787_v20 = vpop.f32.mrf.mxu0 }
0x2377   :  { %v6318_v38 = vadd.f32 %v3787_v20, %v6053_v27 }
0x2378   :  { %v4929_v53 = vpop.f32.mrf.mxu0 }
0x2379   :  { %v3793_v30 = vsel %vm2578_vm11, %v6318_v38, -inf }
0x237a   :  { %3794 = vmax.xlane.f32.xlu1 %v3793_v30  ;;  %v3790_v31 = vpop.f32.mrf.mxu0 }
0x237c   :  { %v4930_v52 = vpop.f32.mrf.mxu0 }
0x2403   :  { %v6322_v34 = vpop.xlane.xlu1 %3794 }
0x2404   :  { %vm3803_vm13 = vcmp.eq.f32.partialorder %v6318_v38, %v6322_v34 }
0x2405   :  { %v3804_v56 = vsel %vm3803_vm13, %v5448_v10, 32 }
0x2406   :  { %v3805_v35 = vsel %vm2578_vm11, %v3804_v56, 2147483647 }
0x2407   :  { %v3807_v36 = vshra.s32 %v3805_v35, 16  ;;  %v3806_v27 = vand.u32 65535, %v3805_v35 }
0x2409   :  { %v3809_v6 = vcvt.s32.f32 %v3807_v36  ;;  %v3808_v51 = vcvt.s32.f32 %v3806_v27 }
0x240b   :  { %3810 = vmin.xlane.f32.xlu0 %v3809_v6 }
0x2494   :  { %v3811_v44 = vpop.xlane.xlu0 %3810 }
0x2495   :  { %vm3812_vm14 = vcmp.eq.f32.partialorder %v3809_v6, %v3811_v44  ;;  %v3817_v63 = vcvt.f32.s32 %v3811_v44 }
0x2496   :  { %v3813_v9 = vsel %vm3812_vm14, %v3808_v51, inf  ;;  %v5238_v51 = vld [vmem:[#allocation7 + $0x8] sm:$0xff]  }
0x2497   :  { %3814 = vmin.xlane.f32.xlu1 %v3813_v9  ;;  %v3818_v49 = vshll.u32 %v3817_v63, 16 }
0x2520   :  { %v3815_v55 = vpop.xlane.xlu1 %3814 }
0x2521   :  { %v3816_v42 = vcvt.f32.s32 %v3815_v55 }
0x2523   :  { %v3819_v50 = vadd.s32 %v3818_v49, %v3816_v42 }
0x2525   :  { %vm3823_vm1 = vcmp.eq.s32.totalorder %v5448_v10, %v3819_v50  ;;  %v6333_v23 = vsel %vm3820_vm15, %v3819_v50, %v6245_v41  ;;  %v5236_v41 = vld [vmem:[#allocation5 + $0x150] ss:$12 sps:$4 sm:$0xff]  }
0x2526   :  { %v4411_v11 = vsel %vm3823_vm1, 1.0, %v5385_v1 }
0x2527   :  { %v3826_v59 = vpack.c.bf16 %v4411_v11, %v4411_v11 }
0x2529   :  { %4412 = vmatmul.mubr.msk.bf16.vlgmr.msra.gmra.mxu1 %vm106_vm2, %v3826_v59  ;;  %4936 = vmatmul.mubr.msk.bf16.vlgmr.msra.gmra.mxu0 %vm106_vm2, %v3826_v59 }
0x252a   :  { %3924 = vmatpush1.bf16.msra.mxu1 %v5233_v24  ;;  %4940 = vmatpush3.bf16.msra.mxu0 %v5234_v19 }
0x252b   :  { %3925 = vmatprep.subr.bf16.mxu1 %v5235_v40  ;;  %4941 = vmatprep.subr.bf16.mxu0 %v5385_v1 }
0x252c   :  { %3943 = vmatprep.mubr.bf16.mxu1 %v5384_v0  ;;  %4943 = vmatprep.mubr.msk.bf16.mxu0 %vm5386_vm0, %v5385_v1 }
0x252e   :  { %3926 = vmatpush1.bf16.msra.mxu1 %v5236_v41  ;;  %4942 = vmatpush3.bf16.msra.mxu0 %v5237_v17 }
0x252f   :  { %4947 = vmatprep.subr.bf16.mxu1 %v5385_v1  ;;  %4955 = vmatprep.subr.bf16.mxu0 %v5385_v1 }
0x2531   :  { %4414 = vmatmul.mubr.msk.bf16.vlgmr.msra.gmra.mxu1 %vm106_vm2, %v6284_v39  ;;  %4944 = vmatmul.mubr.msk.bf16.vlgmr.msra.gmra.mxu0 %vm106_vm2, %v6284_v39 }
0x2532   :  { %4948 = vmatpush3.bf16.msra.mxu1 %v5979_v2  ;;  %4956 = vmatpush3.bf16.msra.mxu0 %v5954_v62 }
0x2533   :  { %4949 = vmatprep.subr.bf16.mxu1 %v5385_v1  ;;  %4951 = vmatprep.mubr.msk.bf16.mxu1 %vm5386_vm0, %v5385_v1 }
0x2534   :  { %4957 = vmatprep.mubr.msk.bf16.mxu0 %vm5386_vm0, %v5385_v1  ;;  %4969 = vmatprep.subr.bf16.mxu0 %v5385_v1 }
0x2536   :  { %4950 = vmatpush3.bf16.msra.mxu1 %v5988_v47 }
0x2537   :  { %4961 = vmatprep.subr.bf16.mxu1 %v5385_v1 }
0x25e9   :  { %v3864_v0 = vpop.f32.mrf.mxu1  ;;  %v3905_v39 = vpop.f32.mrf.mxu0 }
0x25eb   :  { %v3866_v22 = vpop.f32.mrf.mxu1  ;;  %v4937_v2 = vpop.f32.mrf.mxu0 }
0x25ed   :  { %v3868_v58 = vpop.f32.mrf.mxu1  ;;  %v3908_v62 = vpop.f32.mrf.mxu0 }
0x25ee   :  { %v5240_v58 = vld [vmem:[#allocation7 + $0x28] sm:$0xff]   ;;  %v5241_v62 = vld [vmem:[#allocation7 + $0x20] sm:$0xff]  }
0x25ef   :  { %v3869_v8 = vpop.f32.mrf.mxu1  ;;  %v4938_v46 = vpop.f32.mrf.mxu0 }
0x25f1   :  { %v3945_v16 = vpop.f32.mrf.mxu1  ;;  %v3986_v3 = vpop.f32.mrf.mxu0 }
0x25f2   :  { %v3946_v25 = vadd.f32 %v3945_v16, %v5993_v43  ;;  %v3987_v43 = vadd.f32 %v3986_v3, %v6001_v45  ;;  %v5239_v45 = vld [vmem:[#allocation7] sm:$0xff]   ;;  %v5242_v3 = vld [vmem:[#allocation8 + $0xc] sm:$0x7] }
0x25f3   :  { %v3947_v26 = vpop.f32.mrf.mxu1  ;;  %v4945_v7 = vpop.f32.mrf.mxu0 }
0x25f4   :  { %v3992_v4 = vadd.f32 %v3946_v25, %v3864_v0  ;;  %v3948_v21 = vadd.f32 %v3947_v26, %v5997_v37 }
0x25f5   :  { %v3949_v5 = vpop.f32.mrf.mxu1  ;;  %v3989_v48 = vpop.f32.mrf.mxu0 }
0x25f6   :  { %v4416_v47 = vmul.f32 -1.442695, %v3992_v4  ;;  %v3999_v61 = vadd.f32 %v3948_v21, %v3866_v22  ;;  %v2582_v48 = vsub.f32 %v6056_v13, %v6060_v12 }
0x25f7   :  { %v3950_v57 = vpop.f32.mrf.mxu1  ;;  %v4946_v18 = vpop.f32.mrf.mxu0 }
0x25f8   :  { %5194 = vpow2.f32 %v4416_v47  ;;  %v4417_v14 = vmul.f32 -1.442695, %v3999_v61  ;;  %v2583_v47 = vmul.f32 1.442695, %v2582_v48  ;;  %v5243_v18 = vld [vmem:[#allocation8 + $0xf] sm:$0x7] }
0x25fa   :  { %5196 = vpow2.f32 %v4417_v14 }
0x2605   :  { %v5195_v28 = vpop.eup %5194 }
0x2606   :  { %v3996_v29 = vadd.f32 1.0, %v5195_v28 }
0x2607   :  { %v5197_v20 = vpop.eup %5196 }
0x2608   :  { %5198 = vrcp.f32 %v3996_v29  ;;  %v4003_v53 = vadd.f32 1.0, %v5197_v20 }
0x260a   :  { %5200 = vrcp.f32 %v4003_v53 }
0x2615   :  { %v5199_v30 = vpop.eup %5198 }
0x2616   :  { %v4006_v31 = vmul.f32 %v5199_v30, %v3987_v43  ;;  %v3796_v30 = vsub.f32 %v6318_v38, %v6322_v34 }
0x2617   :  { %v5201_v56 = vpop.eup %5200 }
0x2618   :  { %v4007_v52 = vadd.f32 %v4006_v31, %v3905_v39  ;;  %v4009_v37 = vsub.f32 1.0, %v5201_v56  ;;  %v4011_v6 = vmul.f32 %v5201_v56, %v6280_v60  ;;  %v3797_v31 = vmul.f32 1.442695, %v3796_v30 }
0x261a   :  { %5202 = vtanh.f32 %v4007_v52 }
0x2627   :  { %v5203_v35 = vpop.eup %5202 }
0x2628   :  { %v4010_v36 = vmul.f32 %v5203_v35, %v4009_v37 }
0x262a   :  { %v4012_v27 = vadd.f32 %v4011_v6, %v4010_v36 }
0x262c   :  { %v4013_v44 = vpack.c.bf16 %v4012_v27, %v4012_v27 }
0x262e   :  { %4952 = vmatmul.mubr.msk.bf16.vlgmr.msra.gmra.mxu1 %vm106_vm2, %v4013_v44 }
0x262f   :  { %4962 = vmatpush3.bf16.msra.mxu1 %v5238_v51  ;;  %4965 = vmatprep.mubr.msk.bf16.mxu1 %vm5386_vm0, %v5385_v1 }
0x2630   :  { %4963 = vmatprep.subr.bf16.mxu1 %v5385_v1 }
0x2633   :  { %4964 = vmatpush3.bf16.msra.mxu1 %v5239_v45 }
0x2636   :  { %4966 = vmatmul.mubr.msk.bf16.vlgmr.msra.gmra.mxu1 %vm106_vm2, %v4013_v44 }
0x26ee   :  { %v4051_v9 = vpop.f32.mrf.mxu1 }
0x26ef   :  { %v4057_v63 = vsel %vm2408_vm10, %v4051_v9, -inf }
0x26f0   :  { %4058 = vmax.xlane.f32.xlu0 %v4057_v63  ;;  %v4953_v60 = vpop.f32.mrf.mxu1 }
0x26f2   :  { %v4054_v55 = vpop.f32.mrf.mxu1 }
0x26f4   :  { %v4954_v49 = vpop.f32.mrf.mxu1 }
0x26f6   :  { %v4146_v42 = vpop.f32.mrf.mxu1 }
0x26f8   :  { %v4967_v50 = vpop.f32.mrf.mxu1 }
0x26fa   :  { %v4149_v11 = vpop.f32.mrf.mxu1 }
0x26fc   :  { %v4968_v59 = vpop.f32.mrf.mxu1 }
0x2779   :  { %v4059_v24 = vpop.xlane.xlu0 %4058 }
0x277a   :  { %v4060_v19 = vsub.f32 %v4051_v9, %v4059_v24 }
0x277c   :  { %v4061_v40 = vmul.f32 1.442695, %v4060_v19 }
0x277e   :  { %5204 = vpow2.f32 %v4061_v40 }
0x278b   :  { %v5205_v41 = vpop.eup %5204 }
0x278c   :  { %v4063_v17 = vsel %vm2408_vm10, %v5205_v41, 0.0  ;;  %vm4228_vm10 = vcmask 32768  }
0x278d   :  { %4064 = vadd.xlane.f32.xlu1 %v4063_v17 }
0x2816   :  { %v4065_v0 = vpop.xlane.xlu1 %4064 }
0x2817   :  { %5206 = vrcp.f32 %v4065_v0 }
0x2824   :  { %v5207_v39 = vpop.eup %5206 }
0x2825   :  { %v4067_v22 = vmul.f32 %v5207_v39, %v5205_v41 }
0x2827   :  { %v4068_v2 = vpack.c.bf16 %v4067_v22, %v4067_v22 }
0x2829   :  { %4958 = vmatmul.mubr.msk.bf16.vlgmr.msra.gmra.mxu0 %vm1668_vm4, %v4068_v2  ;;  %vm4225_vm4 = vcmp.eq.s32.totalorder %v5448_v10, 4 }
0x282a   :  { %4970 = vmatpush3.bf16.msra.mxu0 %v5240_v58  ;;  %4973 = vmatprep.mubr.msk.bf16.mxu0 %vm5386_vm0, %v5385_v1 }
0x282b   :  { %4971 = vmatprep.subr.bf16.mxu0 %v5385_v1  ;;  %v3391_v1 = vsub.f32 %v6231_v33, %v6235_v15  ;;  %v2987_v33 = vsub.f32 %v6141_v32, %v6145_v54 }
0x282d   :  { %v3392_v21 = vmul.f32 1.442695, %v3391_v1  ;;  %v2988_v15 = vmul.f32 1.442695, %v2987_v33 }
0x282e   :  { %4972 = vmatpush3.bf16.msra.mxu0 %v5241_v62 }
0x28e9   :  { %v4106_v8 = vpop.f32.mrf.mxu0 }
0x28ea   :  { %v4147_v46 = vadd.f32 %v4146_v42, %v4106_v8 }
0x28eb   :  { %v4959_v16 = vpop.f32.mrf.mxu0 }
0x28ec   :  { %v4152_v25 = vadd.f32 %v5242_v3, %v4147_v46 }
0x28ed   :  { %v4109_v26 = vpop.f32.mrf.mxu0 }
0x28ee   :  { %5208 = vtanh.f32 %v4152_v25 }
0x28ef   :  { %v4960_v7 = vpop.f32.mrf.mxu0  ;;  %5210 = vpow2.f32 %v2583_v47 }
0x28f0   :  { %5212 = vpow2.f32 %v3392_v21 }
0x28f1   :  { %5214 = vpow2.f32 %v2988_v15 }
0x28f2   :  { %5216 = vpow2.f32 %v3797_v31 }
0x28fb   :  { %v5209_v4 = vpop.eup %5208 }
0x28fc   :  { %v4154_v5 = vpack.c.bf16 %v5209_v4, %v5209_v4  ;;  %v5211_v29 = vpop.eup %5210 }
0x28fd   :  { %v2585_v43 = vsel %vm2578_vm11, %v5211_v29, 0.0  ;;  %v5213_v13 = vpop.eup %5212 }
0x28fe   :  { %4974 = vmatmul.mubr.msk.bf16.vlgmr.msra.gmra.mxu0 %vm106_vm2, %v4154_v5  ;;  %v3394_v12 = vsel %vm2578_vm11, %v5213_v13, 0.0  ;;  %v5215_v44 = vpop.eup %5214 }
0x28ff   :  { %v2990_v32 = vsel %vm2578_vm11, %v5215_v44, 0.0  ;;  %v5217_v54 = vpop.eup %5216 }
0x2900   :  { %v3799_v38 = vsel %vm2578_vm11, %v5217_v54, 0.0 }
0x29be   :  { %v4192_v57 = vpop.f32.mrf.mxu0 }
0x29bf   :  { %v4193_v61 = vadd.f32 %v5243_v18, %v4192_v57 }
0x29c0   :  { %v4975_v14 = vpop.f32.mrf.mxu0 }
0x29c1   :  { %v4198_v28 = vsel %vm2578_vm11, %v4193_v61, -inf }
0x29c2   :  { %4199 = vmax.xlane.f32.xlu0 %v4198_v28  ;;  %v4195_v20 = vpop.f32.mrf.mxu0 }
0x29c4   :  { %v4976_v53 = vpop.f32.mrf.mxu0 }
0x29c6   :  { %2586 = vadd.xlane.f32.xlu0 %v2585_v43 }
0x29ca   :  { %3395 = vadd.xlane.f32.xlu0 %v3394_v12 }
0x2a4b   :  { %v4200_v52 = vpop.xlane.xlu0 %4199 }
0x2a4c   :  { %v4201_v56 = vsub.f32 %v4193_v61, %v4200_v52  ;;  %vm4208_vm0 = vcmp.eq.f32.partialorder %v4193_v61, %v4200_v52 }
0x2a4d   :  { %v4209_v37 = vsel %vm4208_vm0, %v5448_v10, 32 }
0x2a4e   :  { %v4202_v35 = vmul.f32 1.442695, %v4201_v56  ;;  %v4210_v36 = vsel %vm2578_vm11, %v4209_v37, 2147483647 }
0x2a4f   :  { %v4212_v6 = vshra.s32 %v4210_v36, 16  ;;  %v4211_v45 = vand.u32 65535, %v4210_v36  ;;  %v2587_v60 = vpop.xlane.xlu0 %2586 }
0x2a50   :  { %5218 = vpow2.f32 %v4202_v35 }
0x2a51   :  { %v4214_v27 = vcvt.s32.f32 %v4212_v6  ;;  %v4213_v63 = vcvt.s32.f32 %v4211_v45  ;;  %5220 = vrcp.f32 %v2587_v60 }
0x2a53   :  { %4215 = vmin.xlane.f32.xlu1 %v4214_v27  ;;  %v3396_v42 = vpop.xlane.xlu0 %3395 }
0x2a57   :  { %2991 = vadd.xlane.f32.xlu1 %v2990_v32 }
0x2a5b   :  { %3800 = vadd.xlane.f32.xlu1 %v3799_v38 }
0x2a5d   :  { %v5219_v34 = vpop.eup %5218 }
0x2a5e   :  { %v4204_v51 = vsel %vm2578_vm11, %v5219_v34, 0.0  ;;  %v5221_v59 = vpop.eup %5220 }
0x2a5f   :  { %4205 = vadd.xlane.f32.xlu0 %v4204_v51  ;;  %v2608_v19 = vsel %vm2606_vm3, %v5221_v59, 0.0 }
0x2adc   :  { %v4216_v9 = vpop.xlane.xlu1 %4215 }
0x2add   :  { %vm4217_vm2 = vcmp.eq.f32.partialorder %v4214_v27, %v4216_v9 }
0x2ade   :  { %v4218_v55 = vsel %vm4217_vm2, %v4213_v63, inf }
0x2adf   :  { %4219 = vmin.xlane.f32.xlu1 %v4218_v55 }
0x2ae0   :  { %v2992_v49 = vpop.xlane.xlu1 %2991 }
0x2ae1   :  { %5222 = vrcp.f32 %v2992_v49 }
0x2ae4   :  { %v3801_v50 = vpop.xlane.xlu1 %3800 }
0x2ae5   :  { %5224 = vrcp.f32 %v3801_v50 }
0x2ae6   :  { %5226 = vrcp.f32 %v3396_v42 }
0x2ae8   :  { %v4206_v11 = vpop.xlane.xlu0 %4205 }
0x2ae9   :  { %5228 = vrcp.f32 %v4206_v11 }
0x2aee   :  { %v5223_v24 = vpop.eup %5222 }
0x2aef   :  { %v3012_v40 = vsel %vm2115_vm8, %v5223_v24, %v2608_v19 }
0x2af2   :  { %v5225_v41 = vpop.eup %5224 }
0x2af3   :  { %v5227_v17 = vpop.eup %5226 }
0x2af4   :  { %v3417_v0 = vsel %vm3415_vm9, %v5227_v17, %v3012_v40 }
0x2af5   :  { %v3822_v22 = vsel %vm3820_vm15, %v5225_v41, %v3417_v0 }
0x2af6   :  { %v5229_v39 = vpop.eup %5228 }
0x2af7   :  { %v4227_v2 = vsel %vm4225_vm4, %v5229_v39, %v3822_v22 }
0x2af8   :  { %4230 = vst.msk [vmem:[#allocation11] sm:$0x1] %vm4228_vm10, %v4227_v2 }
0x2af9   :  { %5335 = shalt.err (!%p5332_p10)
}
0x2afa   :  { %4250 = dma.vmem_to_hbm [thread:$0]  %s4248_s4, 16, %s6418_s6, [#allocation12]   ;;  %v4222_v58 = vcvt.f32.s32 %v4216_v9 }
0x2afb   :  { %s5389_s26 = smov [#allocation10]  }
0x2afc   :  { %v4223_v8 = vshll.u32 %v4222_v58, 16  ;;  %s4237_s27 = sshll.u32 %s5389_s26, 4  ;;  %s4238_s27 = int_to_ptr.vmem [resolvable:$true] %s4237_s27 }
0x2afd   :  { %s5344_s28 = scalar_lea.vmem %s4238_s27, 16  ;;  %s5348_s29 = scalar_lea.vmem %s4238_s27, 32 }
0x2afe   :  { %p5345_p11 = scmp.ne.s32.totalorder %s4238_s27, %s5344_s28  ;;  %p5349_p12 = scmp.lt.s32.totalorder %s4238_s27, %s4238_s27 }
0x2aff   :  { %p5350_p13 = scmp.lt.s32.totalorder %s5348_s29, %s5344_s28 }
0x2b01   :  { %p5351_p0 = por %p5350_p13, %p5349_p12 }
0x2b03   :  { %p5352_p1 = pnand %p5351_p0, %p5345_p11 }
0x2b68   :  { %v4220_v62 = vpop.xlane.xlu1 %4219 }
0x2b69   :  { %v4221_v46 = vcvt.f32.s32 %v4220_v62 }
0x2b6b   :  { %v4224_v16 = vadd.s32 %v4223_v8, %v4221_v46 }
0x2b6d   :  { %v4226_v3 = vsel %vm4225_vm4, %v4224_v16, %v6333_v23 }
0x2b6e   :  { %4229 = vst.msk [vmem:[#allocation10] sm:$0x1] %vm4228_vm10, %v4226_v3 }
0x2b6f   :  { %5355 = shalt.err (!%p5352_p1)
}
0x2b70   :  { %4240 = dma.vmem_to_hbm [thread:$0]  %s4238_s27, 16, %s6417_s5, [#allocation4]  }
0x2b71   :  { %5370 = dma.done.wait [#allocation4], 16  }
0x2b72   :  { %5371 = vsyncadd [#allocation4], 4294967280 }
0x2b73   :  { %5372 = dma.done.wait [#allocation12], 16  }
0x2b74   :  { %5373 = vsyncadd [#allocation12], 4294967280 }
0x2b75   :  { %4257 = vsyncpa [#allocation3], 1 }
0x2b76   :  { %4258 = vsyncpa [#allocation6], 1 }
0x2b77   :  { %4259 = vsyncpa [#allocation9], 1 }
0x2b78   :  { %4260 = vsyncpa [#allocation4], 1 }
0x2b79   :  { %4261 = vsyncpa [#allocation12], 1 }

</bundles_post_ra>
